<compile_context>
chip_gen: v5e
topology: v5e:2x2
jax: 0.10.0
libtpu: 0.0.40
codegen_flags: <defaults>
</compile_context>

<pallas_src>
import functools

import jax
import jax.numpy as jnp
from jax.experimental import pallas as pl
from jax.experimental.pallas import tpu as pltpu


# MXU operand dtype for the large matmuls.  Set to jnp.bfloat16 on v6e/v7x for ~2-4x MXU
# throughput (accumulation stays f32 via preferred_element_type); relax the test tolerance
# to ~2e-2 if you flip this.  Elementwise math stays f32 (v5e has no bf16 VPU/EUP path).
MXU_OPERAND_DTYPE = jnp.float32

# Raised scoped-VMEM limit (v5e default is only 16 MiB).
VMEM_LIMIT_BYTES = 32 * 1024 * 1024

LN_EPS = 1e-5


def _round_up(x, m):
    return -(-x // m) * m


def _mxu_dot(a, b):
    return jnp.dot(a.astype(MXU_OPERAND_DTYPE), b.astype(MXU_OPERAND_DTYPE),
                   preferred_element_type=jnp.float32)


def _gelu_exact(x):
    # exact GELU: 0.5 * x * (1 + erf(x / sqrt(2)))   (nn.GELU() default)
    return 0.5 * x * (1.0 + jax.lax.erf(x * 0.7071067811865476))


def _layernorm(x2d, gamma, beta):
    mu = jnp.mean(x2d, axis=-1, keepdims=True)
    var = jnp.mean((x2d - mu) * (x2d - mu), axis=-1, keepdims=True)
    return (x2d - mu) * jax.lax.rsqrt(var + LN_EPS) * gamma + beta


# ----------------------------------------------------------------------------------------
# Kernel 1: one TransformerEncoderLayer (post-norm, ReLU FFN, eval mode) on an (S, Nb, D)
# block.  Attention runs over axis 0 (S), independently for every column of axis 1 -- this
# matches the module's batch_first=False usage.  Multi-head structure is handled without
# any lane-dim reshapes: the per-head score reduction and the head->lane broadcast are both
# matmuls against a 0/1 head-indicator matrix.
# ----------------------------------------------------------------------------------------
def transformer_layer_kernel(x_ref, wqkv_ref, bqkv_ref, wo_ref, bo_ref, ln1_ref,
                             w1_ref, b1_ref, w2_ref, b2_ref, ln2_ref,
                             hm_ref, hmT_ref, o_ref, *, num_heads):
    S, Nb, D = x_ref.shape
    dh = D // num_heads
    scale = 1.0 / (dh ** 0.5)

    # assemble the (small) attention axis into one lane-dense 2-D slab: (S*Nb, D)
    x2d = jnp.concatenate([x_ref[s] for s in range(S)], axis=0)

    q = (_mxu_dot(x2d, wqkv_ref[0]) + bqkv_ref[0]) * scale
    k = _mxu_dot(x2d, wqkv_ref[1]) + bqkv_ref[1]
    v = _mxu_dot(x2d, wqkv_ref[2]) + bqkv_ref[2]

    hm = hm_ref[...]     # (D, H)  head block-indicator (0/1)
    hmT = hmT_ref[...]   # (H, D)

    def rows(a, s):
        return a[s * Nb:(s + 1) * Nb, :]

    ctx_rows = []
    for s in range(S):                                   # query position along axis 0
        qs = rows(q, s)                                                   # (Nb, D)
        sc = [jnp.dot(qs * rows(k, t), hm, preferred_element_type=jnp.float32)
              for t in range(S)]                                          # each (Nb, H)
        m = sc[0]
        for t in range(1, S):
            m = jnp.maximum(m, sc[t])
        ex = [jnp.exp(s_t - m) for s_t in sc]
        denom = ex[0]
        for t in range(1, S):
            denom = denom + ex[t]
        inv = 1.0 / denom
        ctx_s = jnp.zeros((Nb, D), jnp.float32)
        for t in range(S):
            w_lane = jnp.dot(ex[t] * inv, hmT, preferred_element_type=jnp.float32)  # (Nb, D)
            ctx_s = ctx_s + w_lane * rows(v, t)
        ctx_rows.append(ctx_s)
    ctx = jnp.concatenate(ctx_rows, axis=0)                               # (S*Nb, D)

    sa = _mxu_dot(ctx, wo_ref[...]) + bo_ref[...]
    h = _layernorm(x2d + sa, ln1_ref[0], ln1_ref[1])

    ff = jnp.maximum(_mxu_dot(h, w1_ref[...]) + b1_ref[...], 0.0)         # ReLU FFN
    ff = _mxu_dot(ff, w2_ref[...]) + b2_ref[...]
    h = _layernorm(h + ff, ln2_ref[0], ln2_ref[1])

    for s in range(S):
        o_ref[s] = rows(h, s)


# ----------------------------------------------------------------------------------------
# Kernel 2: cnn_down + feature_down + time_down head, gridded over the batch axis.
# ----------------------------------------------------------------------------------------
def _shift_rows(z, row_idx, edge_row, roll_shift):
    """One-row shift of z along axis 0 with a zero fill at `edge_row`.

    `roll_shift` is the pltpu.roll amount realizing the shift; None selects a
    concatenate-based fallback (only used if pltpu.roll is unavailable)."""
    if roll_shift is None:
        zero = jnp.zeros((1, z.shape[1]), z.dtype)
        if edge_row == 0:
            return jnp.concatenate([zero, z[:-1, :]], axis=0)     # s[t] = z[t-1]
        return jnp.concatenate([z[1:, :], zero], axis=0)          # s[t] = z[t+1]
    return jnp.where(row_idx == edge_row, 0.0, pltpu.roll(z, shift=roll_shift, axis=0))


def cnn_head_kernel(x_ref, w1_ref, b1_ref, s1_ref, t1_ref,
                    w2_ref, b2_ref, s2_ref, t2_ref,
                    wfd_ref, bfd_ref, wt_ref, bt_ref, o_ref,
                    *, down_shift, up_shift):
    h = x_ref[0]                                                  # (T, D)
    T = h.shape[0]
    row_idx = jax.lax.broadcasted_iota(jnp.int32, (T, 1), 0)

    def conv_bn_gelu(h, w_ref, b_ref, s_ref, t_ref):
        # Conv1d(k=3, pad=1), channels-last: three MXU matmuls over the SAME operand, with
        # the per-tap outputs shifted by pltpu.roll (XLU slot) + boundary mask.
        z_prev = _mxu_dot(h, w_ref[0])            # tap contributed by h[t-1]
        z_mid = _mxu_dot(h, w_ref[1])             # tap contributed by h[t]
        z_next = _mxu_dot(h, w_ref[2])            # tap contributed by h[t+1]
        y = (z_mid
             + _shift_rows(z_prev, row_idx, 0, down_shift)
             + _shift_rows(z_next, row_idx, T - 1, up_shift)
             + b_ref[...])
        y = y * s_ref[...] + t_ref[...]           # BatchNorm1d folded (eval mode)
        return _gelu_exact(y)                     # Dropout == identity (eval mode)

    y = conv_bn_gelu(h, w1_ref, b1_ref, s1_ref, t1_ref)           # (T, D)
    y = conv_bn_gelu(y, w2_ref, b2_ref, s2_ref, t2_ref)           # (T, F)

    # feature_down: Linear(F, 1) as elementwise multiply + lane reduction (VPU/XLU).
    flat = jnp.sum(y * wfd_ref[...], axis=-1, keepdims=True) + bfd_ref[...]   # (T, 1)

    # time_down: Linear(T, OUT) + Tanh, as a sublane reduction against wt (T, OUT).
    out = jnp.sum(flat * wt_ref[...], axis=0, keepdims=True) + bt_ref[...]    # (1, OUT)
    o_ref[...] = jnp.tanh(out).astype(o_ref.dtype)


# ----------------------------------------------------------------------------------------
# pallas_call wrappers
# ----------------------------------------------------------------------------------------
def _const_spec(arr, pipeline_mode):
    shape = arr.shape
    index_map = lambda g, _r=len(shape): (0,) * _r
    if pipeline_mode is None:
        return pl.BlockSpec(shape, index_map)
    return pl.BlockSpec(shape, index_map, pipeline_mode=pipeline_mode)


_LAYER_KEYS = ("wqkv", "bqkv", "wo", "bo", "ln1", "w1", "b1", "w2", "b2", "ln2", "hm", "hmT")
_HEAD_KEYS = ("w1", "b1", "s1", "t1", "w2", "b2", "s2", "t2", "wfd", "bfd", "wt", "bt")


def transformer_encoder_layer(x, p, *, num_heads, nb, single_buffer_params=True):
    S, N, D = x.shape
    assert N % nb == 0
    pm = pl.Buffered(1) if single_buffer_params else None
    kernel = functools.partial(transformer_layer_kernel, num_heads=num_heads)
    return pl.pallas_call(
        kernel,
        out_shape=jax.ShapeDtypeStruct((S, N, D), jnp.float32),
        grid=(N // nb,),
        in_specs=[pl.BlockSpec((S, nb, D), lambda n: (0, n, 0))]
                 + [_const_spec(p[key], pm) for key in _LAYER_KEYS],
        out_specs=pl.BlockSpec((S, nb, D), lambda n: (0, n, 0)),
        compiler_params=pltpu.CompilerParams(
            dimension_semantics=("parallel",),          # blocks shard across TCs (megacore)
            vmem_limit_bytes=VMEM_LIMIT_BYTES),
    )(x, *(p[key] for key in _LAYER_KEYS))


def cnn_time_head(x, p, output_size, *, single_buffer_params=True, roll_convention=1):
    B, T, D = x.shape
    pm = pl.Buffered(1) if single_buffer_params else None
    if roll_convention == 0:
        down_shift = up_shift = None            # pltpu.roll unavailable -> concat fallback
    else:
        down_shift = 1 if roll_convention > 0 else T - 1      # realizes s[t] = z[t-1]
        up_shift = T - 1 if roll_convention > 0 else 1        # realizes s[t] = z[t+1]
    kernel = functools.partial(cnn_head_kernel, down_shift=down_shift, up_shift=up_shift)
    return pl.pallas_call(
        kernel,
        out_shape=jax.ShapeDtypeStruct((B, output_size), jnp.float32),
        grid=(B,),
        in_specs=[pl.BlockSpec((1, T, D), lambda b: (b, 0, 0))]
                 + [_const_spec(p[key], pm) for key in _HEAD_KEYS],
        out_specs=pl.BlockSpec((1, output_size), lambda b: (b, 0)),
        compiler_params=pltpu.CompilerParams(
            dimension_semantics=("parallel",),
            vmem_limit_bytes=VMEM_LIMIT_BYTES),
    )(x, *(p[key] for key in _HEAD_KEYS))


def resp_bert_attention_forward(hidden, layer_params, head_params, *, output_size,
                                num_heads, single_buffer_params=True, roll_convention=1,
                                n_block=128):
    """hidden = wav_model(**input_values)[0], shape (B, T, D)."""
    S, N, D = hidden.shape
    # nn.TransformerEncoder default batch_first=False => attention runs over dim 0 of (B,T,D)
    # and is independent along dim 1 (== T).  Tile dim 1 in blocks of `nb` columns so the
    # encoder kernel fits VMEM at production shapes (T=1499); pad once, slice once.
    nb = n_block if N >= n_block else _round_up(N, 8)
    n_pad = _round_up(N, nb)
    x = hidden
    if n_pad != N:
        x = jnp.pad(x, ((0, 0), (0, n_pad - N), (0, 0)))
    for p in layer_params:
        x = transformer_encoder_layer(x, p, num_heads=num_heads, nb=nb,
                                      single_buffer_params=single_buffer_params)
    if n_pad != N:
        x = x[:, :N, :]
    return cnn_time_head(x, head_params, output_size,
                         single_buffer_params=single_buffer_params,
                         roll_convention=roll_convention)


def probe_roll_convention():
    """Resolve pltpu.roll's axis-0 rotation direction once, on device.

    Returns +1 if pltpu.roll(x, 1, 0) matches jnp.roll (row t -> t+1), -1 if it rotates the
    other way, 0 if unavailable (the conv then falls back to a concatenate-based shift)."""
    def kernel(x_ref, o_ref):
        o_ref[...] = pltpu.roll(x_ref[...], shift=1, axis=0)
    try:
        x = jnp.tile(jnp.arange(8, dtype=jnp.float32).reshape(8, 1), (1, 128))
        y = pl.pallas_call(kernel, out_shape=jax.ShapeDtypeStruct((8, 128), jnp.float32))(x)
        first = float(jax.block_until_ready(y)[0, 0])
    except Exception:
        return 0
    if first == 7.0:
        return 1
    if first == 1.0:
        return -1
    return 0


# ----------------------------------------------------------------------------------------
# Pure-JAX reference (PyTorch semantics, eval mode)
# ----------------------------------------------------------------------------------------
def _ref_layernorm(x, g, b):
    mu = jnp.mean(x, axis=-1, keepdims=True)
    var = jnp.mean((x - mu) ** 2, axis=-1, keepdims=True)
    return (x - mu) / jnp.sqrt(var + LN_EPS) * g + b


def ref_transformer_layer(x, tp, num_heads):
    S, N, D = x.shape
    dh = D // num_heads
    w_in, b_in = tp["in_proj_w"], tp["in_proj_b"]
    q = (x @ w_in[:D].T + b_in[:D]).reshape(S, N, num_heads, dh)
    k = (x @ w_in[D:2 * D].T + b_in[D:2 * D]).reshape(S, N, num_heads, dh)
    v = (x @ w_in[2 * D:].T + b_in[2 * D:]).reshape(S, N, num_heads, dh)
    scores = jnp.einsum("snhd,tnhd->nhst", q, k) / jnp.sqrt(jnp.float32(dh))
    attn = jax.nn.softmax(scores, axis=-1)
    ctx = jnp.einsum("nhst,tnhd->snhd", attn, v).reshape(S, N, D)
    sa = ctx @ tp["out_proj_w"].T + tp["out_proj_b"]
    x = _ref_layernorm(x + sa, tp["ln1_g"], tp["ln1_b"])
    ff = jax.nn.relu(x @ tp["lin1_w"].T + tp["lin1_b"]) @ tp["lin2_w"].T + tp["lin2_b"]
    return _ref_layernorm(x + ff, tp["ln2_g"], tp["ln2_b"])


def ref_forward(hidden, torch_layers, conv1_w, conv1_b, s1, t1,
                conv2_w, conv2_b, s2, t2, fd_w, fd_b, time_w, time_b, *, num_heads):
    x = hidden
    for tp in torch_layers:
        x = ref_transformer_layer(x, tp, num_heads)

    def conv1d(h, w, b):   # h: (B, T, Cin); w: (Cout, Cin, 3) torch layout; padding=1
        T = h.shape[1]
        hp = jnp.pad(h, ((0, 0), (1, 1), (0, 0)))
        return sum(jnp.einsum("btd,ed->bte", hp[:, kk:kk + T], w[:, :, kk])
                   for kk in range(3)) + b

    y = conv1d(x, conv1_w, conv1_b)
    y = y * s1 + t1
    y = jax.nn.gelu(y, approximate=False)
    y = conv1d(y, conv2_w, conv2_b)
    y = y * s2 + t2
    y = jax.nn.gelu(y, approximate=False)
    flat = (y @ fd_w.T + fd_b)[..., 0]                 # (B, T)
    return jnp.tanh(flat @ time_w.T + time_b)          # (B, OUT)


# ----------------------------------------------------------------------------------------
if __name__ == "__main__":
    # Small stand-ins for production shapes (B, 1499, 768) and dim_feedforward=2048.
    B, T, D = 2, 16, 32          # wav_model output: (batch, frames, hidden_size)
    NHEAD = 16                   # fixed by the module (nhead=16); head_dim = D // 16
    FF = 64                      # TransformerEncoderLayer dim_feedforward stand-in
    N_LAYERS = 2                 # config['n_attion']
    FEAT = 48                    # config['hidden_units']
    OUT = 8                      # config['output_size']
    BN_EPS = 1e-5

    keys = iter(jax.random.split(jax.random.PRNGKey(0), 64))

    def rnd(shape, s=0.1):
        return s * jax.random.normal(next(keys), shape, jnp.float32)

    hidden = jax.random.normal(next(keys), (B, T, D), jnp.float32)

    torch_layers = []
    for _ in range(N_LAYERS):
        torch_layers.append(dict(
            in_proj_w=rnd((3 * D, D), 0.2), in_proj_b=rnd((3 * D,), 0.1),
            out_proj_w=rnd((D, D), 0.2), out_proj_b=rnd((D,), 0.1),
            ln1_g=1.0 + rnd((D,), 0.1), ln1_b=rnd((D,), 0.1),
            lin1_w=rnd((FF, D), 0.2), lin1_b=rnd((FF,), 0.1),
            lin2_w=rnd((D, FF), 0.2), lin2_b=rnd((D,), 0.1),
            ln2_g=1.0 + rnd((D,), 0.1), ln2_b=rnd((D,), 0.1),
        ))

    conv1_w = rnd((D, D, 3), 0.2); conv1_b = rnd((D,), 0.1)
    bn1_g = 1.0 + rnd((D,), 0.1); bn1_b = rnd((D,), 0.1)
    bn1_m = rnd((D,), 0.1); bn1_v = 1.0 + jnp.abs(rnd((D,), 0.1))
    conv2_w = rnd((FEAT, D, 3), 0.2); conv2_b = rnd((FEAT,), 0.1)
    bn2_g = 1.0 + rnd((FEAT,), 0.1); bn2_b = rnd((FEAT,), 0.1)
    bn2_m = rnd((FEAT,), 0.1); bn2_v = 1.0 + jnp.abs(rnd((FEAT,), 0.1))
    fd_w = rnd((1, FEAT), 0.2); fd_b = rnd((1,), 0.1)
    time_w = rnd((OUT, T), 0.2); time_b = rnd((OUT,), 0.1)

    # --- repack parameters for the kernels -------------------------------------------
    dh = D // NHEAD
    head_mask = (jnp.arange(D)[:, None] // dh
                 == jnp.arange(NHEAD)[None, :]).astype(jnp.float32)       # (D, H)

    def pack_layer(tp):
        w_in = tp["in_proj_w"]
        return dict(
            wqkv=jnp.stack([w_in[:D].T, w_in[D:2 * D].T, w_in[2 * D:].T], axis=0),
            bqkv=tp["in_proj_b"].reshape(3, 1, D),
            wo=tp["out_proj_w"].T, bo=tp["out_proj_b"].reshape(1, D),
            ln1=jnp.stack([tp["ln1_g"], tp["ln1_b"]], axis=0).reshape(2, 1, D),
            w1=tp["lin1_w"].T, b1=tp["lin1_b"].reshape(1, FF),
            w2=tp["lin2_w"].T, b2=tp["lin2_b"].reshape(1, D),
            ln2=jnp.stack([tp["ln2_g"], tp["ln2_b"]], axis=0).reshape(2, 1, D),
            hm=head_mask, hmT=head_mask.T,
        )

    layer_params = [pack_layer(tp) for tp in torch_layers]

    # BatchNorm1d (eval) folded into per-channel scale/shift.
    s1 = bn1_g / jnp.sqrt(bn1_v + BN_EPS); t1 = bn1_b - bn1_m * s1
    s2 = bn2_g / jnp.sqrt(bn2_v + BN_EPS); t2 = bn2_b - bn2_m * s2
    head_params = dict(
        w1=jnp.transpose(conv1_w, (2, 1, 0)), b1=conv1_b.reshape(1, D),   # (3, Din, Dout)
        s1=s1.reshape(1, D), t1=t1.reshape(1, D),
        w2=jnp.transpose(conv2_w, (2, 1, 0)), b2=conv2_b.reshape(1, FEAT),
        s2=s2.reshape(1, FEAT), t2=t2.reshape(1, FEAT),
        wfd=fd_w, bfd=fd_b.reshape(1, 1),
        wt=time_w.T, bt=time_b.reshape(1, OUT),
    )

    roll_convention = probe_roll_convention()

    try:
        out = resp_bert_attention_forward(
            hidden, layer_params, head_params, output_size=OUT, num_heads=NHEAD,
            single_buffer_params=True, roll_convention=roll_convention)
        out = jax.block_until_ready(out)
    except Exception:
        # pl.Buffered(1) not accepted by this jax version -> default double buffering.
        out = resp_bert_attention_forward(
            hidden, layer_params, head_params, output_size=OUT, num_heads=NHEAD,
            single_buffer_params=False, roll_convention=roll_convention)
        out = jax.block_until_ready(out)

    ref = ref_forward(hidden, torch_layers, conv1_w, conv1_b, s1, t1,
                      conv2_w, conv2_b, s2, t2, fd_w, fd_b, time_w, time_b,
                      num_heads=NHEAD)

    assert out.shape == (B, OUT), out.shape
    assert jnp.allclose(out, ref, atol=2e-4, rtol=2e-4), (out, ref)
    print("KERNEL_OK")
</pallas_src>

<mosaic_0001>
module attributes {stable_mosaic.version = 11 : i64} {
  func.func @kernel(%arg0: memref<8x128xf32, #tpu.memory_space<vmem>>, %arg1: memref<8x128xf32, #tpu.memory_space<vmem>>) attributes {dimension_semantics = [], scalar_prefetch = 0 : i64, scratch_operands = 0 : i64, tpu.core_type = #tpu.core_type<tc>} {
    %c0 = arith.constant 0 : index
    %c0_0 = arith.constant 0 : index
    %0 = vector.load %arg0[%c0, %c0_0] : memref<8x128xf32, #tpu.memory_space<vmem>>, vector<8x128xf32>
    %c1_i32 = arith.constant 1 : i32
    %1 = tpu.dynamic_rotate %0 by %c1_i32 dim 0 : vector<8x128xf32>, i32 -> vector<8x128xf32>
    %c0_1 = arith.constant 0 : index
    %c0_2 = arith.constant 0 : index
    %2 = vector.load %arg1[%c0_1, %c0_2] : memref<8x128xf32, #tpu.memory_space<vmem>>, vector<8x128xf32>
    tpu.vector_store %arg1[%c0_1, %c0_2], %1 {strides = array<i32>} : memref<8x128xf32, #tpu.memory_space<vmem>>, vector<8x128xf32>,
    return
  }
}

module attributes {stable_mosaic.version = 11 : i64} {
  func.func @transformer_layer_kernel(%arg0: i32, %arg1: memref<2x16x32xf32, #tpu.memory_space<vmem>>, %arg2: memref<3x32x32xf32, #tpu.memory_space<vmem>>, %arg3: memref<3x1x32xf32, #tpu.memory_space<vmem>>, %arg4: memref<32x32xf32, #tpu.memory_space<vmem>>, %arg5: memref<1x32xf32, #tpu.memory_space<vmem>>, %arg6: memref<2x1x32xf32, #tpu.memory_space<vmem>>, %arg7: memref<32x64xf32, #tpu.memory_space<vmem>>, %arg8: memref<1x64xf32, #tpu.memory_space<vmem>>, %arg9: memref<64x32xf32, #tpu.memory_space<vmem>>, %arg10: memref<1x32xf32, #tpu.memory_space<vmem>>, %arg11: memref<2x1x32xf32, #tpu.memory_space<vmem>>, %arg12: memref<32x16xf32, #tpu.memory_space<vmem>>, %arg13: memref<16x32xf32, #tpu.memory_space<vmem>>, %arg14: memref<2x16x32xf32, #tpu.memory_space<vmem>>) attributes {dimension_semantics = [#tpu.dimension_semantics<parallel>], iteration_bounds = array<i64: 1>, scalar_prefetch = 0 : i64, scratch_operands = 0 : i64, tpu.core_type = #tpu.core_type<tc>, window_params = [{transform_indices = @transform_0, window_bounds = array<i64: 2, 16, 32>}, {pipeline_mode = #tpu.pipeline_mode<synchronous>, transform_indices = @transform_1, window_bounds = array<i64: 3, 32, 32>}, {pipeline_mode = #tpu.pipeline_mode<synchronous>, transform_indices = @transform_2, window_bounds = array<i64: 3, 1, 32>}, {pipeline_mode = #tpu.pipeline_mode<synchronous>, transform_indices = @transform_3, window_bounds = array<i64: 32, 32>}, {pipeline_mode = #tpu.pipeline_mode<synchronous>, transform_indices = @transform_4, window_bounds = array<i64: 1, 32>}, {pipeline_mode = #tpu.pipeline_mode<synchronous>, transform_indices = @transform_5, window_bounds = array<i64: 2, 1, 32>}, {pipeline_mode = #tpu.pipeline_mode<synchronous>, transform_indices = @transform_6, window_bounds = array<i64: 32, 64>}, {pipeline_mode = #tpu.pipeline_mode<synchronous>, transform_indices = @transform_7, window_bounds = array<i64: 1, 64>}, {pipeline_mode = #tpu.pipeline_mode<synchronous>, transform_indices = @transform_8, window_bounds = array<i64: 64, 32>}, {pipeline_mode = #tpu.pipeline_mode<synchronous>, transform_indices = @transform_9, window_bounds = array<i64: 1, 32>}, {pipeline_mode = #tpu.pipeline_mode<synchronous>, transform_indices = @transform_10, window_bounds = array<i64: 2, 1, 32>}, {pipeline_mode = #tpu.pipeline_mode<synchronous>, transform_indices = @transform_11, window_bounds = array<i64: 32, 16>}, {pipeline_mode = #tpu.pipeline_mode<synchronous>, transform_indices = @transform_12, window_bounds = array<i64: 16, 32>}, {transform_indices = @transform_13, window_bounds = array<i64: 2, 16, 32>}]} {
    %c0 = arith.constant 0 : index
    %c0_0 = arith.constant 0 : index
    %c0_1 = arith.constant 0 : index
    %0 = vector.load %arg1[%c0, %c0_0, %c0_1] : memref<2x16x32xf32, #tpu.memory_space<vmem>>, vector<1x16x32xf32>
    %1 = vector.shape_cast %0 : vector<1x16x32xf32> to vector<16x32xf32>
    %c1 = arith.constant 1 : index
    %c0_2 = arith.constant 0 : index
    %c0_3 = arith.constant 0 : index
    %2 = vector.load %arg1[%c1, %c0_2, %c0_3] : memref<2x16x32xf32, #tpu.memory_space<vmem>>, vector<1x16x32xf32>
    %3 = vector.shape_cast %2 : vector<1x16x32xf32> to vector<16x32xf32>
    %4 = tpu.concatenate %1, %3 in 0 : vector<16x32xf32>, vector<16x32xf32> -> vector<32x32xf32>
    %c0_4 = arith.constant 0 : index
    %c0_5 = arith.constant 0 : index
    %c0_6 = arith.constant 0 : index
    %5 = vector.load %arg2[%c0_4, %c0_5, %c0_6] : memref<3x32x32xf32, #tpu.memory_space<vmem>>, vector<1x32x32xf32>
    %6 = vector.shape_cast %5 : vector<1x32x32xf32> to vector<32x32xf32>
    %cst = arith.constant dense<0.000000e+00> : vector<32x32xf32>
    %7 = tpu.matmul %4, %6, %cst {dimension_numbers = #tpu.dot_dimension_numbers<[1], [0], [0], [1], [0, 0, 1, 1], [], []>} : vector<32x32xf32>, vector<32x32xf32>, vector<32x32xf32> -> vector<32x32xf32>
    %c0_7 = arith.constant 0 : index
    %c0_8 = arith.constant 0 : index
    %c0_9 = arith.constant 0 : index
    %8 = vector.load %arg3[%c0_7, %c0_8, %c0_9] : memref<3x1x32xf32, #tpu.memory_space<vmem>>, vector<1x1x32xf32>
    %9 = vector.shape_cast %8 : vector<1x1x32xf32> to vector<1x32xf32>
    %10 = vector.broadcast %9 : vector<1x32xf32> to vector<32x32xf32>
    %11 = arith.addf %7, %10 : vector<32x32xf32>
    %cst_10 = arith.constant 0.707106769 : f32
    %12 = vector.broadcast %cst_10 : f32 to vector<32x32xf32>
    %13 = arith.mulf %11, %12 : vector<32x32xf32>
    %c1_11 = arith.constant 1 : index
    %c0_12 = arith.constant 0 : index
    %c0_13 = arith.constant 0 : index
    %14 = vector.load %arg2[%c1_11, %c0_12, %c0_13] : memref<3x32x32xf32, #tpu.memory_space<vmem>>, vector<1x32x32xf32>
    %15 = vector.shape_cast %14 : vector<1x32x32xf32> to vector<32x32xf32>
    %cst_14 = arith.constant dense<0.000000e+00> : vector<32x32xf32>
    %16 = tpu.matmul %4, %15, %cst_14 {dimension_numbers = #tpu.dot_dimension_numbers<[1], [0], [0], [1], [0, 0, 1, 1], [], []>} : vector<32x32xf32>, vector<32x32xf32>, vector<32x32xf32> -> vector<32x32xf32>
    %c1_15 = arith.constant 1 : index
    %c0_16 = arith.constant 0 : index
    %c0_17 = arith.constant 0 : index
    %17 = vector.load %arg3[%c1_15, %c0_16, %c0_17] : memref<3x1x32xf32, #tpu.memory_space<vmem>>, vector<1x1x32xf32>
    %18 = vector.shape_cast %17 : vector<1x1x32xf32> to vector<1x32xf32>
    %19 = vector.broadcast %18 : vector<1x32xf32> to vector<32x32xf32>
    %20 = arith.addf %16, %19 : vector<32x32xf32>
    %c2 = arith.constant 2 : index
    %c0_18 = arith.constant 0 : index
    %c0_19 = arith.constant 0 : index
    %21 = vector.load %arg2[%c2, %c0_18, %c0_19] : memref<3x32x32xf32, #tpu.memory_space<vmem>>, vector<1x32x32xf32>
    %22 = vector.shape_cast %21 : vector<1x32x32xf32> to vector<32x32xf32>
    %cst_20 = arith.constant dense<0.000000e+00> : vector<32x32xf32>
    %23 = tpu.matmul %4, %22, %cst_20 {dimension_numbers = #tpu.dot_dimension_numbers<[1], [0], [0], [1], [0, 0, 1, 1], [], []>} : vector<32x32xf32>, vector<32x32xf32>, vector<32x32xf32> -> vector<32x32xf32>
    %c2_21 = arith.constant 2 : index
    %c0_22 = arith.constant 0 : index
    %c0_23 = arith.constant 0 : index
    %24 = vector.load %arg3[%c2_21, %c0_22, %c0_23] : memref<3x1x32xf32, #tpu.memory_space<vmem>>, vector<1x1x32xf32>
    %25 = vector.shape_cast %24 : vector<1x1x32xf32> to vector<1x32xf32>
    %26 = vector.broadcast %25 : vector<1x32xf32> to vector<32x32xf32>
    %27 = arith.addf %23, %26 : vector<32x32xf32>
    %c0_24 = arith.constant 0 : index
    %c0_25 = arith.constant 0 : index
    %28 = vector.load %arg12[%c0_24, %c0_25] : memref<32x16xf32, #tpu.memory_space<vmem>>, vector<32x16xf32>
    %c0_26 = arith.constant 0 : index
    %c0_27 = arith.constant 0 : index
    %29 = vector.load %arg13[%c0_26, %c0_27] : memref<16x32xf32, #tpu.memory_space<vmem>>, vector<16x32xf32>
    %30 = vector.extract_strided_slice %13 {offsets = [0, 0], sizes = [16, 32], strides = [1, 1]} : vector<32x32xf32> to vector<16x32xf32>
    %31 = vector.extract_strided_slice %20 {offsets = [0, 0], sizes = [16, 32], strides = [1, 1]} : vector<32x32xf32> to vector<16x32xf32>
    %32 = arith.mulf %30, %31 : vector<16x32xf32>
    %cst_28 = arith.constant dense<0.000000e+00> : vector<16x16xf32>
    %33 = tpu.matmul %32, %28, %cst_28 {dimension_numbers = #tpu.dot_dimension_numbers<[1], [0], [0], [1], [0, 0, 1, 1], [], []>} : vector<16x32xf32>, vector<32x16xf32>, vector<16x16xf32> -> vector<16x16xf32>
    %34 = vector.extract_strided_slice %20 {offsets = [16, 0], sizes = [16, 32], strides = [1, 1]} : vector<32x32xf32> to vector<16x32xf32>
    %35 = arith.mulf %30, %34 : vector<16x32xf32>
    %cst_29 = arith.constant dense<0.000000e+00> : vector<16x16xf32>
    %36 = tpu.matmul %35, %28, %cst_29 {dimension_numbers = #tpu.dot_dimension_numbers<[1], [0], [0], [1], [0, 0, 1, 1], [], []>} : vector<16x32xf32>, vector<32x16xf32>, vector<16x16xf32> -> vector<16x16xf32>
    %37 = arith.maximumf %33, %36 : vector<16x16xf32>
    %38 = arith.subf %33, %37 : vector<16x16xf32>
    %39 = math.exp %38 : vector<16x16xf32>
    %40 = arith.subf %36, %37 : vector<16x16xf32>
    %41 = math.exp %40 : vector<16x16xf32>
    %42 = arith.addf %39, %41 : vector<16x16xf32>
    %cst_30 = arith.constant 1.000000e+00 : f32
    %43 = vector.broadcast %cst_30 : f32 to vector<16x16xf32>
    %44 = arith.divf %43, %42 : vector<16x16xf32>
    %cst_31 = arith.constant 0.000000e+00 : f32
    %45 = vector.broadcast %cst_31 : f32 to vector<16x32xf32>
    %46 = arith.mulf %39, %44 : vector<16x16xf32>
    %cst_32 = arith.constant dense<0.000000e+00> : vector<16x32xf32>
    %47 = tpu.matmul %46, %29, %cst_32 {dimension_numbers = #tpu.dot_dimension_numbers<[1], [0], [0], [1], [0, 0, 1, 1], [], []>} : vector<16x16xf32>, vector<16x32xf32>, vector<16x32xf32> -> vector<16x32xf32>
    %48 = vector.extract_strided_slice %27 {offsets = [0, 0], sizes = [16, 32], strides = [1, 1]} : vector<32x32xf32> to vector<16x32xf32>
    %49 = arith.mulf %47, %48 : vector<16x32xf32>
    %50 = arith.addf %45, %49 : vector<16x32xf32>
    %51 = arith.mulf %41, %44 : vector<16x16xf32>
    %cst_33 = arith.constant dense<0.000000e+00> : vector<16x32xf32>
    %52 = tpu.matmul %51, %29, %cst_33 {dimension_numbers = #tpu.dot_dimension_numbers<[1], [0], [0], [1], [0, 0, 1, 1], [], []>} : vector<16x16xf32>, vector<16x32xf32>, vector<16x32xf32> -> vector<16x32xf32>
    %53 = vector.extract_strided_slice %27 {offsets = [16, 0], sizes = [16, 32], strides = [1, 1]} : vector<32x32xf32> to vector<16x32xf32>
    %54 = arith.mulf %52, %53 : vector<16x32xf32>
    %55 = arith.addf %50, %54 : vector<16x32xf32>
    %56 = vector.extract_strided_slice %13 {offsets = [16, 0], sizes = [16, 32], strides = [1, 1]} : vector<32x32xf32> to vector<16x32xf32>
    %57 = vector.extract_strided_slice %20 {offsets = [0, 0], sizes = [16, 32], strides = [1, 1]} : vector<32x32xf32> to vector<16x32xf32>
    %58 = arith.mulf %56, %57 : vector<16x32xf32>
    %cst_34 = arith.constant dense<0.000000e+00> : vector<16x16xf32>
    %59 = tpu.matmul %58, %28, %cst_34 {dimension_numbers = #tpu.dot_dimension_numbers<[1], [0], [0], [1], [0, 0, 1, 1], [], []>} : vector<16x32xf32>, vector<32x16xf32>, vector<16x16xf32> -> vector<16x16xf32>
    %60 = vector.extract_strided_slice %20 {offsets = [16, 0], sizes = [16, 32], strides = [1, 1]} : vector<32x32xf32> to vector<16x32xf32>
    %61 = arith.mulf %56, %60 : vector<16x32xf32>
    %cst_35 = arith.constant dense<0.000000e+00> : vector<16x16xf32>
    %62 = tpu.matmul %61, %28, %cst_35 {dimension_numbers = #tpu.dot_dimension_numbers<[1], [0], [0], [1], [0, 0, 1, 1], [], []>} : vector<16x32xf32>, vector<32x16xf32>, vector<16x16xf32> -> vector<16x16xf32>
    %63 = arith.maximumf %59, %62 : vector<16x16xf32>
    %64 = arith.subf %59, %63 : vector<16x16xf32>
    %65 = math.exp %64 : vector<16x16xf32>
    %66 = arith.subf %62, %63 : vector<16x16xf32>
    %67 = math.exp %66 : vector<16x16xf32>
    %68 = arith.addf %65, %67 : vector<16x16xf32>
    %cst_36 = arith.constant 1.000000e+00 : f32
    %69 = vector.broadcast %cst_36 : f32 to vector<16x16xf32>
    %70 = arith.divf %69, %68 : vector<16x16xf32>
    %cst_37 = arith.constant 0.000000e+00 : f32
    %71 = vector.broadcast %cst_37 : f32 to vector<16x32xf32>
    %72 = arith.mulf %65, %70 : vector<16x16xf32>
    %cst_38 = arith.constant dense<0.000000e+00> : vector<16x32xf32>
    %73 = tpu.matmul %72, %29, %cst_38 {dimension_numbers = #tpu.dot_dimension_numbers<[1], [0], [0], [1], [0, 0, 1, 1], [], []>} : vector<16x16xf32>, vector<16x32xf32>, vector<16x32xf32> -> vector<16x32xf32>
    %74 = vector.extract_strided_slice %27 {offsets = [0, 0], sizes = [16, 32], strides = [1, 1]} : vector<32x32xf32> to vector<16x32xf32>
    %75 = arith.mulf %73, %74 : vector<16x32xf32>
    %76 = arith.addf %71, %75 : vector<16x32xf32>
    %77 = arith.mulf %67, %70 : vector<16x16xf32>
    %cst_39 = arith.constant dense<0.000000e+00> : vector<16x32xf32>
    %78 = tpu.matmul %77, %29, %cst_39 {dimension_numbers = #tpu.dot_dimension_numbers<[1], [0], [0], [1], [0, 0, 1, 1], [], []>} : vector<16x16xf32>, vector<16x32xf32>, vector<16x32xf32> -> vector<16x32xf32>
    %79 = vector.extract_strided_slice %27 {offsets = [16, 0], sizes = [16, 32], strides = [1, 1]} : vector<32x32xf32> to vector<16x32xf32>
    %80 = arith.mulf %78, %79 : vector<16x32xf32>
    %81 = arith.addf %76, %80 : vector<16x32xf32>
    %82 = tpu.concatenate %55, %81 in 0 : vector<16x32xf32>, vector<16x32xf32> -> vector<32x32xf32>
    %c0_40 = arith.constant 0 : index
    %c0_41 = arith.constant 0 : index
    %83 = vector.load %arg4[%c0_40, %c0_41] : memref<32x32xf32, #tpu.memory_space<vmem>>, vector<32x32xf32>
    %cst_42 = arith.constant dense<0.000000e+00> : vector<32x32xf32>
    %84 = tpu.matmul %82, %83, %cst_42 {dimension_numbers = #tpu.dot_dimension_numbers<[1], [0], [0], [1], [0, 0, 1, 1], [], []>} : vector<32x32xf32>, vector<32x32xf32>, vector<32x32xf32> -> vector<32x32xf32>
    %c0_43 = arith.constant 0 : index
    %c0_44 = arith.constant 0 : index
    %85 = vector.load %arg5[%c0_43, %c0_44] : memref<1x32xf32, #tpu.memory_space<vmem>>, vector<1x32xf32>
    %86 = vector.broadcast %85 : vector<1x32xf32> to vector<32x32xf32>
    %87 = arith.addf %84, %86 : vector<32x32xf32>
    %88 = arith.addf %4, %87 : vector<32x32xf32>
    %c0_45 = arith.constant 0 : index
    %c0_46 = arith.constant 0 : index
    %c0_47 = arith.constant 0 : index
    %89 = vector.load %arg6[%c0_45, %c0_46, %c0_47] : memref<2x1x32xf32, #tpu.memory_space<vmem>>, vector<1x1x32xf32>
    %90 = vector.shape_cast %89 : vector<1x1x32xf32> to vector<1x32xf32>
    %c1_48 = arith.constant 1 : index
    %c0_49 = arith.constant 0 : index
    %c0_50 = arith.constant 0 : index
    %91 = vector.load %arg6[%c1_48, %c0_49, %c0_50] : memref<2x1x32xf32, #tpu.memory_space<vmem>>, vector<1x1x32xf32>
    %92 = vector.shape_cast %91 : vector<1x1x32xf32> to vector<1x32xf32>
    %cst_51 = arith.constant dense<0.000000e+00> : vector<32xf32>
    %93 = vector.multi_reduction <add>, %88, %cst_51 [1] : vector<32x32xf32> to vector<32xf32>
    %94 = vector.shape_cast %93 : vector<32xf32> to vector<32x1xf32>
    %cst_52 = arith.constant 3.200000e+01 : f32
    %95 = vector.broadcast %cst_52 : f32 to vector<32x1xf32>
    %96 = arith.divf %94, %95 : vector<32x1xf32>
    %97 = vector.broadcast %96 : vector<32x1xf32> to vector<32x32xf32>
    %98 = arith.subf %88, %97 : vector<32x32xf32>
    %99 = vector.broadcast %96 : vector<32x1xf32> to vector<32x32xf32>
    %100 = arith.subf %88, %99 : vector<32x32xf32>
    %101 = arith.mulf %98, %100 : vector<32x32xf32>
    %cst_53 = arith.constant dense<0.000000e+00> : vector<32xf32>
    %102 = vector.multi_reduction <add>, %101, %cst_53 [1] : vector<32x32xf32> to vector<32xf32>
    %103 = vector.shape_cast %102 : vector<32xf32> to vector<32x1xf32>
    %cst_54 = arith.constant 3.200000e+01 : f32
    %104 = vector.broadcast %cst_54 : f32 to vector<32x1xf32>
    %105 = arith.divf %103, %104 : vector<32x1xf32>
    %106 = vector.broadcast %96 : vector<32x1xf32> to vector<32x32xf32>
    %107 = arith.subf %88, %106 : vector<32x32xf32>
    %cst_55 = arith.constant 9.99999974E-6 : f32
    %108 = vector.broadcast %cst_55 : f32 to vector<32x1xf32>
    %109 = arith.addf %105, %108 : vector<32x1xf32>
    %110 = math.rsqrt %109 : vector<32x1xf32>
    %111 = vector.broadcast %110 : vector<32x1xf32> to vector<32x32xf32>
    %112 = arith.mulf %107, %111 : vector<32x32xf32>
    %113 = vector.broadcast %90 : vector<1x32xf32> to vector<32x32xf32>
    %114 = arith.mulf %112, %113 : vector<32x32xf32>
    %115 = vector.broadcast %92 : vector<1x32xf32> to vector<32x32xf32>
    %116 = arith.addf %114, %115 : vector<32x32xf32>
    %c0_56 = arith.constant 0 : index
    %c0_57 = arith.constant 0 : index
    %117 = vector.load %arg7[%c0_56, %c0_57] : memref<32x64xf32, #tpu.memory_space<vmem>>, vector<32x64xf32>
    %cst_58 = arith.constant dense<0.000000e+00> : vector<32x64xf32>
    %118 = tpu.matmul %116, %117, %cst_58 {dimension_numbers = #tpu.dot_dimension_numbers<[1], [0], [0], [1], [0, 0, 1, 1], [], []>} : vector<32x32xf32>, vector<32x64xf32>, vector<32x64xf32> -> vector<32x64xf32>
    %c0_59 = arith.constant 0 : index
    %c0_60 = arith.constant 0 : index
    %119 = vector.load %arg8[%c0_59, %c0_60] : memref<1x64xf32, #tpu.memory_space<vmem>>, vector<1x64xf32>
    %120 = vector.broadcast %119 : vector<1x64xf32> to vector<32x64xf32>
    %121 = arith.addf %118, %120 : vector<32x64xf32>
    %cst_61 = arith.constant 0.000000e+00 : f32
    %122 = vector.broadcast %cst_61 : f32 to vector<32x64xf32>
    %123 = arith.maximumf %121, %122 : vector<32x64xf32>
    %c0_62 = arith.constant 0 : index
    %c0_63 = arith.constant 0 : index
    %124 = vector.load %arg9[%c0_62, %c0_63] : memref<64x32xf32, #tpu.memory_space<vmem>>, vector<64x32xf32>
    %cst_64 = arith.constant dense<0.000000e+00> : vector<32x32xf32>
    %125 = tpu.matmul %123, %124, %cst_64 {dimension_numbers = #tpu.dot_dimension_numbers<[1], [0], [0], [1], [0, 0, 1, 1], [], []>} : vector<32x64xf32>, vector<64x32xf32>, vector<32x32xf32> -> vector<32x32xf32>
    %c0_65 = arith.constant 0 : index
    %c0_66 = arith.constant 0 : index
    %126 = vector.load %arg10[%c0_65, %c0_66] : memref<1x32xf32, #tpu.memory_space<vmem>>, vector<1x32xf32>
    %127 = vector.broadcast %126 : vector<1x32xf32> to vector<32x32xf32>
    %128 = arith.addf %125, %127 : vector<32x32xf32>
    %129 = arith.addf %116, %128 : vector<32x32xf32>
    %c0_67 = arith.constant 0 : index
    %c0_68 = arith.constant 0 : index
    %c0_69 = arith.constant 0 : index
    %130 = vector.load %arg11[%c0_67, %c0_68, %c0_69] : memref<2x1x32xf32, #tpu.memory_space<vmem>>, vector<1x1x32xf32>
    %131 = vector.shape_cast %130 : vector<1x1x32xf32> to vector<1x32xf32>
    %c1_70 = arith.constant 1 : index
    %c0_71 = arith.constant 0 : index
    %c0_72 = arith.constant 0 : index
    %132 = vector.load %arg11[%c1_70, %c0_71, %c0_72] : memref<2x1x32xf32, #tpu.memory_space<vmem>>, vector<1x1x32xf32>
    %133 = vector.shape_cast %132 : vector<1x1x32xf32> to vector<1x32xf32>
    %cst_73 = arith.constant dense<0.000000e+00> : vector<32xf32>
    %134 = vector.multi_reduction <add>, %129, %cst_73 [1] : vector<32x32xf32> to vector<32xf32>
    %135 = vector.shape_cast %134 : vector<32xf32> to vector<32x1xf32>
    %cst_74 = arith.constant 3.200000e+01 : f32
    %136 = vector.broadcast %cst_74 : f32 to vector<32x1xf32>
    %137 = arith.divf %135, %136 : vector<32x1xf32>
    %138 = vector.broadcast %137 : vector<32x1xf32> to vector<32x32xf32>
    %139 = arith.subf %129, %138 : vector<32x32xf32>
    %140 = vector.broadcast %137 : vector<32x1xf32> to vector<32x32xf32>
    %141 = arith.subf %129, %140 : vector<32x32xf32>
    %142 = arith.mulf %139, %141 : vector<32x32xf32>
    %cst_75 = arith.constant dense<0.000000e+00> : vector<32xf32>
    %143 = vector.multi_reduction <add>, %142, %cst_75 [1] : vector<32x32xf32> to vector<32xf32>
    %144 = vector.shape_cast %143 : vector<32xf32> to vector<32x1xf32>
    %cst_76 = arith.constant 3.200000e+01 : f32
    %145 = vector.broadcast %cst_76 : f32 to vector<32x1xf32>
    %146 = arith.divf %144, %145 : vector<32x1xf32>
    %147 = vector.broadcast %137 : vector<32x1xf32> to vector<32x32xf32>
    %148 = arith.subf %129, %147 : vector<32x32xf32>
    %cst_77 = arith.constant 9.99999974E-6 : f32
    %149 = vector.broadcast %cst_77 : f32 to vector<32x1xf32>
    %150 = arith.addf %146, %149 : vector<32x1xf32>
    %151 = math.rsqrt %150 : vector<32x1xf32>
    %152 = vector.broadcast %151 : vector<32x1xf32> to vector<32x32xf32>
    %153 = arith.mulf %148, %152 : vector<32x32xf32>
    %154 = vector.broadcast %131 : vector<1x32xf32> to vector<32x32xf32>
    %155 = arith.mulf %153, %154 : vector<32x32xf32>
    %156 = vector.broadcast %133 : vector<1x32xf32> to vector<32x32xf32>
    %157 = arith.addf %155, %156 : vector<32x32xf32>
    %158 = vector.extract_strided_slice %157 {offsets = [0, 0], sizes = [16, 32], strides = [1, 1]} : vector<32x32xf32> to vector<16x32xf32>
    %c0_78 = arith.constant 0 : index
    %c0_79 = arith.constant 0 : index
    %c0_80 = arith.constant 0 : index
    %159 = vector.load %arg14[%c0_78, %c0_79, %c0_80] : memref<2x16x32xf32, #tpu.memory_space<vmem>>, vector<1x16x32xf32>
    %160 = vector.shape_cast %159 : vector<1x16x32xf32> to vector<16x32xf32>
    %161 = vector.shape_cast %158 : vector<16x32xf32> to vector<1x16x32xf32>
    tpu.vector_store %arg14[%c0_78, %c0_79, %c0_80], %161 {strides = array<i32>} : memref<2x16x32xf32, #tpu.memory_space<vmem>>, vector<1x16x32xf32>,
    %162 = vector.extract_strided_slice %157 {offsets = [16, 0], sizes = [16, 32], strides = [1, 1]} : vector<32x32xf32> to vector<16x32xf32>
    %c1_81 = arith.constant 1 : index
    %c0_82 = arith.constant 0 : index
    %c0_83 = arith.constant 0 : index
    %163 = vector.load %arg14[%c1_81, %c0_82, %c0_83] : memref<2x16x32xf32, #tpu.memory_space<vmem>>, vector<1x16x32xf32>
    %164 = vector.shape_cast %163 : vector<1x16x32xf32> to vector<16x32xf32>
    %165 = vector.shape_cast %162 : vector<16x32xf32> to vector<1x16x32xf32>
    tpu.vector_store %arg14[%c1_81, %c0_82, %c0_83], %165 {strides = array<i32>} : memref<2x16x32xf32, #tpu.memory_space<vmem>>, vector<1x16x32xf32>,
    return
  }
  func.func @transform_0(%arg0: i32) -> (i32, i32, i32) {
    %c0_i32 = arith.constant 0 : i32
    %c0_i32_0 = arith.constant 0 : i32
    %c0_i32_1 = arith.constant 0 : i32
    return %c0_i32, %arg0, %c0_i32_0 : i32, i32, i32
  }
  func.func @transform_1(%arg0: i32) -> (i32, i32, i32) {
    %c0_i32 = arith.constant 0 : i32
    %c0_i32_0 = arith.constant 0 : i32
    %c0_i32_1 = arith.constant 0 : i32
    %c0_i32_2 = arith.constant 0 : i32
    return %c0_i32, %c0_i32_0, %c0_i32_1 : i32, i32, i32
  }
  func.func @transform_2(%arg0: i32) -> (i32, i32, i32) {
    %c0_i32 = arith.constant 0 : i32
    %c0_i32_0 = arith.constant 0 : i32
    %c0_i32_1 = arith.constant 0 : i32
    %c0_i32_2 = arith.constant 0 : i32
    return %c0_i32, %c0_i32_0, %c0_i32_1 : i32, i32, i32
  }
  func.func @transform_3(%arg0: i32) -> (i32, i32) {
    %c0_i32 = arith.constant 0 : i32
    %c0_i32_0 = arith.constant 0 : i32
    %c0_i32_1 = arith.constant 0 : i32
    return %c0_i32, %c0_i32_0 : i32, i32
  }
  func.func @transform_4(%arg0: i32) -> (i32, i32) {
    %c0_i32 = arith.constant 0 : i32
    %c0_i32_0 = arith.constant 0 : i32
    %c0_i32_1 = arith.constant 0 : i32
    return %c0_i32, %c0_i32_0 : i32, i32
  }
  func.func @transform_5(%arg0: i32) -> (i32, i32, i32) {
    %c0_i32 = arith.constant 0 : i32
    %c0_i32_0 = arith.constant 0 : i32
    %c0_i32_1 = arith.constant 0 : i32
    %c0_i32_2 = arith.constant 0 : i32
    return %c0_i32, %c0_i32_0, %c0_i32_1 : i32, i32, i32
  }
  func.func @transform_6(%arg0: i32) -> (i32, i32) {
    %c0_i32 = arith.constant 0 : i32
    %c0_i32_0 = arith.constant 0 : i32
    %c0_i32_1 = arith.constant 0 : i32
    return %c0_i32, %c0_i32_0 : i32, i32
  }
  func.func @transform_7(%arg0: i32) -> (i32, i32) {
    %c0_i32 = arith.constant 0 : i32
    %c0_i32_0 = arith.constant 0 : i32
    %c0_i32_1 = arith.constant 0 : i32
    return %c0_i32, %c0_i32_0 : i32, i32
  }
  func.func @transform_8(%arg0: i32) -> (i32, i32) {
    %c0_i32 = arith.constant 0 : i32
    %c0_i32_0 = arith.constant 0 : i32
    %c0_i32_1 = arith.constant 0 : i32
    return %c0_i32, %c0_i32_0 : i32, i32
  }
  func.func @transform_9(%arg0: i32) -> (i32, i32) {
    %c0_i32 = arith.constant 0 : i32
    %c0_i32_0 = arith.constant 0 : i32
    %c0_i32_1 = arith.constant 0 : i32
    return %c0_i32, %c0_i32_0 : i32, i32
  }
  func.func @transform_10(%arg0: i32) -> (i32, i32, i32) {
    %c0_i32 = arith.constant 0 : i32
    %c0_i32_0 = arith.constant 0 : i32
    %c0_i32_1 = arith.constant 0 : i32
    %c0_i32_2 = arith.constant 0 : i32
    return %c0_i32, %c0_i32_0, %c0_i32_1 : i32, i32, i32
  }
  func.func @transform_11(%arg0: i32) -> (i32, i32) {
    %c0_i32 = arith.constant 0 : i32
    %c0_i32_0 = arith.constant 0 : i32
    %c0_i32_1 = arith.constant 0 : i32
    return %c0_i32, %c0_i32_0 : i32, i32
  }
  func.func @transform_12(%arg0: i32) -> (i32, i32) {
    %c0_i32 = arith.constant 0 : i32
    %c0_i32_0 = arith.constant 0 : i32
    %c0_i32_1 = arith.constant 0 : i32
    return %c0_i32, %c0_i32_0 : i32, i32
  }
  func.func @transform_13(%arg0: i32) -> (i32, i32, i32) {
    %c0_i32 = arith.constant 0 : i32
    %c0_i32_0 = arith.constant 0 : i32
    %c0_i32_1 = arith.constant 0 : i32
    return %c0_i32, %arg0, %c0_i32_0 : i32, i32, i32
  }
}

module attributes {stable_mosaic.version = 11 : i64} {
  func.func @transformer_layer_kernel(%arg0: i32, %arg1: memref<2x16x32xf32, #tpu.memory_space<vmem>>, %arg2: memref<3x32x32xf32, #tpu.memory_space<vmem>>, %arg3: memref<3x1x32xf32, #tpu.memory_space<vmem>>, %arg4: memref<32x32xf32, #tpu.memory_space<vmem>>, %arg5: memref<1x32xf32, #tpu.memory_space<vmem>>, %arg6: memref<2x1x32xf32, #tpu.memory_space<vmem>>, %arg7: memref<32x64xf32, #tpu.memory_space<vmem>>, %arg8: memref<1x64xf32, #tpu.memory_space<vmem>>, %arg9: memref<64x32xf32, #tpu.memory_space<vmem>>, %arg10: memref<1x32xf32, #tpu.memory_space<vmem>>, %arg11: memref<2x1x32xf32, #tpu.memory_space<vmem>>, %arg12: memref<32x16xf32, #tpu.memory_space<vmem>>, %arg13: memref<16x32xf32, #tpu.memory_space<vmem>>, %arg14: memref<2x16x32xf32, #tpu.memory_space<vmem>>) attributes {dimension_semantics = [#tpu.dimension_semantics<parallel>], iteration_bounds = array<i64: 1>, scalar_prefetch = 0 : i64, scratch_operands = 0 : i64, tpu.core_type = #tpu.core_type<tc>, window_params = [{transform_indices = @transform_0, window_bounds = array<i64: 2, 16, 32>}, {pipeline_mode = #tpu.pipeline_mode<synchronous>, transform_indices = @transform_1, window_bounds = array<i64: 3, 32, 32>}, {pipeline_mode = #tpu.pipeline_mode<synchronous>, transform_indices = @transform_2, window_bounds = array<i64: 3, 1, 32>}, {pipeline_mode = #tpu.pipeline_mode<synchronous>, transform_indices = @transform_3, window_bounds = array<i64: 32, 32>}, {pipeline_mode = #tpu.pipeline_mode<synchronous>, transform_indices = @transform_4, window_bounds = array<i64: 1, 32>}, {pipeline_mode = #tpu.pipeline_mode<synchronous>, transform_indices = @transform_5, window_bounds = array<i64: 2, 1, 32>}, {pipeline_mode = #tpu.pipeline_mode<synchronous>, transform_indices = @transform_6, window_bounds = array<i64: 32, 64>}, {pipeline_mode = #tpu.pipeline_mode<synchronous>, transform_indices = @transform_7, window_bounds = array<i64: 1, 64>}, {pipeline_mode = #tpu.pipeline_mode<synchronous>, transform_indices = @transform_8, window_bounds = array<i64: 64, 32>}, {pipeline_mode = #tpu.pipeline_mode<synchronous>, transform_indices = @transform_9, window_bounds = array<i64: 1, 32>}, {pipeline_mode = #tpu.pipeline_mode<synchronous>, transform_indices = @transform_10, window_bounds = array<i64: 2, 1, 32>}, {pipeline_mode = #tpu.pipeline_mode<synchronous>, transform_indices = @transform_11, window_bounds = array<i64: 32, 16>}, {pipeline_mode = #tpu.pipeline_mode<synchronous>, transform_indices = @transform_12, window_bounds = array<i64: 16, 32>}, {transform_indices = @transform_13, window_bounds = array<i64: 2, 16, 32>}]} {
    %c0 = arith.constant 0 : index
    %c0_0 = arith.constant 0 : index
    %c0_1 = arith.constant 0 : index
    %0 = vector.load %arg1[%c0, %c0_0, %c0_1] : memref<2x16x32xf32, #tpu.memory_space<vmem>>, vector<1x16x32xf32>
    %1 = vector.shape_cast %0 : vector<1x16x32xf32> to vector<16x32xf32>
    %c1 = arith.constant 1 : index
    %c0_2 = arith.constant 0 : index
    %c0_3 = arith.constant 0 : index
    %2 = vector.load %arg1[%c1, %c0_2, %c0_3] : memref<2x16x32xf32, #tpu.memory_space<vmem>>, vector<1x16x32xf32>
    %3 = vector.shape_cast %2 : vector<1x16x32xf32> to vector<16x32xf32>
    %4 = tpu.concatenate %1, %3 in 0 : vector<16x32xf32>, vector<16x32xf32> -> vector<32x32xf32>
    %c0_4 = arith.constant 0 : index
    %c0_5 = arith.constant 0 : index
    %c0_6 = arith.constant 0 : index
    %5 = vector.load %arg2[%c0_4, %c0_5, %c0_6] : memref<3x32x32xf32, #tpu.memory_space<vmem>>, vector<1x32x32xf32>
    %6 = vector.shape_cast %5 : vector<1x32x32xf32> to vector<32x32xf32>
    %cst = arith.constant dense<0.000000e+00> : vector<32x32xf32>
    %7 = tpu.matmul %4, %6, %cst {dimension_numbers = #tpu.dot_dimension_numbers<[1], [0], [0], [1], [0, 0, 1, 1], [], []>} : vector<32x32xf32>, vector<32x32xf32>, vector<32x32xf32> -> vector<32x32xf32>
    %c0_7 = arith.constant 0 : index
    %c0_8 = arith.constant 0 : index
    %c0_9 = arith.constant 0 : index
    %8 = vector.load %arg3[%c0_7, %c0_8, %c0_9] : memref<3x1x32xf32, #tpu.memory_space<vmem>>, vector<1x1x32xf32>
    %9 = vector.shape_cast %8 : vector<1x1x32xf32> to vector<1x32xf32>
    %10 = vector.broadcast %9 : vector<1x32xf32> to vector<32x32xf32>
    %11 = arith.addf %7, %10 : vector<32x32xf32>
    %cst_10 = arith.constant 0.707106769 : f32
    %12 = vector.broadcast %cst_10 : f32 to vector<32x32xf32>
    %13 = arith.mulf %11, %12 : vector<32x32xf32>
    %c1_11 = arith.constant 1 : index
    %c0_12 = arith.constant 0 : index
    %c0_13 = arith.constant 0 : index
    %14 = vector.load %arg2[%c1_11, %c0_12, %c0_13] : memref<3x32x32xf32, #tpu.memory_space<vmem>>, vector<1x32x32xf32>
    %15 = vector.shape_cast %14 : vector<1x32x32xf32> to vector<32x32xf32>
    %cst_14 = arith.constant dense<0.000000e+00> : vector<32x32xf32>
    %16 = tpu.matmul %4, %15, %cst_14 {dimension_numbers = #tpu.dot_dimension_numbers<[1], [0], [0], [1], [0, 0, 1, 1], [], []>} : vector<32x32xf32>, vector<32x32xf32>, vector<32x32xf32> -> vector<32x32xf32>
    %c1_15 = arith.constant 1 : index
    %c0_16 = arith.constant 0 : index
    %c0_17 = arith.constant 0 : index
    %17 = vector.load %arg3[%c1_15, %c0_16, %c0_17] : memref<3x1x32xf32, #tpu.memory_space<vmem>>, vector<1x1x32xf32>
    %18 = vector.shape_cast %17 : vector<1x1x32xf32> to vector<1x32xf32>
    %19 = vector.broadcast %18 : vector<1x32xf32> to vector<32x32xf32>
    %20 = arith.addf %16, %19 : vector<32x32xf32>
    %c2 = arith.constant 2 : index
    %c0_18 = arith.constant 0 : index
    %c0_19 = arith.constant 0 : index
    %21 = vector.load %arg2[%c2, %c0_18, %c0_19] : memref<3x32x32xf32, #tpu.memory_space<vmem>>, vector<1x32x32xf32>
    %22 = vector.shape_cast %21 : vector<1x32x32xf32> to vector<32x32xf32>
    %cst_20 = arith.constant dense<0.000000e+00> : vector<32x32xf32>
    %23 = tpu.matmul %4, %22, %cst_20 {dimension_numbers = #tpu.dot_dimension_numbers<[1], [0], [0], [1], [0, 0, 1, 1], [], []>} : vector<32x32xf32>, vector<32x32xf32>, vector<32x32xf32> -> vector<32x32xf32>
    %c2_21 = arith.constant 2 : index
    %c0_22 = arith.constant 0 : index
    %c0_23 = arith.constant 0 : index
    %24 = vector.load %arg3[%c2_21, %c0_22, %c0_23] : memref<3x1x32xf32, #tpu.memory_space<vmem>>, vector<1x1x32xf32>
    %25 = vector.shape_cast %24 : vector<1x1x32xf32> to vector<1x32xf32>
    %26 = vector.broadcast %25 : vector<1x32xf32> to vector<32x32xf32>
    %27 = arith.addf %23, %26 : vector<32x32xf32>
    %c0_24 = arith.constant 0 : index
    %c0_25 = arith.constant 0 : index
    %28 = vector.load %arg12[%c0_24, %c0_25] : memref<32x16xf32, #tpu.memory_space<vmem>>, vector<32x16xf32>
    %c0_26 = arith.constant 0 : index
    %c0_27 = arith.constant 0 : index
    %29 = vector.load %arg13[%c0_26, %c0_27] : memref<16x32xf32, #tpu.memory_space<vmem>>, vector<16x32xf32>
    %30 = vector.extract_strided_slice %13 {offsets = [0, 0], sizes = [16, 32], strides = [1, 1]} : vector<32x32xf32> to vector<16x32xf32>
    %31 = vector.extract_strided_slice %20 {offsets = [0, 0], sizes = [16, 32], strides = [1, 1]} : vector<32x32xf32> to vector<16x32xf32>
    %32 = arith.mulf %30, %31 : vector<16x32xf32>
    %cst_28 = arith.constant dense<0.000000e+00> : vector<16x16xf32>
    %33 = tpu.matmul %32, %28, %cst_28 {dimension_numbers = #tpu.dot_dimension_numbers<[1], [0], [0], [1], [0, 0, 1, 1], [], []>} : vector<16x32xf32>, vector<32x16xf32>, vector<16x16xf32> -> vector<16x16xf32>
    %34 = vector.extract_strided_slice %20 {offsets = [16, 0], sizes = [16, 32], strides = [1, 1]} : vector<32x32xf32> to vector<16x32xf32>
    %35 = arith.mulf %30, %34 : vector<16x32xf32>
    %cst_29 = arith.constant dense<0.000000e+00> : vector<16x16xf32>
    %36 = tpu.matmul %35, %28, %cst_29 {dimension_numbers = #tpu.dot_dimension_numbers<[1], [0], [0], [1], [0, 0, 1, 1], [], []>} : vector<16x32xf32>, vector<32x16xf32>, vector<16x16xf32> -> vector<16x16xf32>
    %37 = arith.maximumf %33, %36 : vector<16x16xf32>
    %38 = arith.subf %33, %37 : vector<16x16xf32>
    %39 = math.exp %38 : vector<16x16xf32>
    %40 = arith.subf %36, %37 : vector<16x16xf32>
    %41 = math.exp %40 : vector<16x16xf32>
    %42 = arith.addf %39, %41 : vector<16x16xf32>
    %cst_30 = arith.constant 1.000000e+00 : f32
    %43 = vector.broadcast %cst_30 : f32 to vector<16x16xf32>
    %44 = arith.divf %43, %42 : vector<16x16xf32>
    %cst_31 = arith.constant 0.000000e+00 : f32
    %45 = vector.broadcast %cst_31 : f32 to vector<16x32xf32>
    %46 = arith.mulf %39, %44 : vector<16x16xf32>
    %cst_32 = arith.constant dense<0.000000e+00> : vector<16x32xf32>
    %47 = tpu.matmul %46, %29, %cst_32 {dimension_numbers = #tpu.dot_dimension_numbers<[1], [0], [0], [1], [0, 0, 1, 1], [], []>} : vector<16x16xf32>, vector<16x32xf32>, vector<16x32xf32> -> vector<16x32xf32>
    %48 = vector.extract_strided_slice %27 {offsets = [0, 0], sizes = [16, 32], strides = [1, 1]} : vector<32x32xf32> to vector<16x32xf32>
    %49 = arith.mulf %47, %48 : vector<16x32xf32>
    %50 = arith.addf %45, %49 : vector<16x32xf32>
    %51 = arith.mulf %41, %44 : vector<16x16xf32>
    %cst_33 = arith.constant dense<0.000000e+00> : vector<16x32xf32>
    %52 = tpu.matmul %51, %29, %cst_33 {dimension_numbers = #tpu.dot_dimension_numbers<[1], [0], [0], [1], [0, 0, 1, 1], [], []>} : vector<16x16xf32>, vector<16x32xf32>, vector<16x32xf32> -> vector<16x32xf32>
    %53 = vector.extract_strided_slice %27 {offsets = [16, 0], sizes = [16, 32], strides = [1, 1]} : vector<32x32xf32> to vector<16x32xf32>
    %54 = arith.mulf %52, %53 : vector<16x32xf32>
    %55 = arith.addf %50, %54 : vector<16x32xf32>
    %56 = vector.extract_strided_slice %13 {offsets = [16, 0], sizes = [16, 32], strides = [1, 1]} : vector<32x32xf32> to vector<16x32xf32>
    %57 = vector.extract_strided_slice %20 {offsets = [0, 0], sizes = [16, 32], strides = [1, 1]} : vector<32x32xf32> to vector<16x32xf32>
    %58 = arith.mulf %56, %57 : vector<16x32xf32>
    %cst_34 = arith.constant dense<0.000000e+00> : vector<16x16xf32>
    %59 = tpu.matmul %58, %28, %cst_34 {dimension_numbers = #tpu.dot_dimension_numbers<[1], [0], [0], [1], [0, 0, 1, 1], [], []>} : vector<16x32xf32>, vector<32x16xf32>, vector<16x16xf32> -> vector<16x16xf32>
    %60 = vector.extract_strided_slice %20 {offsets = [16, 0], sizes = [16, 32], strides = [1, 1]} : vector<32x32xf32> to vector<16x32xf32>
    %61 = arith.mulf %56, %60 : vector<16x32xf32>
    %cst_35 = arith.constant dense<0.000000e+00> : vector<16x16xf32>
    %62 = tpu.matmul %61, %28, %cst_35 {dimension_numbers = #tpu.dot_dimension_numbers<[1], [0], [0], [1], [0, 0, 1, 1], [], []>} : vector<16x32xf32>, vector<32x16xf32>, vector<16x16xf32> -> vector<16x16xf32>
    %63 = arith.maximumf %59, %62 : vector<16x16xf32>
    %64 = arith.subf %59, %63 : vector<16x16xf32>
    %65 = math.exp %64 : vector<16x16xf32>
    %66 = arith.subf %62, %63 : vector<16x16xf32>
    %67 = math.exp %66 : vector<16x16xf32>
    %68 = arith.addf %65, %67 : vector<16x16xf32>
    %cst_36 = arith.constant 1.000000e+00 : f32
    %69 = vector.broadcast %cst_36 : f32 to vector<16x16xf32>
    %70 = arith.divf %69, %68 : vector<16x16xf32>
    %cst_37 = arith.constant 0.000000e+00 : f32
    %71 = vector.broadcast %cst_37 : f32 to vector<16x32xf32>
    %72 = arith.mulf %65, %70 : vector<16x16xf32>
    %cst_38 = arith.constant dense<0.000000e+00> : vector<16x32xf32>
    %73 = tpu.matmul %72, %29, %cst_38 {dimension_numbers = #tpu.dot_dimension_numbers<[1], [0], [0], [1], [0, 0, 1, 1], [], []>} : vector<16x16xf32>, vector<16x32xf32>, vector<16x32xf32> -> vector<16x32xf32>
    %74 = vector.extract_strided_slice %27 {offsets = [0, 0], sizes = [16, 32], strides = [1, 1]} : vector<32x32xf32> to vector<16x32xf32>
    %75 = arith.mulf %73, %74 : vector<16x32xf32>
    %76 = arith.addf %71, %75 : vector<16x32xf32>
    %77 = arith.mulf %67, %70 : vector<16x16xf32>
    %cst_39 = arith.constant dense<0.000000e+00> : vector<16x32xf32>
    %78 = tpu.matmul %77, %29, %cst_39 {dimension_numbers = #tpu.dot_dimension_numbers<[1], [0], [0], [1], [0, 0, 1, 1], [], []>} : vector<16x16xf32>, vector<16x32xf32>, vector<16x32xf32> -> vector<16x32xf32>
    %79 = vector.extract_strided_slice %27 {offsets = [16, 0], sizes = [16, 32], strides = [1, 1]} : vector<32x32xf32> to vector<16x32xf32>
    %80 = arith.mulf %78, %79 : vector<16x32xf32>
    %81 = arith.addf %76, %80 : vector<16x32xf32>
    %82 = tpu.concatenate %55, %81 in 0 : vector<16x32xf32>, vector<16x32xf32> -> vector<32x32xf32>
    %c0_40 = arith.constant 0 : index
    %c0_41 = arith.constant 0 : index
    %83 = vector.load %arg4[%c0_40, %c0_41] : memref<32x32xf32, #tpu.memory_space<vmem>>, vector<32x32xf32>
    %cst_42 = arith.constant dense<0.000000e+00> : vector<32x32xf32>
    %84 = tpu.matmul %82, %83, %cst_42 {dimension_numbers = #tpu.dot_dimension_numbers<[1], [0], [0], [1], [0, 0, 1, 1], [], []>} : vector<32x32xf32>, vector<32x32xf32>, vector<32x32xf32> -> vector<32x32xf32>
    %c0_43 = arith.constant 0 : index
    %c0_44 = arith.constant 0 : index
    %85 = vector.load %arg5[%c0_43, %c0_44] : memref<1x32xf32, #tpu.memory_space<vmem>>, vector<1x32xf32>
    %86 = vector.broadcast %85 : vector<1x32xf32> to vector<32x32xf32>
    %87 = arith.addf %84, %86 : vector<32x32xf32>
    %88 = arith.addf %4, %87 : vector<32x32xf32>
    %c0_45 = arith.constant 0 : index
    %c0_46 = arith.constant 0 : index
    %c0_47 = arith.constant 0 : index
    %89 = vector.load %arg6[%c0_45, %c0_46, %c0_47] : memref<2x1x32xf32, #tpu.memory_space<vmem>>, vector<1x1x32xf32>
    %90 = vector.shape_cast %89 : vector<1x1x32xf32> to vector<1x32xf32>
    %c1_48 = arith.constant 1 : index
    %c0_49 = arith.constant 0 : index
    %c0_50 = arith.constant 0 : index
    %91 = vector.load %arg6[%c1_48, %c0_49, %c0_50] : memref<2x1x32xf32, #tpu.memory_space<vmem>>, vector<1x1x32xf32>
    %92 = vector.shape_cast %91 : vector<1x1x32xf32> to vector<1x32xf32>
    %cst_51 = arith.constant dense<0.000000e+00> : vector<32xf32>
    %93 = vector.multi_reduction <add>, %88, %cst_51 [1] : vector<32x32xf32> to vector<32xf32>
    %94 = vector.shape_cast %93 : vector<32xf32> to vector<32x1xf32>
    %cst_52 = arith.constant 3.200000e+01 : f32
    %95 = vector.broadcast %cst_52 : f32 to vector<32x1xf32>
    %96 = arith.divf %94, %95 : vector<32x1xf32>
    %97 = vector.broadcast %96 : vector<32x1xf32> to vector<32x32xf32>
    %98 = arith.subf %88, %97 : vector<32x32xf32>
    %99 = vector.broadcast %96 : vector<32x1xf32> to vector<32x32xf32>
    %100 = arith.subf %88, %99 : vector<32x32xf32>
    %101 = arith.mulf %98, %100 : vector<32x32xf32>
    %cst_53 = arith.constant dense<0.000000e+00> : vector<32xf32>
    %102 = vector.multi_reduction <add>, %101, %cst_53 [1] : vector<32x32xf32> to vector<32xf32>
    %103 = vector.shape_cast %102 : vector<32xf32> to vector<32x1xf32>
    %cst_54 = arith.constant 3.200000e+01 : f32
    %104 = vector.broadcast %cst_54 : f32 to vector<32x1xf32>
    %105 = arith.divf %103, %104 : vector<32x1xf32>
    %106 = vector.broadcast %96 : vector<32x1xf32> to vector<32x32xf32>
    %107 = arith.subf %88, %106 : vector<32x32xf32>
    %cst_55 = arith.constant 9.99999974E-6 : f32
    %108 = vector.broadcast %cst_55 : f32 to vector<32x1xf32>
    %109 = arith.addf %105, %108 : vector<32x1xf32>
    %110 = math.rsqrt %109 : vector<32x1xf32>
    %111 = vector.broadcast %110 : vector<32x1xf32> to vector<32x32xf32>
    %112 = arith.mulf %107, %111 : vector<32x32xf32>
    %113 = vector.broadcast %90 : vector<1x32xf32> to vector<32x32xf32>
    %114 = arith.mulf %112, %113 : vector<32x32xf32>
    %115 = vector.broadcast %92 : vector<1x32xf32> to vector<32x32xf32>
    %116 = arith.addf %114, %115 : vector<32x32xf32>
    %c0_56 = arith.constant 0 : index
    %c0_57 = arith.constant 0 : index
    %117 = vector.load %arg7[%c0_56, %c0_57] : memref<32x64xf32, #tpu.memory_space<vmem>>, vector<32x64xf32>
    %cst_58 = arith.constant dense<0.000000e+00> : vector<32x64xf32>
    %118 = tpu.matmul %116, %117, %cst_58 {dimension_numbers = #tpu.dot_dimension_numbers<[1], [0], [0], [1], [0, 0, 1, 1], [], []>} : vector<32x32xf32>, vector<32x64xf32>, vector<32x64xf32> -> vector<32x64xf32>
    %c0_59 = arith.constant 0 : index
    %c0_60 = arith.constant 0 : index
    %119 = vector.load %arg8[%c0_59, %c0_60] : memref<1x64xf32, #tpu.memory_space<vmem>>, vector<1x64xf32>
    %120 = vector.broadcast %119 : vector<1x64xf32> to vector<32x64xf32>
    %121 = arith.addf %118, %120 : vector<32x64xf32>
    %cst_61 = arith.constant 0.000000e+00 : f32
    %122 = vector.broadcast %cst_61 : f32 to vector<32x64xf32>
    %123 = arith.maximumf %121, %122 : vector<32x64xf32>
    %c0_62 = arith.constant 0 : index
    %c0_63 = arith.constant 0 : index
    %124 = vector.load %arg9[%c0_62, %c0_63] : memref<64x32xf32, #tpu.memory_space<vmem>>, vector<64x32xf32>
    %cst_64 = arith.constant dense<0.000000e+00> : vector<32x32xf32>
    %125 = tpu.matmul %123, %124, %cst_64 {dimension_numbers = #tpu.dot_dimension_numbers<[1], [0], [0], [1], [0, 0, 1, 1], [], []>} : vector<32x64xf32>, vector<64x32xf32>, vector<32x32xf32> -> vector<32x32xf32>
    %c0_65 = arith.constant 0 : index
    %c0_66 = arith.constant 0 : index
    %126 = vector.load %arg10[%c0_65, %c0_66] : memref<1x32xf32, #tpu.memory_space<vmem>>, vector<1x32xf32>
    %127 = vector.broadcast %126 : vector<1x32xf32> to vector<32x32xf32>
    %128 = arith.addf %125, %127 : vector<32x32xf32>
    %129 = arith.addf %116, %128 : vector<32x32xf32>
    %c0_67 = arith.constant 0 : index
    %c0_68 = arith.constant 0 : index
    %c0_69 = arith.constant 0 : index
    %130 = vector.load %arg11[%c0_67, %c0_68, %c0_69] : memref<2x1x32xf32, #tpu.memory_space<vmem>>, vector<1x1x32xf32>
    %131 = vector.shape_cast %130 : vector<1x1x32xf32> to vector<1x32xf32>
    %c1_70 = arith.constant 1 : index
    %c0_71 = arith.constant 0 : index
    %c0_72 = arith.constant 0 : index
    %132 = vector.load %arg11[%c1_70, %c0_71, %c0_72] : memref<2x1x32xf32, #tpu.memory_space<vmem>>, vector<1x1x32xf32>
    %133 = vector.shape_cast %132 : vector<1x1x32xf32> to vector<1x32xf32>
    %cst_73 = arith.constant dense<0.000000e+00> : vector<32xf32>
    %134 = vector.multi_reduction <add>, %129, %cst_73 [1] : vector<32x32xf32> to vector<32xf32>
    %135 = vector.shape_cast %134 : vector<32xf32> to vector<32x1xf32>
    %cst_74 = arith.constant 3.200000e+01 : f32
    %136 = vector.broadcast %cst_74 : f32 to vector<32x1xf32>
    %137 = arith.divf %135, %136 : vector<32x1xf32>
    %138 = vector.broadcast %137 : vector<32x1xf32> to vector<32x32xf32>
    %139 = arith.subf %129, %138 : vector<32x32xf32>
    %140 = vector.broadcast %137 : vector<32x1xf32> to vector<32x32xf32>
    %141 = arith.subf %129, %140 : vector<32x32xf32>
    %142 = arith.mulf %139, %141 : vector<32x32xf32>
    %cst_75 = arith.constant dense<0.000000e+00> : vector<32xf32>
    %143 = vector.multi_reduction <add>, %142, %cst_75 [1] : vector<32x32xf32> to vector<32xf32>
    %144 = vector.shape_cast %143 : vector<32xf32> to vector<32x1xf32>
    %cst_76 = arith.constant 3.200000e+01 : f32
    %145 = vector.broadcast %cst_76 : f32 to vector<32x1xf32>
    %146 = arith.divf %144, %145 : vector<32x1xf32>
    %147 = vector.broadcast %137 : vector<32x1xf32> to vector<32x32xf32>
    %148 = arith.subf %129, %147 : vector<32x32xf32>
    %cst_77 = arith.constant 9.99999974E-6 : f32
    %149 = vector.broadcast %cst_77 : f32 to vector<32x1xf32>
    %150 = arith.addf %146, %149 : vector<32x1xf32>
    %151 = math.rsqrt %150 : vector<32x1xf32>
    %152 = vector.broadcast %151 : vector<32x1xf32> to vector<32x32xf32>
    %153 = arith.mulf %148, %152 : vector<32x32xf32>
    %154 = vector.broadcast %131 : vector<1x32xf32> to vector<32x32xf32>
    %155 = arith.mulf %153, %154 : vector<32x32xf32>
    %156 = vector.broadcast %133 : vector<1x32xf32> to vector<32x32xf32>
    %157 = arith.addf %155, %156 : vector<32x32xf32>
    %158 = vector.extract_strided_slice %157 {offsets = [0, 0], sizes = [16, 32], strides = [1, 1]} : vector<32x32xf32> to vector<16x32xf32>
    %c0_78 = arith.constant 0 : index
    %c0_79 = arith.constant 0 : index
    %c0_80 = arith.constant 0 : index
    %159 = vector.load %arg14[%c0_78, %c0_79, %c0_80] : memref<2x16x32xf32, #tpu.memory_space<vmem>>, vector<1x16x32xf32>
    %160 = vector.shape_cast %159 : vector<1x16x32xf32> to vector<16x32xf32>
    %161 = vector.shape_cast %158 : vector<16x32xf32> to vector<1x16x32xf32>
    tpu.vector_store %arg14[%c0_78, %c0_79, %c0_80], %161 {strides = array<i32>} : memref<2x16x32xf32, #tpu.memory_space<vmem>>, vector<1x16x32xf32>,
    %162 = vector.extract_strided_slice %157 {offsets = [16, 0], sizes = [16, 32], strides = [1, 1]} : vector<32x32xf32> to vector<16x32xf32>
    %c1_81 = arith.constant 1 : index
    %c0_82 = arith.constant 0 : index
    %c0_83 = arith.constant 0 : index
    %163 = vector.load %arg14[%c1_81, %c0_82, %c0_83] : memref<2x16x32xf32, #tpu.memory_space<vmem>>, vector<1x16x32xf32>
    %164 = vector.shape_cast %163 : vector<1x16x32xf32> to vector<16x32xf32>
    %165 = vector.shape_cast %162 : vector<16x32xf32> to vector<1x16x32xf32>
    tpu.vector_store %arg14[%c1_81, %c0_82, %c0_83], %165 {strides = array<i32>} : memref<2x16x32xf32, #tpu.memory_space<vmem>>, vector<1x16x32xf32>,
    return
  }
  func.func @transform_0(%arg0: i32) -> (i32, i32, i32) {
    %c0_i32 = arith.constant 0 : i32
    %c0_i32_0 = arith.constant 0 : i32
    %c0_i32_1 = arith.constant 0 : i32
    return %c0_i32, %arg0, %c0_i32_0 : i32, i32, i32
  }
  func.func @transform_1(%arg0: i32) -> (i32, i32, i32) {
    %c0_i32 = arith.constant 0 : i32
    %c0_i32_0 = arith.constant 0 : i32
    %c0_i32_1 = arith.constant 0 : i32
    %c0_i32_2 = arith.constant 0 : i32
    return %c0_i32, %c0_i32_0, %c0_i32_1 : i32, i32, i32
  }
  func.func @transform_2(%arg0: i32) -> (i32, i32, i32) {
    %c0_i32 = arith.constant 0 : i32
    %c0_i32_0 = arith.constant 0 : i32
    %c0_i32_1 = arith.constant 0 : i32
    %c0_i32_2 = arith.constant 0 : i32
    return %c0_i32, %c0_i32_0, %c0_i32_1 : i32, i32, i32
  }
  func.func @transform_3(%arg0: i32) -> (i32, i32) {
    %c0_i32 = arith.constant 0 : i32
    %c0_i32_0 = arith.constant 0 : i32
    %c0_i32_1 = arith.constant 0 : i32
    return %c0_i32, %c0_i32_0 : i32, i32
  }
  func.func @transform_4(%arg0: i32) -> (i32, i32) {
    %c0_i32 = arith.constant 0 : i32
    %c0_i32_0 = arith.constant 0 : i32
    %c0_i32_1 = arith.constant 0 : i32
    return %c0_i32, %c0_i32_0 : i32, i32
  }
  func.func @transform_5(%arg0: i32) -> (i32, i32, i32) {
    %c0_i32 = arith.constant 0 : i32
    %c0_i32_0 = arith.constant 0 : i32
    %c0_i32_1 = arith.constant 0 : i32
    %c0_i32_2 = arith.constant 0 : i32
    return %c0_i32, %c0_i32_0, %c0_i32_1 : i32, i32, i32
  }
  func.func @transform_6(%arg0: i32) -> (i32, i32) {
    %c0_i32 = arith.constant 0 : i32
    %c0_i32_0 = arith.constant 0 : i32
    %c0_i32_1 = arith.constant 0 : i32
    return %c0_i32, %c0_i32_0 : i32, i32
  }
  func.func @transform_7(%arg0: i32) -> (i32, i32) {
    %c0_i32 = arith.constant 0 : i32
    %c0_i32_0 = arith.constant 0 : i32
    %c0_i32_1 = arith.constant 0 : i32
    return %c0_i32, %c0_i32_0 : i32, i32
  }
  func.func @transform_8(%arg0: i32) -> (i32, i32) {
    %c0_i32 = arith.constant 0 : i32
    %c0_i32_0 = arith.constant 0 : i32
    %c0_i32_1 = arith.constant 0 : i32
    return %c0_i32, %c0_i32_0 : i32, i32
  }
  func.func @transform_9(%arg0: i32) -> (i32, i32) {
    %c0_i32 = arith.constant 0 : i32
    %c0_i32_0 = arith.constant 0 : i32
    %c0_i32_1 = arith.constant 0 : i32
    return %c0_i32, %c0_i32_0 : i32, i32
  }
  func.func @transform_10(%arg0: i32) -> (i32, i32, i32) {
    %c0_i32 = arith.constant 0 : i32
    %c0_i32_0 = arith.constant 0 : i32
    %c0_i32_1 = arith.constant 0 : i32
    %c0_i32_2 = arith.constant 0 : i32
    return %c0_i32, %c0_i32_0, %c0_i32_1 : i32, i32, i32
  }
  func.func @transform_11(%arg0: i32) -> (i32, i32) {
    %c0_i32 = arith.constant 0 : i32
    %c0_i32_0 = arith.constant 0 : i32
    %c0_i32_1 = arith.constant 0 : i32
    return %c0_i32, %c0_i32_0 : i32, i32
  }
  func.func @transform_12(%arg0: i32) -> (i32, i32) {
    %c0_i32 = arith.constant 0 : i32
    %c0_i32_0 = arith.constant 0 : i32
    %c0_i32_1 = arith.constant 0 : i32
    return %c0_i32, %c0_i32_0 : i32, i32
  }
  func.func @transform_13(%arg0: i32) -> (i32, i32, i32) {
    %c0_i32 = arith.constant 0 : i32
    %c0_i32_0 = arith.constant 0 : i32
    %c0_i32_1 = arith.constant 0 : i32
    return %c0_i32, %arg0, %c0_i32_0 : i32, i32, i32
  }
}

</mosaic_0001>

<bundles_post_ra>
// kernel: tpu_custom_call.1
= control target key start
LH: loop header
LB: loop body
LE: loop exit
PB: predicated region body
PF: predicated region fallthrough
CT: control target
= control target key end

     0   :  { %6 = vsyncpa [#allocation3], 0  ;;  %s115_s0 = inlined_call_operand.hbm [shape: f32[8,128], index: 0, kind: input, shape index: {}]   ;;  %s116_s1 = inlined_call_operand.hbm [shape: f32[8,128], index: 1, kind: output, shape index: {}]  }
   0x1   :  { %7 = vsyncpa [#allocation4], 0  ;;  %s13_s8 = sshll.u32 %s115_s0, 4  ;;  %s97_s9 = smov [#allocation2]   ;;  %s14_s8 = int_to_ptr.hbm [resolvable:$true] %s13_s8 }
   0x2   :  { %s15_s10 = sshll.u32 %s97_s9, 4  ;;  %s16_s10 = int_to_ptr.vmem [resolvable:$true] %s15_s10 }
   0x3   :  { %18 = dma.hbm_to_vmem [thread:$0]  %s14_s8, 128, %s16_s10, [#allocation3]  }
   0x4   :  { %93 = dma.done.wait [#allocation3], 128  }
   0x5   :  { %94 = vsyncadd [#allocation3], 4294967168  ;;  %s98_s11 = smov [#allocation5]   ;;  %s33_s15 = sshll.u32 %s116_s1, 4  ;;  %v23_v0 = vld [vmem:[#allocation2] sm:$0xff]  ;;  %s34_s15 = int_to_ptr.hbm [resolvable:$true] %s33_s15 }
   0x6   :  { %s31_s12 = sshll.u32 %s98_s11, 4  ;;  %v24_v1 = vrot.slane %v23_v0, 7  ;;  %s32_s12 = int_to_ptr.vmem [resolvable:$true] %s31_s12 }
   0x8   :  { %25 = vst [vmem:[#allocation5] sm:$0xff] %v24_v1 }
   0x9   :  { %36 = dma.vmem_to_hbm [thread:$0]  %s32_s12, 128, %s34_s15, [#allocation4]  }
   0xa   :  { %95 = dma.done.wait [#allocation4], 128  }
   0xb   :  { %96 = vsyncadd [#allocation4], 4294967168 }
   0xc   :  { %41 = vsyncpa [#allocation3], 1 }
   0xd   :  { %42 = vsyncpa [#allocation4], 1 }

// kernel: tpu_custom_call.1
= control target key start
LH: loop header
LB: loop body
LE: loop exit
PB: predicated region body
PF: predicated region fallthrough
CT: control target
= control target key end

     0   :  { %18 = vsyncpa [#allocation3], 0  ;;  %s1707_s0 = inlined_call_operand.hbm [shape: f32[2,16,32], index: 0, kind: input, shape index: {}]   ;;  %s1708_s1 = inlined_call_operand.vmem [shape: f32[3,32,32], index: 1, kind: input, shape index: {}]   ;;  %s1709_s2 = inlined_call_operand.vmem [shape: f32[3,1,32], index: 2, kind: input, shape index: {}]   ;;  %s1710_s3 = inlined_call_operand.hbm [shape: f32[32,32], index: 3, kind: input, shape index: {}]   ;;  %s1711_s4 = inlined_call_operand.hbm [shape: f32[1,32], index: 4, kind: input, shape index: {}]   ;;  %s1712_s5 = inlined_call_operand.vmem [shape: f32[2,1,32], index: 5, kind: input, shape index: {}]   ;;  %s1713_s6 = inlined_call_operand.hbm [shape: f32[32,64], index: 6, kind: input, shape index: {}]   ;;  %s1714_s7 = inlined_call_operand.hbm [shape: f32[1,64], index: 7, kind: input, shape index: {}]   ;;  %s1715_s8 = inlined_call_operand.vmem [shape: f32[64,32], index: 8, kind: input, shape index: {}]   ;;  %s1716_s9 = inlined_call_operand.hbm [shape: f32[1,32], index: 9, kind: input, shape index: {}]   ;;  %s1717_s10 = inlined_call_operand.vmem [shape: f32[2,1,32], index: 10, kind: input, shape index: {}]   ;;  %s1718_s11 = inlined_call_operand.vmem [shape: f32[32,16], index: 11, kind: input, shape index: {}]   ;;  %s1719_s12 = inlined_call_operand.vmem [shape: f32[16,32], index: 12, kind: input, shape index: {}]   ;;  %s1720_s13 = inlined_call_operand.hbm [shape: f32[2,16,32], index: 13, kind: output, shape index: {}]  }
   0x1   :  { %19 = vsyncpa [#allocation6], 0 }
   0x2   :  { %20 = vsyncpa [#allocation9], 0 }
   0x3   :  { %21 = vsyncpa [#allocation12], 0 }
   0x4   :  { %22 = vsyncpa [#allocation4], 0  ;;  %s44_s27 = sshll.u32 %s1710_s3, 4  ;;  %s1337_s28 = smov [#allocation5]   ;;  %s45_s27 = int_to_ptr.hbm [resolvable:$true] %s44_s27 }
   0x5   :  { %s46_s29 = sshll.u32 %s1337_s28, 4  ;;  %s70_s15 = sshll.u32 %s1713_s6, 4  ;;  %s47_s29 = int_to_ptr.vmem [resolvable:$true] %s46_s29  ;;  %s71_s15 = int_to_ptr.hbm [resolvable:$true] %s70_s15 }
   0x6   :  { %s1338_s16 = smov 128   ;;  %s1339_s17 = smov 8  }
   0x7   :  { %52 = dma.hbm_to_vmem [thread:$0]  %s45_s27, 512, %s47_s29, [#allocation6], %s1338_s16, %s1338_s16, %s1339_s17  }
   0x8   :  { %s1340_s18 = smov [#allocation8]   ;;  %s27_s3 = sshll.u32 %s1707_s0, 4  ;;  %s28_s3 = int_to_ptr.hbm [resolvable:$true] %s27_s3 }
   0x9   :  { %s72_s19 = sshll.u32 %s1340_s18, 4  ;;  %s58_s23 = sshll.u32 %s1711_s4, 4  ;;  %s73_s19 = int_to_ptr.vmem [resolvable:$true] %s72_s19  ;;  %s59_s23 = int_to_ptr.hbm [resolvable:$true] %s58_s23 }
   0xa   :  { %78 = dma.hbm_to_vmem [thread:$0]  %s71_s15, 512, %s73_s19, [#allocation9], %s1338_s16, %s1338_s16, %s1339_s17  }
   0xb   :  { %s1341_s24 = smov [#allocation2]   ;;  %s1342_s26 = smov [#allocation7]  }
   0xc   :  { %s29_s25 = sshll.u32 %s1341_s24, 4  ;;  %s60_s0 = sshll.u32 %s1342_s26, 4  ;;  %s30_s25 = int_to_ptr.vmem [resolvable:$true] %s29_s25  ;;  %s61_s0 = int_to_ptr.vmem [resolvable:$true] %s60_s0 }
   0xd   :  { %35 = dma.hbm_to_vmem [thread:$0]  %s28_s3, 512, %s30_s25, [#allocation3], %s1338_s16, %s1338_s16, %s1339_s17  }
   0xe   :  { %s84_s29 = sshll.u32 %s1714_s7, 4  ;;  %s97_s4 = sshll.u32 %s1716_s9, 4  ;;  %s85_s29 = int_to_ptr.hbm [resolvable:$true] %s84_s29  ;;  %s98_s4 = int_to_ptr.hbm [resolvable:$true] %s97_s4 }
   0xf   :  { %63 = dma.hbm_to_vmem [thread:$0]  %s59_s23, 16, %s61_s0, [#allocation6]  }
  0x10   :  { %s1343_s15 = smov [#allocation10]   ;;  %s1344_s19 = smov [#allocation11]  }
  0x11   :  { %s86_s18 = sshll.u32 %s1343_s15, 4  ;;  %s99_s20 = sshll.u32 %s1344_s19, 4  ;;  %s87_s18 = int_to_ptr.vmem [resolvable:$true] %s86_s18  ;;  %s100_s20 = int_to_ptr.vmem [resolvable:$true] %s99_s20 }
  0x12   :  { %89 = dma.hbm_to_vmem [thread:$0]  %s85_s29, 16, %s87_s18, [#allocation9]  }
  0x13   :  { %102 = dma.hbm_to_vmem [thread:$0]  %s98_s4, 16, %s100_s20, [#allocation12]  }
  0x14   :  { %1327 = dma.done.wait [#allocation3], 512  }
  0x15   :  { %1328 = vsyncadd [#allocation3], 4294966784 }
  0x16   :  { %1329 = dma.done.wait [#allocation6], 528  }
  0x17   :  { %1330 = vsyncadd [#allocation6], 4294966768 }
  0x18   :  { %1331 = dma.done.wait [#allocation9], 528  }
  0x19   :  { %1332 = vsyncadd [#allocation9], 4294966768 }
  0x1a   :  { %1333 = dma.done.wait [#allocation12], 16  }
  0x1b   :  { %1334 = vsyncadd [#allocation12], 4294967280  ;;  %v141_v0 = vld [vmem:[%s1708_s1 + $0x18] sm:$0xff]  ;;  %v140_v1 = vld [vmem:[%s1708_s1 + $0x10] sm:$0xff]  ;;  %vm146_vm0 = vcmask 261120   ;;  %vm386_vm5 = vcmask 130048  }
  0x1c   :  { %1093 = vmatpush.msra.mxu1 %v141_v0  ;;  %171 = vmatpush.msra.mxu0 %v141_v0  ;;  %v139_v2 = vld [vmem:[%s1708_s1 + $0x8] sm:$0xff]  ;;  %v138_v3 = vld [vmem:[%s1708_s1] sm:$0xff]  ;;  %v1456_v4 = vld [vmem:[#allocation2 + $0x10] sm:$0xff] }
  0x1d   :  { %v1458_v5 = vld [vmem:[#allocation2] sm:$0xff]  ;;  %v1048_v6 = vld [vmem:[%s1708_s1 + $0x38] sm:$0xff]  ;;  %v1047_v7 = vld [vmem:[%s1708_s1 + $0x30] sm:$0xff] }
  0x1e   :  { %1094 = vmatpush.msra.mxu1 %v140_v1  ;;  %172 = vmatpush.msra.mxu0 %v140_v1  ;;  %v1046_v8 = vld [vmem:[%s1708_s1 + $0x28] sm:$0xff]  ;;  %v1045_v9 = vld [vmem:[%s1708_s1 + $0x20] sm:$0xff]  ;;  %v1476_v10 = vld [vmem:[#allocation2 + $0x18] sm:$0xff] }
  0x1f   :  { %v1478_v11 = vld [vmem:[#allocation2 + $0x8] sm:$0xff]  ;;  %v1057_v12 = vld [vmem:[%s1708_s1 + $0x58] sm:$0xff]  ;;  %v1056_v13 = vld [vmem:[%s1708_s1 + $0x50] sm:$0xff] }
  0x20   :  { %1095 = vmatpush.msra.mxu1 %v139_v2  ;;  %173 = vmatpush.msra.mxu0 %v139_v2  ;;  %v1055_v14 = vld [vmem:[%s1708_s1 + $0x48] sm:$0xff]  ;;  %v1054_v15 = vld [vmem:[%s1708_s1 + $0x40] sm:$0xff]  ;;  %v273_v16 = vld [vmem:[%s1718_s11 + $0x18] sm:$0xff] }
  0x21   :  { %253 = vmatpush.msra.mxu2 %v1057_v12  ;;  %296 = vmatpush.msra.mxu3 %v273_v16  ;;  %v272_v17 = vld [vmem:[%s1718_s11 + $0x10] sm:$0xff]  ;;  %v271_v18 = vld [vmem:[%s1718_s11 + $0x8] sm:$0xff]  ;;  %v270_v19 = vld [vmem:[%s1718_s11] sm:$0xff] }
  0x22   :  { %1096 = vmatpush.msra.mxu1 %v138_v3  ;;  %174 = vmatpush.msra.mxu0 %v138_v3  ;;  %v1107_v23 = vld [vmem:[%s1709_s2] ss:$0 sm:$0xff]  ;;  %v1108_v26 = vld [vmem:[%s1709_s2 + $0x1] ss:$0 sm:$0xff]  ;;  %v275_v53 = vld [vmem:[%s1719_s12 + $0x8] sm:$0xff] }
  0x23   :  { %1043 = vmatmul.msk.f32.vlgmr.msra.gmra.mxu1 %vm146_vm0, %v1456_v4  ;;  %1041 = vmatmul.msk.f32.vlgmr.msra.gmra.mxu0 %vm146_vm0, %v1458_v5  ;;  %v274_v58 = vld [vmem:[%s1719_s12] sm:$0xff] }
  0x24   :  { %214 = vmatpush.msrb.mxu1 %v1048_v6  ;;  %254 = vmatpush.msra.mxu2 %v1056_v13 }
  0x25   :  { %297 = vmatpush.msra.mxu3 %v272_v17  ;;  %407 = vmatpush.msrb.mxu0 %v275_v53 }
  0x26   :  { %215 = vmatpush.msrb.mxu1 %v1047_v7  ;;  %255 = vmatpush.msra.mxu2 %v1055_v14 }
  0x27   :  { %298 = vmatpush.msra.mxu3 %v271_v18  ;;  %408 = vmatpush.msrb.mxu0 %v274_v58 }
  0x28   :  { %216 = vmatpush.msrb.mxu1 %v1046_v8  ;;  %256 = vmatpush.msra.mxu2 %v1054_v15 }
  0x29   :  { %1059 = vmatmul.msk.f32.vlgmr.msra.gmra.mxu2 %vm146_vm0, %v1458_v5  ;;  %299 = vmatpush.msra.mxu3 %v270_v19 }
  0x2a   :  { %217 = vmatpush.msrb.mxu1 %v1045_v9  ;;  %475 = vmatpush.msrb.mxu2 %v273_v16 }
  0x2b   :  { %1044 = vmatmul.msk.f32.gmra.mxu1 %vm146_vm0, %v1476_v10  ;;  %1042 = vmatmul.msk.f32.gmra.mxu0 %vm146_vm0, %v1478_v11 }
  0x2c   :  { %476 = vmatpush.msrb.mxu2 %v272_v17  ;;  %327 = vmatpush.msrb.mxu3 %v273_v16 }
  0x2d   :  { %442 = vmatpush.msra.mxu1 %v275_v53  ;;  %585 = vmatpush.msra.mxu0 %v275_v53 }
  0x2e   :  { %477 = vmatpush.msrb.mxu2 %v271_v18  ;;  %328 = vmatpush.msrb.mxu3 %v272_v17 }
  0x2f   :  { %443 = vmatpush.msra.mxu1 %v274_v58  ;;  %586 = vmatpush.msra.mxu0 %v274_v58 }
  0x30   :  { %478 = vmatpush.msrb.mxu2 %v270_v19  ;;  %329 = vmatpush.msrb.mxu3 %v271_v18 }
  0x31   :  { %1060 = vmatmul.msk.f32.gmra.mxu2 %vm146_vm0, %v1478_v11 }
  0x32   :  { %330 = vmatpush.msrb.mxu3 %v270_v19 }
  0x33   :  { %1050 = vmatmul.msk.f32.vlgmr.msrb.gmra.mxu1 %vm146_vm0, %v1458_v5 }
  0x34   :  { %620 = vmatpush.msrb.mxu1 %v275_v53 }
  0x36   :  { %621 = vmatpush.msrb.mxu1 %v274_v58 }
  0x39   :  { %1061 = vmatmul.msk.f32.gmra.mxu2 %vm146_vm0, %v1456_v4 }
  0x3b   :  { %1051 = vmatmul.msk.f32.gmra.mxu1 %vm146_vm0, %v1478_v11 }
  0x41   :  { %1062 = vmatmul.msk.f32.gmra.mxu2 %vm146_vm0, %v1476_v10 }
  0x43   :  { %1052 = vmatmul.msk.f32.gmra.mxu1 %vm146_vm0, %v1456_v4 }
  0x4b   :  { %1053 = vmatmul.msk.f32.gmra.mxu1 %vm146_vm0, %v1476_v10 }
  0xa0   :  { %v182_v20 = vpop.f32.mrf.mxu1  ;;  %v176_v21 = vpop.f32.mrf.mxu0 }
  0xa1   :  { %v177_v24 = vadd.f32 %v1107_v23, %v176_v21  ;;  %v183_v25 = vadd.f32 %v1107_v23, %v182_v20 }
  0xa3   :  { %v188_v27 = vmul.f32 0.70710677, %v177_v24  ;;  %v190_v30 = vmul.f32 0.70710677, %v183_v25 }
  0xa8   :  { %v185_v22 = vpop.f32.mrf.mxu1  ;;  %v179_v29 = vpop.f32.mrf.mxu0 }
  0xa9   :  { %v180_v34 = vadd.f32 %v1107_v23, %v179_v29  ;;  %v186_v35 = vadd.f32 %v1107_v23, %v185_v22 }
  0xab   :  { %v189_v36 = vmul.f32 0.70710677, %v180_v34  ;;  %v191_v38 = vmul.f32 0.70710677, %v186_v35 }
  0xac   :  { %v1538_v50 = vpop.f32.mrf.mxu2 }
  0xb0   :  { %v219_v28 = vpop.f32.mrf.mxu1 }
  0xb1   :  { %v220_v31 = vadd.f32 %v1108_v26, %v219_v28 }
  0xb3   :  { %v276_v32 = vmul.f32 %v220_v31, %v188_v27  ;;  %v455_v33 = vmul.f32 %v220_v31, %v190_v30 }
  0xb4   :  { %v1540_v51 = vpop.f32.mrf.mxu2 }
  0xb5   :  { %1063 = vmatmul.msk.f32.vlgmr.msra.gmra.mxu3 %vm146_vm0, %v276_v32  ;;  %1071 = vmatmul.msk.f32.vlgmr.msrb.gmra.mxu2 %vm146_vm0, %v455_v33 }
  0xb6   :  { %506 = vmatpush.msra.mxu3 %v273_v16 }
  0xb8   :  { %v222_v37 = vpop.f32.mrf.mxu1  ;;  %507 = vmatpush.msra.mxu3 %v272_v17 }
  0xb9   :  { %v223_v39 = vadd.f32 %v1108_v26, %v222_v37  ;;  %v636_v37 = vld [vmem:[#allocation5 + $0x18] sm:$0xff] }
  0xba   :  { %508 = vmatpush.msra.mxu3 %v271_v18  ;;  %665 = vmatpush.msra.mxu2 %v636_v37 }
  0xbb   :  { %v277_v40 = vmul.f32 %v223_v39, %v189_v36  ;;  %v456_v41 = vmul.f32 %v223_v39, %v191_v38 }
  0xbc   :  { %509 = vmatpush.msra.mxu3 %v270_v19  ;;  %v1545_v55 = vpop.f32.mrf.mxu2 }
  0xbd   :  { %1064 = vmatmul.msk.f32.gmra.mxu3 %vm146_vm0, %v277_v40  ;;  %1072 = vmatmul.msk.f32.gmra.mxu2 %vm146_vm0, %v456_v41 }
  0xc0   :  { %v225_v42 = vpop.f32.mrf.mxu1 }
  0xc1   :  { %v226_v43 = vadd.f32 %v1108_v26, %v225_v42 }
  0xc3   :  { %v307_v44 = vmul.f32 %v226_v43, %v188_v27  ;;  %v486_v48 = vmul.f32 %v226_v43, %v190_v30  ;;  %v634_v43 = vld [vmem:[#allocation5 + $0x8] sm:$0xff] }
  0xc4   :  { %v1550_v61 = vpop.f32.mrf.mxu2 }
  0xc5   :  { %1065 = vmatmul.msk.f32.vlgmr.msrb.gmra.mxu3 %vm146_vm0, %v307_v44 }
  0xc8   :  { %v228_v45 = vpop.f32.mrf.mxu1 }
  0xc9   :  { %v229_v46 = vadd.f32 %v1108_v26, %v228_v45 }
  0xcb   :  { %v308_v47 = vmul.f32 %v229_v46, %v189_v36  ;;  %v487_v49 = vmul.f32 %v229_v46, %v191_v38  ;;  %v635_v38 = vld [vmem:[#allocation5 + $0x10] sm:$0xff] }
  0xcc   :  { %666 = vmatpush.msra.mxu2 %v635_v38 }
  0xcd   :  { %1066 = vmatmul.msk.f32.gmra.mxu3 %vm146_vm0, %v308_v47 }
  0xce   :  { %667 = vmatpush.msra.mxu2 %v634_v43 }
  0xd5   :  { %1073 = vmatmul.msk.f32.vlgmr.msra.gmra.mxu3 %vm146_vm0, %v486_v48 }
  0xdd   :  { %1074 = vmatmul.msk.f32.gmra.mxu3 %vm146_vm0, %v487_v49 }
 0x138   :  { %v301_v52 = vpop.f32.mrf.mxu3  ;;  %v480_v12 = vpop.f32.mrf.mxu2 }
 0x140   :  { %v304_v54 = vpop.f32.mrf.mxu3  ;;  %v483_v24 = vpop.f32.mrf.mxu2 }
 0x148   :  { %v332_v56 = vpop.f32.mrf.mxu3 }
 0x149   :  { %v338_v57 = vmax.f32 %v301_v52, %v332_v56 }
 0x14b   :  { %v340_v59 = vsub.f32 %v301_v52, %v338_v57  ;;  %v346_v60 = vsub.f32 %v332_v56, %v338_v57 }
 0x14d   :  { %v342_v62 = vmul.f32 1.442695, %v340_v59  ;;  %v348_v63 = vmul.f32 1.442695, %v346_v60 }
 0x14f   :  { %1117 = vpow2.f32 %v342_v62 }
 0x150   :  { %1119 = vpow2.f32 %v348_v63  ;;  %v335_v0 = vpop.f32.mrf.mxu3 }
 0x151   :  { %v339_v1 = vmax.f32 %v304_v54, %v335_v0 }
 0x153   :  { %v341_v2 = vsub.f32 %v304_v54, %v339_v1  ;;  %v347_v3 = vsub.f32 %v335_v0, %v339_v1 }
 0x155   :  { %v1118_v6 = vpop.eup %1117  ;;  %v344_v7 = vmul.f32 1.442695, %v341_v2  ;;  %v350_v8 = vmul.f32 1.442695, %v347_v3 }
 0x156   :  { %v1120_v9 = vpop.eup %1119 }
 0x157   :  { %v352_v13 = vadd.f32 %v1120_v9, %v1118_v6  ;;  %1121 = vpow2.f32 %v344_v7 }
 0x158   :  { %1123 = vpow2.f32 %v350_v8  ;;  %v511_v14 = vpop.f32.mrf.mxu3 }
 0x159   :  { %1125 = vrcp.f32 %v352_v13  ;;  %v517_v15 = vmax.f32 %v480_v12, %v511_v14  ;;  %v363_v32 = vand.u32 2147483647, %v352_v13  ;;  %v365_v33 = vand.u32 2147483648, %v352_v13 }
 0x15a   :  { %vm359_vm2 = vweird.f32 %v352_v13 }
 0x15b   :  { %v519_v16 = vsub.f32 %v480_v12, %v517_v15  ;;  %v525_v17 = vsub.f32 %v511_v14, %v517_v15  ;;  %v366_v45 = vor.u32 1.1754944e-38, %v365_v33  ;;  %vm364_vm4 = vcmp.eq.f32.partialorder %v363_v32, 8.507059e+37  ;;  %v1109_v32 = vld [vmem:[%s1709_s2 + $0x2] ss:$0 sm:$0xff]  ;;  %s1025_s2 = sshll.u32 %s1720_s13, 4  ;;  %s1026_s2 = int_to_ptr.hbm [resolvable:$true] %s1025_s2 }
 0x15c   :  { %v259_v33 = vadd.f32 %v1109_v32, %v1538_v50 }
 0x15d   :  { %v1552_v18 = vpop.eup %1121  ;;  %v521_v19 = vmul.f32 1.442695, %v519_v16  ;;  %v527_v20 = vmul.f32 1.442695, %v525_v17 }
 0x15e   :  { %v1554_v21 = vpop.eup %1123 }
 0x15f   :  { %v1126_v22 = vpop.eup %1125  ;;  %v353_v23 = vadd.f32 %v1554_v21, %v1552_v18  ;;  %1127 = vpow2.f32 %v521_v19 }
 0x160   :  { %1129 = vpow2.f32 %v527_v20  ;;  %v514_v25 = vpop.f32.mrf.mxu3  ;;  %v355_v26 = vmul.f32 %v1126_v22, %v352_v13  ;;  %vm360_vm1 = vweird.f32 %v1126_v22 }
 0x161   :  { %1131 = vrcp.f32 %v353_v23  ;;  %v518_v27 = vmax.f32 %v483_v24, %v514_v25  ;;  %vm361_vm3 = vmor %vm359_vm2, %vm360_vm1  ;;  %v380_v53 = vand.u32 2147483648, %v353_v23  ;;  %v378_v56 = vand.u32 2147483647, %v353_v23 }
 0x162   :  { %v356_v28 = vsub.f32 1.0, %v355_v26  ;;  %vm374_vm7 = vweird.f32 %v353_v23 }
 0x163   :  { %v520_v29 = vsub.f32 %v483_v24, %v518_v27  ;;  %v526_v30 = vsub.f32 %v514_v25, %v518_v27  ;;  %v381_v63 = vor.u32 1.1754944e-38, %v380_v53  ;;  %vm379_vm9 = vcmp.eq.f32.partialorder %v378_v56, 8.507059e+37 }
 0x164   :  { %v357_v31 = vmul.f32 %v1126_v22, %v356_v28 }
 0x165   :  { %v1558_v34 = vpop.eup %1127  ;;  %v523_v35 = vmul.f32 1.442695, %v520_v29  ;;  %v529_v36 = vmul.f32 1.442695, %v526_v30 }
 0x166   :  { %v1130_v39 = vpop.eup %1129  ;;  %v358_v40 = vadd.f32 %v1126_v22, %v357_v31  ;;  %v633_v31 = vld [vmem:[#allocation5] sm:$0xff] }
 0x167   :  { %v1132_v41 = vpop.eup %1131  ;;  %v531_v42 = vadd.f32 %v1130_v39, %v1558_v34  ;;  %1133 = vpow2.f32 %v523_v35  ;;  %668 = vmatpush.msra.mxu2 %v633_v31 }
 0x168   :  { %1135 = vpow2.f32 %v529_v36  ;;  %v362_v44 = vsel %vm361_vm3, %v1126_v22, %v358_v40  ;;  %v370_v46 = vmul.f32 %v1132_v41, %v353_v23  ;;  %vm375_vm6 = vweird.f32 %v1132_v41 }
 0x169   :  { %1137 = vrcp.f32 %v531_v42  ;;  %v367_v47 = vsel %vm364_vm4, %v366_v45, %v362_v44  ;;  %vm376_vm8 = vmor %vm374_vm7, %vm375_vm6  ;;  %v544_v8 = vand.u32 2147483648, %v531_v42  ;;  %v542_v12 = vand.u32 2147483647, %v531_v42 }
 0x16a   :  { %v371_v48 = vsub.f32 1.0, %v370_v46  ;;  %v384_v49 = vmul.f32 %v1118_v6, %v367_v47  ;;  %v420_v52 = vmul.f32 %v1120_v9, %v367_v47  ;;  %vm538_vm11 = vweird.f32 %v531_v42 }
 0x16b   :  { %v545_v15 = vor.u32 1.1754944e-38, %v544_v8  ;;  %vm543_vm13 = vcmp.eq.f32.partialorder %v542_v12, 8.507059e+37  ;;  %v262_v40 = vadd.f32 %v1109_v32, %v1540_v51 }
 0x16c   :  { %v372_v54 = vmul.f32 %v1132_v41, %v371_v48  ;;  %1067 = vmatmul.msk.f32.vlgmr.msrb.gmra.mxu0 %vm386_vm5, %v384_v49  ;;  %1069 = vmatmul.msk.f32.vlgmr.msra.gmra.mxu1 %vm386_vm5, %v420_v52 }
 0x16d   :  { %v1134_v57 = vpop.eup %1133 }
 0x16e   :  { %v1136_v58 = vpop.eup %1135  ;;  %v373_v59 = vadd.f32 %v1132_v41, %v372_v54 }
 0x16f   :  { %v1138_v60 = vpop.eup %1137  ;;  %v532_v62 = vadd.f32 %v1136_v58, %v1134_v57 }
 0x170   :  { %v534_v0 = vmul.f32 %v1138_v60, %v531_v42  ;;  %v377_v1 = vsel %vm376_vm8, %v1132_v41, %v373_v59  ;;  %vm539_vm10 = vweird.f32 %v1138_v60  ;;  %v268_v41 = vadd.f32 %v1109_v32, %v1550_v61  ;;  %v1110_v61 = vld [vmem:[#allocation7] ss:$0 sm:$0xff] }
 0x171   :  { %1139 = vrcp.f32 %v532_v62  ;;  %v382_v2 = vsel %vm379_vm9, %v381_v63, %v377_v1  ;;  %vm540_vm12 = vmor %vm538_vm11, %vm539_vm10  ;;  %v559_v22 = vand.u32 2147483648, %v532_v62  ;;  %v557_v24 = vand.u32 2147483647, %v532_v62 }
 0x172   :  { %v535_v3 = vsub.f32 1.0, %v534_v0  ;;  %v385_v6 = vmul.f32 %v1552_v18, %v382_v2  ;;  %v421_v7 = vmul.f32 %v1554_v21, %v382_v2  ;;  %vm553_vm15 = vweird.f32 %v532_v62 }
 0x173   :  { %v560_v26 = vor.u32 1.1754944e-38, %v559_v22  ;;  %vm558_vm2 = vcmp.eq.f32.partialorder %v557_v24, 8.507059e+37 }
 0x174   :  { %v536_v9 = vmul.f32 %v1138_v60, %v535_v3  ;;  %1068 = vmatmul.msk.f32.gmra.mxu0 %vm386_vm5, %v385_v6  ;;  %1070 = vmatmul.msk.f32.gmra.mxu1 %vm386_vm5, %v421_v7 }
 0x176   :  { %v537_v13 = vadd.f32 %v1138_v60, %v536_v9 }
 0x177   :  { %v1140_v14 = vpop.eup %1139 }
 0x178   :  { %v541_v16 = vsel %vm540_vm12, %v1138_v60, %v537_v13  ;;  %v549_v17 = vmul.f32 %v1140_v14, %v532_v62  ;;  %vm554_vm14 = vweird.f32 %v1140_v14  ;;  %v1345_v13 = vmov 32.0  }
 0x179   :  { %v546_v19 = vsel %vm543_vm13, %v545_v15, %v541_v16  ;;  %vm555_vm1 = vmor %vm553_vm15, %vm554_vm14  ;;  %1141 = vrcp.f32 %v1345_v13 }
 0x17a   :  { %v563_v18 = vmul.f32 %v1558_v34, %v546_v19  ;;  %v598_v20 = vmul.f32 %v1130_v39, %v546_v19  ;;  %v550_v21 = vsub.f32 1.0, %v549_v17  ;;  %v265_v34 = vadd.f32 %v1109_v32, %v1545_v55 }
 0x17c   :  { %v551_v23 = vmul.f32 %v1140_v14, %v550_v21  ;;  %1075 = vmatmul.msk.f32.vlgmr.msra.gmra.mxu0 %vm386_vm5, %v563_v18  ;;  %1077 = vmatmul.msk.f32.vlgmr.msrb.gmra.mxu1 %vm386_vm5, %v598_v20 }
 0x17e   :  { %v552_v25 = vadd.f32 %v1140_v14, %v551_v23 }
 0x180   :  { %v556_v27 = vsel %vm555_vm1, %v1140_v14, %v552_v25  ;;  %vm863_vm1 = vcmask 523264  }
 0x181   :  { %v561_v28 = vsel %vm558_vm2, %v560_v26, %v556_v27 }
 0x182   :  { %v564_v29 = vmul.f32 %v1134_v57, %v561_v28  ;;  %v599_v30 = vmul.f32 %v1136_v58, %v561_v28 }
 0x184   :  { %1076 = vmatmul.msk.f32.gmra.mxu0 %vm386_vm5, %v564_v29  ;;  %1078 = vmatmul.msk.f32.gmra.mxu1 %vm386_vm5, %v599_v30 }
 0x1e9   :  { %v410_v35 = vpop.f32.mrf.mxu0  ;;  %v445_v36 = vpop.f32.mrf.mxu1 }
 0x1ea   :  { %v416_v37 = vmul.f32 %v410_v35, %v259_v33  ;;  %v451_v38 = vmul.f32 %v445_v36, %v265_v34 }
 0x1ec   :  { %v453_v39 = vadd.f32 %v451_v38, %v416_v37  ;;  %v801_v37 = vld [vmem:[#allocation8 + $0x18] sm:$0xff]  ;;  %v800_v38 = vld [vmem:[#allocation8 + $0x10] sm:$0xff] }
 0x1ed   :  { %830 = vmatpush.msrb.mxu3 %v801_v37 }
 0x1ee   :  { %1079 = vmatmul.msk.f32.vlgmr.msra.gmra.mxu2 %vm146_vm0, %v453_v39  ;;  %v799_v39 = vld [vmem:[#allocation8 + $0x8] sm:$0xff] }
 0x1ef   :  { %831 = vmatpush.msrb.mxu3 %v800_v38 }
 0x1f1   :  { %v413_v42 = vpop.f32.mrf.mxu0  ;;  %v448_v43 = vpop.f32.mrf.mxu1  ;;  %832 = vmatpush.msrb.mxu3 %v799_v39 }
 0x1f2   :  { %v417_v44 = vmul.f32 %v413_v42, %v262_v40  ;;  %v452_v45 = vmul.f32 %v448_v43, %v268_v41 }
 0x1f4   :  { %v454_v46 = vadd.f32 %v452_v45, %v417_v44 }
 0x1f6   :  { %1080 = vmatmul.msk.f32.gmra.mxu2 %vm146_vm0, %v454_v46 }
 0x1f9   :  { %v588_v50 = vpop.f32.mrf.mxu0  ;;  %v623_v55 = vpop.f32.mrf.mxu1 }
 0x1fa   :  { %v594_v47 = vmul.f32 %v588_v50, %v259_v33  ;;  %v629_v48 = vmul.f32 %v623_v55, %v265_v34 }
 0x1fc   :  { %v631_v49 = vadd.f32 %v629_v48, %v594_v47 }
 0x1fe   :  { %1081 = vmatmul.msk.f32.gmra.mxu2 %vm146_vm0, %v631_v49 }
 0x201   :  { %v591_v52 = vpop.f32.mrf.mxu0  ;;  %v626_v53 = vpop.f32.mrf.mxu1 }
 0x202   :  { %v595_v54 = vmul.f32 %v591_v52, %v262_v40  ;;  %v630_v51 = vmul.f32 %v626_v53, %v268_v41  ;;  %v798_v40 = vld [vmem:[#allocation8] sm:$0xff] }
 0x203   :  { %833 = vmatpush.msrb.mxu3 %v798_v40  ;;  %v851_v40 = vld [vmem:[%s1715_s8] sm:$0xff] }
 0x204   :  { %v632_v56 = vadd.f32 %v630_v51, %v595_v54 }
 0x206   :  { %1082 = vmatmul.msk.f32.gmra.mxu2 %vm146_vm0, %v632_v56  ;;  %v1620_v56 = vld [vmem:[%s1712_s5] ss:$0 sm:$0xff] }
 0x271   :  { %v670_v57 = vpop.f32.mrf.mxu2 }
 0x272   :  { %v671_v58 = vadd.f32 %v1110_v61, %v670_v57 }
 0x274   :  { %v682_v59 = vadd.f32 %v671_v58, %v1458_v5  ;;  %v858_v58 = vld [vmem:[%s1715_s8 + $0x38] sm:$0xff] }
 0x275   :  { %884 = vmatpush.msrb.mxu0 %v858_v58 }
 0x276   :  { %v689_v60 = vsel %vm146_vm0, %v682_v59, 0.0 }
 0x277   :  { %690 = vadd.xlane.f32.xlu0 %v689_v60 }
 0x279   :  { %v673_v62 = vpop.f32.mrf.mxu2 }
 0x27a   :  { %v674_v63 = vadd.f32 %v1110_v61, %v673_v62 }
 0x27c   :  { %v683_v0 = vadd.f32 %v674_v63, %v1478_v11  ;;  %v1142_v11 = vpop.eup %1141 }
 0x27d   :  { %v702_v14 = vmul.f32 32.0, %v1142_v11  ;;  %vm706_vm3 = vweird.f32 %v1142_v11 }
 0x27e   :  { %v692_v1 = vsel %vm146_vm0, %v683_v0, 0.0 }
 0x27f   :  { %693 = vadd.xlane.f32.xlu0 %v692_v1  ;;  %v703_v15 = vsub.f32 1.0, %v702_v14  ;;  %v856_v1 = vld [vmem:[%s1715_s8 + $0x28] sm:$0xff] }
 0x281   :  { %v676_v2 = vpop.f32.mrf.mxu2  ;;  %v704_v16 = vmul.f32 %v1142_v11, %v703_v15 }
 0x282   :  { %v677_v3 = vadd.f32 %v1110_v61, %v676_v2 }
 0x283   :  { %v705_v17 = vadd.f32 %v1142_v11, %v704_v16  ;;  %v853_v16 = vld [vmem:[%s1715_s8 + $0x10] sm:$0xff] }
 0x284   :  { %v684_v6 = vadd.f32 %v677_v3, %v1456_v4 }
 0x285   :  { %v1592_v19 = vsel %vm706_vm3, %v1142_v11, %v705_v17  ;;  %v854_v11 = vld [vmem:[%s1715_s8 + $0x18] sm:$0xff] }
 0x286   :  { %v695_v7 = vsel %vm146_vm0, %v684_v6, 0.0 }
 0x287   :  { %696 = vadd.xlane.f32.xlu1 %v695_v7 }
 0x289   :  { %v679_v8 = vpop.f32.mrf.mxu2 }
 0x28a   :  { %v680_v9 = vadd.f32 %v1110_v61, %v679_v8  ;;  %v855_v8 = vld [vmem:[%s1715_s8 + $0x20] sm:$0xff] }
 0x28c   :  { %v685_v5 = vadd.f32 %v680_v9, %v1476_v10 }
 0x28e   :  { %v698_v12 = vsel %vm146_vm0, %v685_v5, 0.0 }
 0x28f   :  { %699 = vadd.xlane.f32.xlu1 %v698_v12 }
 0x2ea   :  { %v691_v4 = vpop.xlane.xlu0 %690 }
 0x2eb   :  { %v708_v18 = vmul.f32 %v1592_v19, %v691_v4 }
 0x2ed   :  { %v712_v20 = vsub.f32 %v682_v59, %v708_v18  ;;  %v857_v59 = vld [vmem:[%s1715_s8 + $0x30] sm:$0xff] }
 0x2ee   :  { %885 = vmatpush.msrb.mxu0 %v857_v59 }
 0x2ef   :  { %v716_v21 = vmul.f32 %v712_v20, %v712_v20 }
 0x2f0   :  { %886 = vmatpush.msrb.mxu0 %v856_v1 }
 0x2f1   :  { %v720_v10 = vsel %vm146_vm0, %v716_v21, 0.0 }
 0x2f2   :  { %721 = vadd.xlane.f32.xlu2 %v720_v10  ;;  %v694_v22 = vpop.xlane.xlu0 %693  ;;  %887 = vmatpush.msrb.mxu0 %v855_v8 }
 0x2f3   :  { %v709_v23 = vmul.f32 %v1592_v19, %v694_v22 }
 0x2f4   :  { %888 = vmatpush.msrb.mxu0 %v854_v11 }
 0x2f5   :  { %v1597_v24 = vsub.f32 %v683_v0, %v709_v23  ;;  %v1112_v0 = vld [vmem:[%s1712_s5 + $0x1] ss:$0 sm:$0xff] }
 0x2f6   :  { %889 = vmatpush.msrb.mxu0 %v853_v16 }
 0x2f7   :  { %v717_v25 = vmul.f32 %v1597_v24, %v1597_v24 }
 0x2f9   :  { %v723_v26 = vsel %vm146_vm0, %v717_v25, 0.0 }
 0x2fa   :  { %v697_v27 = vpop.xlane.xlu1 %696  ;;  %724 = vadd.xlane.f32.xlu2 %v723_v26 }
 0x2fb   :  { %v710_v28 = vmul.f32 %v1592_v19, %v697_v27 }
 0x2fd   :  { %v1603_v29 = vsub.f32 %v684_v6, %v710_v28 }
 0x2ff   :  { %v718_v30 = vmul.f32 %v1603_v29, %v1603_v29 }
 0x301   :  { %v726_v31 = vsel %vm146_vm0, %v718_v30, 0.0 }
 0x302   :  { %v700_v32 = vpop.xlane.xlu1 %699  ;;  %727 = vadd.xlane.f32.xlu0 %v726_v31 }
 0x303   :  { %v711_v33 = vmul.f32 %v1592_v19, %v700_v32 }
 0x305   :  { %v1609_v34 = vsub.f32 %v685_v5, %v711_v33 }
 0x307   :  { %v719_v35 = vmul.f32 %v1609_v34, %v1609_v34 }
 0x309   :  { %v729_v36 = vsel %vm146_vm0, %v719_v35, 0.0 }
 0x30a   :  { %730 = vadd.xlane.f32.xlu1 %v729_v36 }
 0x365   :  { %v722_v41 = vpop.xlane.xlu2 %721 }
 0x366   :  { %v732_v42 = vmul.f32 %v722_v41, %v1592_v19  ;;  %v1113_v41 = vld [vmem:[#allocation10] ss:$0 sm:$0xff] }
 0x368   :  { %v736_v43 = vadd.f32 1e-05, %v732_v42 }
 0x36a   :  { %1143 = vrsqrt.f32 %v736_v43  ;;  %vm746_vm5 = vweird.f32 %v736_v43 }
 0x36d   :  { %v725_v44 = vpop.xlane.xlu2 %724 }
 0x36e   :  { %v733_v45 = vmul.f32 %v725_v44, %v1592_v19 }
 0x370   :  { %v1144_v46 = vpop.eup %1143  ;;  %v737_v50 = vadd.f32 1e-05, %v733_v45 }
 0x371   :  { %v741_v55 = vmul.f32 %v1144_v46, %v736_v43  ;;  %vm747_vm4 = vweird.f32 %v1144_v46 }
 0x372   :  { %1145 = vrsqrt.f32 %v737_v50  ;;  %vm748_vm6 = vmor %vm746_vm5, %vm747_vm4  ;;  %vm756_vm8 = vweird.f32 %v737_v50 }
 0x373   :  { %v742_v47 = vmul.f32 %v1144_v46, %v741_v55 }
 0x375   :  { %v743_v48 = vmul.f32 0.5, %v742_v47  ;;  %v728_v49 = vpop.xlane.xlu0 %727 }
 0x376   :  { %v734_v52 = vmul.f32 %v728_v49, %v1592_v19 }
 0x377   :  { %v744_v53 = vsub.f32 1.5, %v743_v48 }
 0x378   :  { %v1146_v54 = vpop.eup %1145  ;;  %v738_v51 = vadd.f32 1e-05, %v734_v52 }
 0x379   :  { %v745_v61 = vmul.f32 %v1144_v46, %v744_v53  ;;  %v751_v57 = vmul.f32 %v1146_v54, %v737_v50  ;;  %vm757_vm7 = vweird.f32 %v1146_v54  ;;  %v1114_v53 = vld [vmem:[#allocation11] ss:$0 sm:$0xff] }
 0x37a   :  { %1147 = vrsqrt.f32 %v738_v51  ;;  %vm758_vm9 = vmor %vm756_vm8, %vm757_vm7  ;;  %vm766_vm11 = vweird.f32 %v738_v51 }
 0x37b   :  { %v749_v60 = vsel %vm748_vm6, %v1144_v46, %v745_v61  ;;  %v752_v62 = vmul.f32 %v1146_v54, %v751_v57 }
 0x37c   :  { %v780_v63 = vmul.f32 %v749_v60, %v712_v20 }
 0x37d   :  { %v753_v2 = vmul.f32 0.5, %v752_v62  ;;  %v731_v3 = vpop.xlane.xlu1 %730 }
 0x37e   :  { %v787_v6 = vmul.f32 %v1620_v56, %v780_v63  ;;  %v735_v7 = vmul.f32 %v731_v3, %v1592_v19 }
 0x37f   :  { %v754_v9 = vsub.f32 1.5, %v753_v2 }
 0x380   :  { %v1148_v5 = vpop.eup %1147  ;;  %v739_v12 = vadd.f32 1e-05, %v735_v7  ;;  %v1639_v13 = vadd.f32 %v1112_v0, %v787_v6 }
 0x381   :  { %v755_v14 = vmul.f32 %v1146_v54, %v754_v9  ;;  %v761_v15 = vmul.f32 %v1148_v5, %v738_v51  ;;  %vm767_vm10 = vweird.f32 %v1148_v5 }
 0x382   :  { %1149 = vrsqrt.f32 %v739_v12  ;;  %1084 = vmatmul.msk.f32.vlgmr.msrb.gmra.mxu3 %vm146_vm0, %v1639_v13  ;;  %vm768_vm12 = vmor %vm766_vm11, %vm767_vm10  ;;  %vm776_vm14 = vweird.f32 %v739_v12 }
 0x383   :  { %v759_v17 = vsel %vm758_vm9, %v1146_v54, %v755_v14  ;;  %v762_v4 = vmul.f32 %v1148_v5, %v761_v15 }
 0x384   :  { %v781_v18 = vmul.f32 %v759_v17, %v1597_v24 }
 0x385   :  { %v763_v20 = vmul.f32 0.5, %v762_v4 }
 0x386   :  { %v788_v21 = vmul.f32 %v1620_v56, %v781_v18 }
 0x387   :  { %v764_v10 = vsub.f32 1.5, %v763_v20 }
 0x388   :  { %v1150_v22 = vpop.eup %1149  ;;  %v795_v23 = vadd.f32 %v1112_v0, %v788_v21 }
 0x389   :  { %v765_v25 = vmul.f32 %v1148_v5, %v764_v10  ;;  %v771_v26 = vmul.f32 %v1150_v22, %v739_v12  ;;  %vm777_vm13 = vweird.f32 %v1150_v22 }
 0x38a   :  { %1085 = vmatmul.msk.f32.gmra.mxu3 %vm146_vm0, %v795_v23  ;;  %vm778_vm15 = vmor %vm776_vm14, %vm777_vm13 }
 0x38b   :  { %v769_v27 = vsel %vm768_vm12, %v1148_v5, %v765_v25  ;;  %v772_v28 = vmul.f32 %v1150_v22, %v771_v26 }
 0x38c   :  { %v782_v30 = vmul.f32 %v769_v27, %v1603_v29  ;;  %v852_v29 = vld [vmem:[%s1715_s8 + $0x8] sm:$0xff] }
 0x38d   :  { %v773_v31 = vmul.f32 0.5, %v772_v28  ;;  %890 = vmatpush.msrb.mxu0 %v852_v29 }
 0x38e   :  { %v789_v24 = vmul.f32 %v1620_v56, %v782_v30 }
 0x38f   :  { %v774_v32 = vsub.f32 1.5, %v773_v31  ;;  %891 = vmatpush.msrb.mxu0 %v851_v40 }
 0x390   :  { %v796_v33 = vadd.f32 %v1112_v0, %v789_v24 }
 0x391   :  { %v775_v35 = vmul.f32 %v1150_v22, %v774_v32 }
 0x392   :  { %1086 = vmatmul.msk.f32.gmra.mxu3 %vm146_vm0, %v796_v33 }
 0x393   :  { %v779_v36 = vsel %vm778_vm15, %v1150_v22, %v775_v35 }
 0x394   :  { %v783_v37 = vmul.f32 %v779_v36, %v1609_v34 }
 0x396   :  { %v790_v38 = vmul.f32 %v1620_v56, %v783_v37 }
 0x398   :  { %v797_v39 = vadd.f32 %v1112_v0, %v790_v38 }
 0x39a   :  { %1087 = vmatmul.msk.f32.gmra.mxu3 %vm146_vm0, %v797_v39 }
 0x405   :  { %v835_v42 = vpop.f32.mrf.mxu3 }
 0x406   :  { %v836_v43 = vadd.f32 %v1113_v41, %v835_v42 }
 0x408   :  { %v847_v34 = vmax.f32 %v836_v43, 0.0 }
 0x40a   :  { %1088 = vmatmul.msk.f32.vlgmr.msrb.gmra.mxu0 %vm863_vm1, %v847_v34 }
 0x40d   :  { %v838_v44 = vpop.f32.mrf.mxu3 }
 0x40e   :  { %v839_v45 = vadd.f32 %v1113_v41, %v838_v44  ;;  %v1115_v44 = vld [vmem:[%s1717_s10] ss:$0 sm:$0xff] }
 0x410   :  { %v848_v46 = vmax.f32 %v839_v45, 0.0 }
 0x412   :  { %1089 = vmatmul.msk.f32.gmra.mxu0 %vm863_vm1, %v848_v46 }
 0x415   :  { %v841_v50 = vpop.f32.mrf.mxu3 }
 0x416   :  { %v842_v55 = vadd.f32 %v1113_v41, %v841_v50  ;;  %v1116_v50 = vld [vmem:[%s1717_s10 + $0x1] ss:$0 sm:$0xff]  ;;  %s1346_s10 = smov [#allocation13]  }
 0x417   :  { %s1023_s4 = sshll.u32 %s1346_s10, 4  ;;  %s1024_s4 = int_to_ptr.vmem [resolvable:$true] %s1023_s4 }
 0x418   :  { %v849_v47 = vmax.f32 %v842_v55, 0.0 }
 0x41a   :  { %1090 = vmatmul.msk.f32.gmra.mxu0 %vm863_vm1, %v849_v47 }
 0x41d   :  { %v844_v48 = vpop.f32.mrf.mxu3 }
 0x41e   :  { %v845_v49 = vadd.f32 %v1113_v41, %v844_v48 }
 0x420   :  { %v850_v52 = vmax.f32 %v845_v49, 0.0 }
 0x422   :  { %1091 = vmatmul.msk.f32.gmra.mxu0 %vm863_vm1, %v850_v52 }
 0x487   :  { %v893_v54 = vpop.f32.mrf.mxu0 }
 0x488   :  { %v894_v51 = vadd.f32 %v1114_v53, %v893_v54 }
 0x48a   :  { %v905_v56 = vadd.f32 %v894_v51, %v1639_v13 }
 0x48c   :  { %v912_v61 = vsel %vm146_vm0, %v905_v56, 0.0 }
 0x48d   :  { %913 = vadd.xlane.f32.xlu2 %v912_v61 }
 0x48f   :  { %v896_v57 = vpop.f32.mrf.mxu0 }
 0x490   :  { %v897_v58 = vadd.f32 %v1114_v53, %v896_v57 }
 0x492   :  { %v906_v59 = vadd.f32 %v897_v58, %v795_v23 }
 0x494   :  { %v915_v60 = vsel %vm146_vm0, %v906_v59, 0.0 }
 0x495   :  { %916 = vadd.xlane.f32.xlu0 %v915_v60 }
 0x497   :  { %v899_v62 = vpop.f32.mrf.mxu0 }
 0x498   :  { %v900_v63 = vadd.f32 %v1114_v53, %v899_v62 }
 0x49a   :  { %v907_v0 = vadd.f32 %v900_v63, %v796_v33 }
 0x49c   :  { %v918_v1 = vsel %vm146_vm0, %v907_v0, 0.0 }
 0x49d   :  { %919 = vadd.xlane.f32.xlu1 %v918_v1 }
 0x49f   :  { %v902_v2 = vpop.f32.mrf.mxu0 }
 0x4a0   :  { %v903_v3 = vadd.f32 %v1114_v53, %v902_v2 }
 0x4a2   :  { %v908_v6 = vadd.f32 %v903_v3, %v797_v39 }
 0x4a4   :  { %v921_v7 = vsel %vm146_vm0, %v908_v6, 0.0 }
 0x4a5   :  { %922 = vadd.xlane.f32.xlu2 %v921_v7 }
 0x500   :  { %v914_v8 = vpop.xlane.xlu2 %913 }
 0x501   :  { %v924_v9 = vmul.f32 %v914_v8, %v1592_v19 }
 0x503   :  { %v928_v5 = vsub.f32 %v905_v56, %v924_v9 }
 0x505   :  { %v932_v12 = vmul.f32 %v928_v5, %v928_v5 }
 0x507   :  { %v936_v13 = vsel %vm146_vm0, %v932_v12, 0.0 }
 0x508   :  { %937 = vadd.xlane.f32.xlu0 %v936_v13  ;;  %v917_v11 = vpop.xlane.xlu0 %916 }
 0x509   :  { %v925_v14 = vmul.f32 %v917_v11, %v1592_v19 }
 0x50b   :  { %v929_v15 = vsub.f32 %v906_v59, %v925_v14 }
 0x50d   :  { %v933_v16 = vmul.f32 %v929_v15, %v929_v15 }
 0x50f   :  { %v939_v17 = vsel %vm146_vm0, %v933_v16, 0.0 }
 0x510   :  { %v920_v4 = vpop.xlane.xlu1 %919  ;;  %940 = vadd.xlane.f32.xlu1 %v939_v17 }
 0x511   :  { %v926_v18 = vmul.f32 %v920_v4, %v1592_v19 }
 0x513   :  { %v1674_v20 = vsub.f32 %v907_v0, %v926_v18 }
 0x515   :  { %v934_v21 = vmul.f32 %v1674_v20, %v1674_v20 }
 0x517   :  { %v942_v10 = vsel %vm146_vm0, %v934_v21, 0.0 }
 0x518   :  { %v923_v22 = vpop.xlane.xlu2 %922  ;;  %943 = vadd.xlane.f32.xlu2 %v942_v10 }
 0x519   :  { %v927_v23 = vmul.f32 %v923_v22, %v1592_v19 }
 0x51b   :  { %v1680_v25 = vsub.f32 %v908_v6, %v927_v23 }
 0x51d   :  { %v935_v26 = vmul.f32 %v1680_v25, %v1680_v25 }
 0x51f   :  { %v945_v27 = vsel %vm146_vm0, %v935_v26, 0.0 }
 0x520   :  { %946 = vadd.xlane.f32.xlu0 %v945_v27 }
 0x57b   :  { %v938_v28 = vpop.xlane.xlu0 %937 }
 0x57c   :  { %v948_v30 = vmul.f32 %v938_v28, %v1592_v19 }
 0x57e   :  { %v952_v31 = vadd.f32 1e-05, %v948_v30 }
 0x580   :  { %1151 = vrsqrt.f32 %v952_v31  ;;  %vm962_vm3 = vweird.f32 %v952_v31 }
 0x583   :  { %v941_v24 = vpop.xlane.xlu1 %940 }
 0x584   :  { %v949_v32 = vmul.f32 %v941_v24, %v1592_v19 }
 0x586   :  { %v1152_v33 = vpop.eup %1151  ;;  %v953_v35 = vadd.f32 1e-05, %v949_v32 }
 0x587   :  { %v957_v36 = vmul.f32 %v1152_v33, %v952_v31  ;;  %vm963_vm2 = vweird.f32 %v1152_v33 }
 0x588   :  { %1153 = vrsqrt.f32 %v953_v35  ;;  %vm964_vm4 = vmor %vm962_vm3, %vm963_vm2  ;;  %vm972_vm6 = vweird.f32 %v953_v35 }
 0x589   :  { %v958_v37 = vmul.f32 %v1152_v33, %v957_v36 }
 0x58b   :  { %v959_v38 = vmul.f32 0.5, %v958_v37  ;;  %v944_v39 = vpop.xlane.xlu2 %943 }
 0x58c   :  { %v950_v29 = vmul.f32 %v944_v39, %v1592_v19 }
 0x58d   :  { %v960_v40 = vsub.f32 1.5, %v959_v38 }
 0x58e   :  { %v1154_v41 = vpop.eup %1153  ;;  %v954_v42 = vadd.f32 1e-05, %v950_v29 }
 0x58f   :  { %v961_v43 = vmul.f32 %v1152_v33, %v960_v40  ;;  %v967_v34 = vmul.f32 %v1154_v41, %v953_v35  ;;  %vm973_vm5 = vweird.f32 %v1154_v41 }
 0x590   :  { %1155 = vrsqrt.f32 %v954_v42  ;;  %vm974_vm7 = vmor %vm972_vm6, %vm973_vm5  ;;  %vm982_vm9 = vweird.f32 %v954_v42 }
 0x591   :  { %v965_v45 = vsel %vm964_vm4, %v1152_v33, %v961_v43  ;;  %v968_v46 = vmul.f32 %v1154_v41, %v967_v34 }
 0x592   :  { %v996_v55 = vmul.f32 %v965_v45, %v928_v5 }
 0x593   :  { %v969_v47 = vmul.f32 0.5, %v968_v46  ;;  %v947_v48 = vpop.xlane.xlu0 %946 }
 0x594   :  { %v1003_v49 = vmul.f32 %v1115_v44, %v996_v55  ;;  %v951_v52 = vmul.f32 %v947_v48, %v1592_v19 }
 0x595   :  { %v970_v53 = vsub.f32 1.5, %v969_v47 }
 0x596   :  { %v1156_v54 = vpop.eup %1155  ;;  %v1010_v51 = vadd.f32 %v1116_v50, %v1003_v49  ;;  %v955_v56 = vadd.f32 1e-05, %v951_v52 }
 0x597   :  { %v971_v61 = vmul.f32 %v1154_v41, %v970_v53  ;;  %v977_v57 = vmul.f32 %v1156_v54, %v954_v42  ;;  %vm983_vm8 = vweird.f32 %v1156_v54 }
 0x598   :  { %1014 = vst.msk [vmem:[#allocation13] sm:$0xff] %vm146_vm0, %v1010_v51  ;;  %1157 = vrsqrt.f32 %v955_v56  ;;  %vm984_vm10 = vmor %vm982_vm9, %vm983_vm8  ;;  %vm992_vm12 = vweird.f32 %v955_v56 }
 0x599   :  { %v975_v58 = vsel %vm974_vm7, %v1154_v41, %v971_v61  ;;  %v978_v59 = vmul.f32 %v1156_v54, %v977_v57 }
 0x59a   :  { %v997_v60 = vmul.f32 %v975_v58, %v929_v15 }
 0x59b   :  { %v979_v62 = vmul.f32 0.5, %v978_v59 }
 0x59c   :  { %v1004_v63 = vmul.f32 %v1115_v44, %v997_v60 }
 0x59d   :  { %v980_v0 = vsub.f32 1.5, %v979_v62 }
 0x59e   :  { %v1158_v19 = vpop.eup %1157  ;;  %v1011_v1 = vadd.f32 %v1116_v50, %v1004_v63 }
 0x59f   :  { %v981_v2 = vmul.f32 %v1156_v54, %v980_v0  ;;  %v987_v3 = vmul.f32 %v1158_v19, %v955_v56  ;;  %vm993_vm11 = vweird.f32 %v1158_v19 }
 0x5a0   :  { %1015 = vst.msk [vmem:[#allocation13 + $0x8] sm:$0xff] %vm146_vm0, %v1011_v1  ;;  %vm994_vm13 = vmor %vm992_vm12, %vm993_vm11 }
 0x5a1   :  { %v985_v6 = vsel %vm984_vm10, %v1156_v54, %v981_v2  ;;  %v988_v7 = vmul.f32 %v1158_v19, %v987_v3 }
 0x5a2   :  { %v998_v8 = vmul.f32 %v985_v6, %v1674_v20 }
 0x5a3   :  { %v989_v9 = vmul.f32 0.5, %v988_v7 }
 0x5a4   :  { %v1005_v5 = vmul.f32 %v1115_v44, %v998_v8 }
 0x5a5   :  { %v990_v12 = vsub.f32 1.5, %v989_v9 }
 0x5a6   :  { %v1012_v13 = vadd.f32 %v1116_v50, %v1005_v5 }
 0x5a7   :  { %v991_v11 = vmul.f32 %v1158_v19, %v990_v12 }
 0x5a8   :  { %1017 = vst.msk [vmem:[#allocation13 + $0x10] sm:$0xff] %vm146_vm0, %v1012_v13 }
 0x5a9   :  { %v995_v14 = vsel %vm994_vm13, %v1158_v19, %v991_v11 }
 0x5aa   :  { %v999_v15 = vmul.f32 %v995_v14, %v1680_v25 }
 0x5ac   :  { %v1006_v16 = vmul.f32 %v1115_v44, %v999_v15 }
 0x5ae   :  { %v1013_v17 = vadd.f32 %v1116_v50, %v1006_v16 }
 0x5b0   :  { %1018 = vst.msk [vmem:[#allocation13 + $0x18] sm:$0xff] %vm146_vm0, %v1013_v17 }
 0x5b1   :  { %1031 = dma.vmem_to_hbm [thread:$0]  %s1024_s4, 512, %s1026_s2, [#allocation4], %s1338_s16, %s1338_s16, %s1339_s17  }
 0x5b2   :  { %1335 = dma.done.wait [#allocation4], 512  }
 0x5b3   :  { %1336 = vsyncadd [#allocation4], 4294966784 }
 0x5b4   :  { %1036 = vsyncpa [#allocation3], 1 }
 0x5b5   :  { %1037 = vsyncpa [#allocation6], 1 }
 0x5b6   :  { %1038 = vsyncpa [#allocation9], 1 }
 0x5b7   :  { %1039 = vsyncpa [#allocation12], 1 }
 0x5b8   :  { %1040 = vsyncpa [#allocation4], 1 }

// kernel: tpu_custom_call.1
= control target key start
LH: loop header
LB: loop body
LE: loop exit
PB: predicated region body
PF: predicated region fallthrough
CT: control target
= control target key end

     0   :  { %18 = vsyncpa [#allocation3], 0  ;;  %s1707_s0 = inlined_call_operand.hbm [shape: f32[2,16,32], index: 0, kind: input, shape index: {}]   ;;  %s1708_s1 = inlined_call_operand.vmem [shape: f32[3,32,32], index: 1, kind: input, shape index: {}]   ;;  %s1709_s2 = inlined_call_operand.vmem [shape: f32[3,1,32], index: 2, kind: input, shape index: {}]   ;;  %s1710_s3 = inlined_call_operand.hbm [shape: f32[32,32], index: 3, kind: input, shape index: {}]   ;;  %s1711_s4 = inlined_call_operand.hbm [shape: f32[1,32], index: 4, kind: input, shape index: {}]   ;;  %s1712_s5 = inlined_call_operand.vmem [shape: f32[2,1,32], index: 5, kind: input, shape index: {}]   ;;  %s1713_s6 = inlined_call_operand.hbm [shape: f32[32,64], index: 6, kind: input, shape index: {}]   ;;  %s1714_s7 = inlined_call_operand.hbm [shape: f32[1,64], index: 7, kind: input, shape index: {}]   ;;  %s1715_s8 = inlined_call_operand.vmem [shape: f32[64,32], index: 8, kind: input, shape index: {}]   ;;  %s1716_s9 = inlined_call_operand.hbm [shape: f32[1,32], index: 9, kind: input, shape index: {}]   ;;  %s1717_s10 = inlined_call_operand.vmem [shape: f32[2,1,32], index: 10, kind: input, shape index: {}]   ;;  %s1718_s11 = inlined_call_operand.vmem [shape: f32[32,16], index: 11, kind: input, shape index: {}]   ;;  %s1719_s12 = inlined_call_operand.vmem [shape: f32[16,32], index: 12, kind: input, shape index: {}]   ;;  %s1720_s13 = inlined_call_operand.hbm [shape: f32[2,16,32], index: 13, kind: output, shape index: {}]  }
   0x1   :  { %19 = vsyncpa [#allocation6], 0 }
   0x2   :  { %20 = vsyncpa [#allocation9], 0 }
   0x3   :  { %21 = vsyncpa [#allocation12], 0 }
   0x4   :  { %22 = vsyncpa [#allocation4], 0  ;;  %s44_s27 = sshll.u32 %s1710_s3, 4  ;;  %s1337_s28 = smov [#allocation5]   ;;  %s45_s27 = int_to_ptr.hbm [resolvable:$true] %s44_s27 }
   0x5   :  { %s46_s29 = sshll.u32 %s1337_s28, 4  ;;  %s70_s15 = sshll.u32 %s1713_s6, 4  ;;  %s47_s29 = int_to_ptr.vmem [resolvable:$true] %s46_s29  ;;  %s71_s15 = int_to_ptr.hbm [resolvable:$true] %s70_s15 }
   0x6   :  { %s1338_s16 = smov 128   ;;  %s1339_s17 = smov 8  }
   0x7   :  { %52 = dma.hbm_to_vmem [thread:$0]  %s45_s27, 512, %s47_s29, [#allocation6], %s1338_s16, %s1338_s16, %s1339_s17  }
   0x8   :  { %s1340_s18 = smov [#allocation8]   ;;  %s27_s3 = sshll.u32 %s1707_s0, 4  ;;  %s28_s3 = int_to_ptr.hbm [resolvable:$true] %s27_s3 }
   0x9   :  { %s72_s19 = sshll.u32 %s1340_s18, 4  ;;  %s58_s23 = sshll.u32 %s1711_s4, 4  ;;  %s73_s19 = int_to_ptr.vmem [resolvable:$true] %s72_s19  ;;  %s59_s23 = int_to_ptr.hbm [resolvable:$true] %s58_s23 }
   0xa   :  { %78 = dma.hbm_to_vmem [thread:$0]  %s71_s15, 512, %s73_s19, [#allocation9], %s1338_s16, %s1338_s16, %s1339_s17  }
   0xb   :  { %s1341_s24 = smov [#allocation2]   ;;  %s1342_s26 = smov [#allocation7]  }
   0xc   :  { %s29_s25 = sshll.u32 %s1341_s24, 4  ;;  %s60_s0 = sshll.u32 %s1342_s26, 4  ;;  %s30_s25 = int_to_ptr.vmem [resolvable:$true] %s29_s25  ;;  %s61_s0 = int_to_ptr.vmem [resolvable:$true] %s60_s0 }
   0xd   :  { %35 = dma.hbm_to_vmem [thread:$0]  %s28_s3, 512, %s30_s25, [#allocation3], %s1338_s16, %s1338_s16, %s1339_s17  }
   0xe   :  { %s84_s29 = sshll.u32 %s1714_s7, 4  ;;  %s97_s4 = sshll.u32 %s1716_s9, 4  ;;  %s85_s29 = int_to_ptr.hbm [resolvable:$true] %s84_s29  ;;  %s98_s4 = int_to_ptr.hbm [resolvable:$true] %s97_s4 }
   0xf   :  { %63 = dma.hbm_to_vmem [thread:$0]  %s59_s23, 16, %s61_s0, [#allocation6]  }
  0x10   :  { %s1343_s15 = smov [#allocation10]   ;;  %s1344_s19 = smov [#allocation11]  }
  0x11   :  { %s86_s18 = sshll.u32 %s1343_s15, 4  ;;  %s99_s20 = sshll.u32 %s1344_s19, 4  ;;  %s87_s18 = int_to_ptr.vmem [resolvable:$true] %s86_s18  ;;  %s100_s20 = int_to_ptr.vmem [resolvable:$true] %s99_s20 }
  0x12   :  { %89 = dma.hbm_to_vmem [thread:$0]  %s85_s29, 16, %s87_s18, [#allocation9]  }
  0x13   :  { %102 = dma.hbm_to_vmem [thread:$0]  %s98_s4, 16, %s100_s20, [#allocation12]  }
  0x14   :  { %1327 = dma.done.wait [#allocation3], 512  }
  0x15   :  { %1328 = vsyncadd [#allocation3], 4294966784 }
  0x16   :  { %1329 = dma.done.wait [#allocation6], 528  }
  0x17   :  { %1330 = vsyncadd [#allocation6], 4294966768 }
  0x18   :  { %1331 = dma.done.wait [#allocation9], 528  }
  0x19   :  { %1332 = vsyncadd [#allocation9], 4294966768 }
  0x1a   :  { %1333 = dma.done.wait [#allocation12], 16  }
  0x1b   :  { %1334 = vsyncadd [#allocation12], 4294967280  ;;  %v141_v0 = vld [vmem:[%s1708_s1 + $0x18] sm:$0xff]  ;;  %v140_v1 = vld [vmem:[%s1708_s1 + $0x10] sm:$0xff]  ;;  %vm146_vm0 = vcmask 261120   ;;  %vm386_vm5 = vcmask 130048  }
  0x1c   :  { %1093 = vmatpush.msra.mxu1 %v141_v0  ;;  %171 = vmatpush.msra.mxu0 %v141_v0  ;;  %v139_v2 = vld [vmem:[%s1708_s1 + $0x8] sm:$0xff]  ;;  %v138_v3 = vld [vmem:[%s1708_s1] sm:$0xff]  ;;  %v1456_v4 = vld [vmem:[#allocation2 + $0x10] sm:$0xff] }
  0x1d   :  { %v1458_v5 = vld [vmem:[#allocation2] sm:$0xff]  ;;  %v1048_v6 = vld [vmem:[%s1708_s1 + $0x38] sm:$0xff]  ;;  %v1047_v7 = vld [vmem:[%s1708_s1 + $0x30] sm:$0xff] }
  0x1e   :  { %1094 = vmatpush.msra.mxu1 %v140_v1  ;;  %172 = vmatpush.msra.mxu0 %v140_v1  ;;  %v1046_v8 = vld [vmem:[%s1708_s1 + $0x28] sm:$0xff]  ;;  %v1045_v9 = vld [vmem:[%s1708_s1 + $0x20] sm:$0xff]  ;;  %v1476_v10 = vld [vmem:[#allocation2 + $0x18] sm:$0xff] }
  0x1f   :  { %v1478_v11 = vld [vmem:[#allocation2 + $0x8] sm:$0xff]  ;;  %v1057_v12 = vld [vmem:[%s1708_s1 + $0x58] sm:$0xff]  ;;  %v1056_v13 = vld [vmem:[%s1708_s1 + $0x50] sm:$0xff] }
  0x20   :  { %1095 = vmatpush.msra.mxu1 %v139_v2  ;;  %173 = vmatpush.msra.mxu0 %v139_v2  ;;  %v1055_v14 = vld [vmem:[%s1708_s1 + $0x48] sm:$0xff]  ;;  %v1054_v15 = vld [vmem:[%s1708_s1 + $0x40] sm:$0xff]  ;;  %v273_v16 = vld [vmem:[%s1718_s11 + $0x18] sm:$0xff] }
  0x21   :  { %253 = vmatpush.msra.mxu2 %v1057_v12  ;;  %296 = vmatpush.msra.mxu3 %v273_v16  ;;  %v272_v17 = vld [vmem:[%s1718_s11 + $0x10] sm:$0xff]  ;;  %v271_v18 = vld [vmem:[%s1718_s11 + $0x8] sm:$0xff]  ;;  %v270_v19 = vld [vmem:[%s1718_s11] sm:$0xff] }
  0x22   :  { %1096 = vmatpush.msra.mxu1 %v138_v3  ;;  %174 = vmatpush.msra.mxu0 %v138_v3  ;;  %v1107_v23 = vld [vmem:[%s1709_s2] ss:$0 sm:$0xff]  ;;  %v1108_v26 = vld [vmem:[%s1709_s2 + $0x1] ss:$0 sm:$0xff]  ;;  %v275_v53 = vld [vmem:[%s1719_s12 + $0x8] sm:$0xff] }
  0x23   :  { %1043 = vmatmul.msk.f32.vlgmr.msra.gmra.mxu1 %vm146_vm0, %v1456_v4  ;;  %1041 = vmatmul.msk.f32.vlgmr.msra.gmra.mxu0 %vm146_vm0, %v1458_v5  ;;  %v274_v58 = vld [vmem:[%s1719_s12] sm:$0xff] }
  0x24   :  { %214 = vmatpush.msrb.mxu1 %v1048_v6  ;;  %254 = vmatpush.msra.mxu2 %v1056_v13 }
  0x25   :  { %297 = vmatpush.msra.mxu3 %v272_v17  ;;  %407 = vmatpush.msrb.mxu0 %v275_v53 }
  0x26   :  { %215 = vmatpush.msrb.mxu1 %v1047_v7  ;;  %255 = vmatpush.msra.mxu2 %v1055_v14 }
  0x27   :  { %298 = vmatpush.msra.mxu3 %v271_v18  ;;  %408 = vmatpush.msrb.mxu0 %v274_v58 }
  0x28   :  { %216 = vmatpush.msrb.mxu1 %v1046_v8  ;;  %256 = vmatpush.msra.mxu2 %v1054_v15 }
  0x29   :  { %1059 = vmatmul.msk.f32.vlgmr.msra.gmra.mxu2 %vm146_vm0, %v1458_v5  ;;  %299 = vmatpush.msra.mxu3 %v270_v19 }
  0x2a   :  { %217 = vmatpush.msrb.mxu1 %v1045_v9  ;;  %475 = vmatpush.msrb.mxu2 %v273_v16 }
  0x2b   :  { %1044 = vmatmul.msk.f32.gmra.mxu1 %vm146_vm0, %v1476_v10  ;;  %1042 = vmatmul.msk.f32.gmra.mxu0 %vm146_vm0, %v1478_v11 }
  0x2c   :  { %476 = vmatpush.msrb.mxu2 %v272_v17  ;;  %327 = vmatpush.msrb.mxu3 %v273_v16 }
  0x2d   :  { %442 = vmatpush.msra.mxu1 %v275_v53  ;;  %585 = vmatpush.msra.mxu0 %v275_v53 }
  0x2e   :  { %477 = vmatpush.msrb.mxu2 %v271_v18  ;;  %328 = vmatpush.msrb.mxu3 %v272_v17 }
  0x2f   :  { %443 = vmatpush.msra.mxu1 %v274_v58  ;;  %586 = vmatpush.msra.mxu0 %v274_v58 }
  0x30   :  { %478 = vmatpush.msrb.mxu2 %v270_v19  ;;  %329 = vmatpush.msrb.mxu3 %v271_v18 }
  0x31   :  { %1060 = vmatmul.msk.f32.gmra.mxu2 %vm146_vm0, %v1478_v11 }
  0x32   :  { %330 = vmatpush.msrb.mxu3 %v270_v19 }
  0x33   :  { %1050 = vmatmul.msk.f32.vlgmr.msrb.gmra.mxu1 %vm146_vm0, %v1458_v5 }
  0x34   :  { %620 = vmatpush.msrb.mxu1 %v275_v53 }
  0x36   :  { %621 = vmatpush.msrb.mxu1 %v274_v58 }
  0x39   :  { %1061 = vmatmul.msk.f32.gmra.mxu2 %vm146_vm0, %v1456_v4 }
  0x3b   :  { %1051 = vmatmul.msk.f32.gmra.mxu1 %vm146_vm0, %v1478_v11 }
  0x41   :  { %1062 = vmatmul.msk.f32.gmra.mxu2 %vm146_vm0, %v1476_v10 }
  0x43   :  { %1052 = vmatmul.msk.f32.gmra.mxu1 %vm146_vm0, %v1456_v4 }
  0x4b   :  { %1053 = vmatmul.msk.f32.gmra.mxu1 %vm146_vm0, %v1476_v10 }
  0xa0   :  { %v182_v20 = vpop.f32.mrf.mxu1  ;;  %v176_v21 = vpop.f32.mrf.mxu0 }
  0xa1   :  { %v177_v24 = vadd.f32 %v1107_v23, %v176_v21  ;;  %v183_v25 = vadd.f32 %v1107_v23, %v182_v20 }
  0xa3   :  { %v188_v27 = vmul.f32 0.70710677, %v177_v24  ;;  %v190_v30 = vmul.f32 0.70710677, %v183_v25 }
  0xa8   :  { %v185_v22 = vpop.f32.mrf.mxu1  ;;  %v179_v29 = vpop.f32.mrf.mxu0 }
  0xa9   :  { %v180_v34 = vadd.f32 %v1107_v23, %v179_v29  ;;  %v186_v35 = vadd.f32 %v1107_v23, %v185_v22 }
  0xab   :  { %v189_v36 = vmul.f32 0.70710677, %v180_v34  ;;  %v191_v38 = vmul.f32 0.70710677, %v186_v35 }
  0xac   :  { %v1538_v50 = vpop.f32.mrf.mxu2 }
  0xb0   :  { %v219_v28 = vpop.f32.mrf.mxu1 }
  0xb1   :  { %v220_v31 = vadd.f32 %v1108_v26, %v219_v28 }
  0xb3   :  { %v276_v32 = vmul.f32 %v220_v31, %v188_v27  ;;  %v455_v33 = vmul.f32 %v220_v31, %v190_v30 }
  0xb4   :  { %v1540_v51 = vpop.f32.mrf.mxu2 }
  0xb5   :  { %1063 = vmatmul.msk.f32.vlgmr.msra.gmra.mxu3 %vm146_vm0, %v276_v32  ;;  %1071 = vmatmul.msk.f32.vlgmr.msrb.gmra.mxu2 %vm146_vm0, %v455_v33 }
  0xb6   :  { %506 = vmatpush.msra.mxu3 %v273_v16 }
  0xb8   :  { %v222_v37 = vpop.f32.mrf.mxu1  ;;  %507 = vmatpush.msra.mxu3 %v272_v17 }
  0xb9   :  { %v223_v39 = vadd.f32 %v1108_v26, %v222_v37  ;;  %v636_v37 = vld [vmem:[#allocation5 + $0x18] sm:$0xff] }
  0xba   :  { %508 = vmatpush.msra.mxu3 %v271_v18  ;;  %665 = vmatpush.msra.mxu2 %v636_v37 }
  0xbb   :  { %v277_v40 = vmul.f32 %v223_v39, %v189_v36  ;;  %v456_v41 = vmul.f32 %v223_v39, %v191_v38 }
  0xbc   :  { %509 = vmatpush.msra.mxu3 %v270_v19  ;;  %v1545_v55 = vpop.f32.mrf.mxu2 }
  0xbd   :  { %1064 = vmatmul.msk.f32.gmra.mxu3 %vm146_vm0, %v277_v40  ;;  %1072 = vmatmul.msk.f32.gmra.mxu2 %vm146_vm0, %v456_v41 }
  0xc0   :  { %v225_v42 = vpop.f32.mrf.mxu1 }
  0xc1   :  { %v226_v43 = vadd.f32 %v1108_v26, %v225_v42 }
  0xc3   :  { %v307_v44 = vmul.f32 %v226_v43, %v188_v27  ;;  %v486_v48 = vmul.f32 %v226_v43, %v190_v30  ;;  %v634_v43 = vld [vmem:[#allocation5 + $0x8] sm:$0xff] }
  0xc4   :  { %v1550_v61 = vpop.f32.mrf.mxu2 }
  0xc5   :  { %1065 = vmatmul.msk.f32.vlgmr.msrb.gmra.mxu3 %vm146_vm0, %v307_v44 }
  0xc8   :  { %v228_v45 = vpop.f32.mrf.mxu1 }
  0xc9   :  { %v229_v46 = vadd.f32 %v1108_v26, %v228_v45 }
  0xcb   :  { %v308_v47 = vmul.f32 %v229_v46, %v189_v36  ;;  %v487_v49 = vmul.f32 %v229_v46, %v191_v38  ;;  %v635_v38 = vld [vmem:[#allocation5 + $0x10] sm:$0xff] }
  0xcc   :  { %666 = vmatpush.msra.mxu2 %v635_v38 }
  0xcd   :  { %1066 = vmatmul.msk.f32.gmra.mxu3 %vm146_vm0, %v308_v47 }
  0xce   :  { %667 = vmatpush.msra.mxu2 %v634_v43 }
  0xd5   :  { %1073 = vmatmul.msk.f32.vlgmr.msra.gmra.mxu3 %vm146_vm0, %v486_v48 }
  0xdd   :  { %1074 = vmatmul.msk.f32.gmra.mxu3 %vm146_vm0, %v487_v49 }
 0x138   :  { %v301_v52 = vpop.f32.mrf.mxu3  ;;  %v480_v12 = vpop.f32.mrf.mxu2 }
 0x140   :  { %v304_v54 = vpop.f32.mrf.mxu3  ;;  %v483_v24 = vpop.f32.mrf.mxu2 }
 0x148   :  { %v332_v56 = vpop.f32.mrf.mxu3 }
 0x149   :  { %v338_v57 = vmax.f32 %v301_v52, %v332_v56 }
 0x14b   :  { %v340_v59 = vsub.f32 %v301_v52, %v338_v57  ;;  %v346_v60 = vsub.f32 %v332_v56, %v338_v57 }
 0x14d   :  { %v342_v62 = vmul.f32 1.442695, %v340_v59  ;;  %v348_v63 = vmul.f32 1.442695, %v346_v60 }
 0x14f   :  { %1117 = vpow2.f32 %v342_v62 }
 0x150   :  { %1119 = vpow2.f32 %v348_v63  ;;  %v335_v0 = vpop.f32.mrf.mxu3 }
 0x151   :  { %v339_v1 = vmax.f32 %v304_v54, %v335_v0 }
 0x153   :  { %v341_v2 = vsub.f32 %v304_v54, %v339_v1  ;;  %v347_v3 = vsub.f32 %v335_v0, %v339_v1 }
 0x155   :  { %v1118_v6 = vpop.eup %1117  ;;  %v344_v7 = vmul.f32 1.442695, %v341_v2  ;;  %v350_v8 = vmul.f32 1.442695, %v347_v3 }
 0x156   :  { %v1120_v9 = vpop.eup %1119 }
 0x157   :  { %v352_v13 = vadd.f32 %v1120_v9, %v1118_v6  ;;  %1121 = vpow2.f32 %v344_v7 }
 0x158   :  { %1123 = vpow2.f32 %v350_v8  ;;  %v511_v14 = vpop.f32.mrf.mxu3 }
 0x159   :  { %1125 = vrcp.f32 %v352_v13  ;;  %v517_v15 = vmax.f32 %v480_v12, %v511_v14  ;;  %v363_v32 = vand.u32 2147483647, %v352_v13  ;;  %v365_v33 = vand.u32 2147483648, %v352_v13 }
 0x15a   :  { %vm359_vm2 = vweird.f32 %v352_v13 }
 0x15b   :  { %v519_v16 = vsub.f32 %v480_v12, %v517_v15  ;;  %v525_v17 = vsub.f32 %v511_v14, %v517_v15  ;;  %v366_v45 = vor.u32 1.1754944e-38, %v365_v33  ;;  %vm364_vm4 = vcmp.eq.f32.partialorder %v363_v32, 8.507059e+37  ;;  %v1109_v32 = vld [vmem:[%s1709_s2 + $0x2] ss:$0 sm:$0xff]  ;;  %s1025_s2 = sshll.u32 %s1720_s13, 4  ;;  %s1026_s2 = int_to_ptr.hbm [resolvable:$true] %s1025_s2 }
 0x15c   :  { %v259_v33 = vadd.f32 %v1109_v32, %v1538_v50 }
 0x15d   :  { %v1552_v18 = vpop.eup %1121  ;;  %v521_v19 = vmul.f32 1.442695, %v519_v16  ;;  %v527_v20 = vmul.f32 1.442695, %v525_v17 }
 0x15e   :  { %v1554_v21 = vpop.eup %1123 }
 0x15f   :  { %v1126_v22 = vpop.eup %1125  ;;  %v353_v23 = vadd.f32 %v1554_v21, %v1552_v18  ;;  %1127 = vpow2.f32 %v521_v19 }
 0x160   :  { %1129 = vpow2.f32 %v527_v20  ;;  %v514_v25 = vpop.f32.mrf.mxu3  ;;  %v355_v26 = vmul.f32 %v1126_v22, %v352_v13  ;;  %vm360_vm1 = vweird.f32 %v1126_v22 }
 0x161   :  { %1131 = vrcp.f32 %v353_v23  ;;  %v518_v27 = vmax.f32 %v483_v24, %v514_v25  ;;  %vm361_vm3 = vmor %vm359_vm2, %vm360_vm1  ;;  %v380_v53 = vand.u32 2147483648, %v353_v23  ;;  %v378_v56 = vand.u32 2147483647, %v353_v23 }
 0x162   :  { %v356_v28 = vsub.f32 1.0, %v355_v26  ;;  %vm374_vm7 = vweird.f32 %v353_v23 }
 0x163   :  { %v520_v29 = vsub.f32 %v483_v24, %v518_v27  ;;  %v526_v30 = vsub.f32 %v514_v25, %v518_v27  ;;  %v381_v63 = vor.u32 1.1754944e-38, %v380_v53  ;;  %vm379_vm9 = vcmp.eq.f32.partialorder %v378_v56, 8.507059e+37 }
 0x164   :  { %v357_v31 = vmul.f32 %v1126_v22, %v356_v28 }
 0x165   :  { %v1558_v34 = vpop.eup %1127  ;;  %v523_v35 = vmul.f32 1.442695, %v520_v29  ;;  %v529_v36 = vmul.f32 1.442695, %v526_v30 }
 0x166   :  { %v1130_v39 = vpop.eup %1129  ;;  %v358_v40 = vadd.f32 %v1126_v22, %v357_v31  ;;  %v633_v31 = vld [vmem:[#allocation5] sm:$0xff] }
 0x167   :  { %v1132_v41 = vpop.eup %1131  ;;  %v531_v42 = vadd.f32 %v1130_v39, %v1558_v34  ;;  %1133 = vpow2.f32 %v523_v35  ;;  %668 = vmatpush.msra.mxu2 %v633_v31 }
 0x168   :  { %1135 = vpow2.f32 %v529_v36  ;;  %v362_v44 = vsel %vm361_vm3, %v1126_v22, %v358_v40  ;;  %v370_v46 = vmul.f32 %v1132_v41, %v353_v23  ;;  %vm375_vm6 = vweird.f32 %v1132_v41 }
 0x169   :  { %1137 = vrcp.f32 %v531_v42  ;;  %v367_v47 = vsel %vm364_vm4, %v366_v45, %v362_v44  ;;  %vm376_vm8 = vmor %vm374_vm7, %vm375_vm6  ;;  %v544_v8 = vand.u32 2147483648, %v531_v42  ;;  %v542_v12 = vand.u32 2147483647, %v531_v42 }
 0x16a   :  { %v371_v48 = vsub.f32 1.0, %v370_v46  ;;  %v384_v49 = vmul.f32 %v1118_v6, %v367_v47  ;;  %v420_v52 = vmul.f32 %v1120_v9, %v367_v47  ;;  %vm538_vm11 = vweird.f32 %v531_v42 }
 0x16b   :  { %v545_v15 = vor.u32 1.1754944e-38, %v544_v8  ;;  %vm543_vm13 = vcmp.eq.f32.partialorder %v542_v12, 8.507059e+37  ;;  %v262_v40 = vadd.f32 %v1109_v32, %v1540_v51 }
 0x16c   :  { %v372_v54 = vmul.f32 %v1132_v41, %v371_v48  ;;  %1067 = vmatmul.msk.f32.vlgmr.msrb.gmra.mxu0 %vm386_vm5, %v384_v49  ;;  %1069 = vmatmul.msk.f32.vlgmr.msra.gmra.mxu1 %vm386_vm5, %v420_v52 }
 0x16d   :  { %v1134_v57 = vpop.eup %1133 }
 0x16e   :  { %v1136_v58 = vpop.eup %1135  ;;  %v373_v59 = vadd.f32 %v1132_v41, %v372_v54 }
 0x16f   :  { %v1138_v60 = vpop.eup %1137  ;;  %v532_v62 = vadd.f32 %v1136_v58, %v1134_v57 }
 0x170   :  { %v534_v0 = vmul.f32 %v1138_v60, %v531_v42  ;;  %v377_v1 = vsel %vm376_vm8, %v1132_v41, %v373_v59  ;;  %vm539_vm10 = vweird.f32 %v1138_v60  ;;  %v268_v41 = vadd.f32 %v1109_v32, %v1550_v61  ;;  %v1110_v61 = vld [vmem:[#allocation7] ss:$0 sm:$0xff] }
 0x171   :  { %1139 = vrcp.f32 %v532_v62  ;;  %v382_v2 = vsel %vm379_vm9, %v381_v63, %v377_v1  ;;  %vm540_vm12 = vmor %vm538_vm11, %vm539_vm10  ;;  %v559_v22 = vand.u32 2147483648, %v532_v62  ;;  %v557_v24 = vand.u32 2147483647, %v532_v62 }
 0x172   :  { %v535_v3 = vsub.f32 1.0, %v534_v0  ;;  %v385_v6 = vmul.f32 %v1552_v18, %v382_v2  ;;  %v421_v7 = vmul.f32 %v1554_v21, %v382_v2  ;;  %vm553_vm15 = vweird.f32 %v532_v62 }
 0x173   :  { %v560_v26 = vor.u32 1.1754944e-38, %v559_v22  ;;  %vm558_vm2 = vcmp.eq.f32.partialorder %v557_v24, 8.507059e+37 }
 0x174   :  { %v536_v9 = vmul.f32 %v1138_v60, %v535_v3  ;;  %1068 = vmatmul.msk.f32.gmra.mxu0 %vm386_vm5, %v385_v6  ;;  %1070 = vmatmul.msk.f32.gmra.mxu1 %vm386_vm5, %v421_v7 }
 0x176   :  { %v537_v13 = vadd.f32 %v1138_v60, %v536_v9 }
 0x177   :  { %v1140_v14 = vpop.eup %1139 }
 0x178   :  { %v541_v16 = vsel %vm540_vm12, %v1138_v60, %v537_v13  ;;  %v549_v17 = vmul.f32 %v1140_v14, %v532_v62  ;;  %vm554_vm14 = vweird.f32 %v1140_v14  ;;  %v1345_v13 = vmov 32.0  }
 0x179   :  { %v546_v19 = vsel %vm543_vm13, %v545_v15, %v541_v16  ;;  %vm555_vm1 = vmor %vm553_vm15, %vm554_vm14  ;;  %1141 = vrcp.f32 %v1345_v13 }
 0x17a   :  { %v563_v18 = vmul.f32 %v1558_v34, %v546_v19  ;;  %v598_v20 = vmul.f32 %v1130_v39, %v546_v19  ;;  %v550_v21 = vsub.f32 1.0, %v549_v17  ;;  %v265_v34 = vadd.f32 %v1109_v32, %v1545_v55 }
 0x17c   :  { %v551_v23 = vmul.f32 %v1140_v14, %v550_v21  ;;  %1075 = vmatmul.msk.f32.vlgmr.msra.gmra.mxu0 %vm386_vm5, %v563_v18  ;;  %1077 = vmatmul.msk.f32.vlgmr.msrb.gmra.mxu1 %vm386_vm5, %v598_v20 }
 0x17e   :  { %v552_v25 = vadd.f32 %v1140_v14, %v551_v23 }
 0x180   :  { %v556_v27 = vsel %vm555_vm1, %v1140_v14, %v552_v25  ;;  %vm863_vm1 = vcmask 523264  }
 0x181   :  { %v561_v28 = vsel %vm558_vm2, %v560_v26, %v556_v27 }
 0x182   :  { %v564_v29 = vmul.f32 %v1134_v57, %v561_v28  ;;  %v599_v30 = vmul.f32 %v1136_v58, %v561_v28 }
 0x184   :  { %1076 = vmatmul.msk.f32.gmra.mxu0 %vm386_vm5, %v564_v29  ;;  %1078 = vmatmul.msk.f32.gmra.mxu1 %vm386_vm5, %v599_v30 }
 0x1e9   :  { %v410_v35 = vpop.f32.mrf.mxu0  ;;  %v445_v36 = vpop.f32.mrf.mxu1 }
 0x1ea   :  { %v416_v37 = vmul.f32 %v410_v35, %v259_v33  ;;  %v451_v38 = vmul.f32 %v445_v36, %v265_v34 }
 0x1ec   :  { %v453_v39 = vadd.f32 %v451_v38, %v416_v37  ;;  %v801_v37 = vld [vmem:[#allocation8 + $0x18] sm:$0xff]  ;;  %v800_v38 = vld [vmem:[#allocation8 + $0x10] sm:$0xff] }
 0x1ed   :  { %830 = vmatpush.msrb.mxu3 %v801_v37 }
 0x1ee   :  { %1079 = vmatmul.msk.f32.vlgmr.msra.gmra.mxu2 %vm146_vm0, %v453_v39  ;;  %v799_v39 = vld [vmem:[#allocation8 + $0x8] sm:$0xff] }
 0x1ef   :  { %831 = vmatpush.msrb.mxu3 %v800_v38 }
 0x1f1   :  { %v413_v42 = vpop.f32.mrf.mxu0  ;;  %v448_v43 = vpop.f32.mrf.mxu1  ;;  %832 = vmatpush.msrb.mxu3 %v799_v39 }
 0x1f2   :  { %v417_v44 = vmul.f32 %v413_v42, %v262_v40  ;;  %v452_v45 = vmul.f32 %v448_v43, %v268_v41 }
 0x1f4   :  { %v454_v46 = vadd.f32 %v452_v45, %v417_v44 }
 0x1f6   :  { %1080 = vmatmul.msk.f32.gmra.mxu2 %vm146_vm0, %v454_v46 }
 0x1f9   :  { %v588_v50 = vpop.f32.mrf.mxu0  ;;  %v623_v55 = vpop.f32.mrf.mxu1 }
 0x1fa   :  { %v594_v47 = vmul.f32 %v588_v50, %v259_v33  ;;  %v629_v48 = vmul.f32 %v623_v55, %v265_v34 }
 0x1fc   :  { %v631_v49 = vadd.f32 %v629_v48, %v594_v47 }
 0x1fe   :  { %1081 = vmatmul.msk.f32.gmra.mxu2 %vm146_vm0, %v631_v49 }
 0x201   :  { %v591_v52 = vpop.f32.mrf.mxu0  ;;  %v626_v53 = vpop.f32.mrf.mxu1 }
 0x202   :  { %v595_v54 = vmul.f32 %v591_v52, %v262_v40  ;;  %v630_v51 = vmul.f32 %v626_v53, %v268_v41  ;;  %v798_v40 = vld [vmem:[#allocation8] sm:$0xff] }
 0x203   :  { %833 = vmatpush.msrb.mxu3 %v798_v40  ;;  %v851_v40 = vld [vmem:[%s1715_s8] sm:$0xff] }
 0x204   :  { %v632_v56 = vadd.f32 %v630_v51, %v595_v54 }
 0x206   :  { %1082 = vmatmul.msk.f32.gmra.mxu2 %vm146_vm0, %v632_v56  ;;  %v1620_v56 = vld [vmem:[%s1712_s5] ss:$0 sm:$0xff] }
 0x271   :  { %v670_v57 = vpop.f32.mrf.mxu2 }
 0x272   :  { %v671_v58 = vadd.f32 %v1110_v61, %v670_v57 }
 0x274   :  { %v682_v59 = vadd.f32 %v671_v58, %v1458_v5  ;;  %v858_v58 = vld [vmem:[%s1715_s8 + $0x38] sm:$0xff] }
 0x275   :  { %884 = vmatpush.msrb.mxu0 %v858_v58 }
 0x276   :  { %v689_v60 = vsel %vm146_vm0, %v682_v59, 0.0 }
 0x277   :  { %690 = vadd.xlane.f32.xlu0 %v689_v60 }
 0x279   :  { %v673_v62 = vpop.f32.mrf.mxu2 }
 0x27a   :  { %v674_v63 = vadd.f32 %v1110_v61, %v673_v62 }
 0x27c   :  { %v683_v0 = vadd.f32 %v674_v63, %v1478_v11  ;;  %v1142_v11 = vpop.eup %1141 }
 0x27d   :  { %v702_v14 = vmul.f32 32.0, %v1142_v11  ;;  %vm706_vm3 = vweird.f32 %v1142_v11 }
 0x27e   :  { %v692_v1 = vsel %vm146_vm0, %v683_v0, 0.0 }
 0x27f   :  { %693 = vadd.xlane.f32.xlu0 %v692_v1  ;;  %v703_v15 = vsub.f32 1.0, %v702_v14  ;;  %v856_v1 = vld [vmem:[%s1715_s8 + $0x28] sm:$0xff] }
 0x281   :  { %v676_v2 = vpop.f32.mrf.mxu2  ;;  %v704_v16 = vmul.f32 %v1142_v11, %v703_v15 }
 0x282   :  { %v677_v3 = vadd.f32 %v1110_v61, %v676_v2 }
 0x283   :  { %v705_v17 = vadd.f32 %v1142_v11, %v704_v16  ;;  %v853_v16 = vld [vmem:[%s1715_s8 + $0x10] sm:$0xff] }
 0x284   :  { %v684_v6 = vadd.f32 %v677_v3, %v1456_v4 }
 0x285   :  { %v1592_v19 = vsel %vm706_vm3, %v1142_v11, %v705_v17  ;;  %v854_v11 = vld [vmem:[%s1715_s8 + $0x18] sm:$0xff] }
 0x286   :  { %v695_v7 = vsel %vm146_vm0, %v684_v6, 0.0 }
 0x287   :  { %696 = vadd.xlane.f32.xlu1 %v695_v7 }
 0x289   :  { %v679_v8 = vpop.f32.mrf.mxu2 }
 0x28a   :  { %v680_v9 = vadd.f32 %v1110_v61, %v679_v8  ;;  %v855_v8 = vld [vmem:[%s1715_s8 + $0x20] sm:$0xff] }
 0x28c   :  { %v685_v5 = vadd.f32 %v680_v9, %v1476_v10 }
 0x28e   :  { %v698_v12 = vsel %vm146_vm0, %v685_v5, 0.0 }
 0x28f   :  { %699 = vadd.xlane.f32.xlu1 %v698_v12 }
 0x2ea   :  { %v691_v4 = vpop.xlane.xlu0 %690 }
 0x2eb   :  { %v708_v18 = vmul.f32 %v1592_v19, %v691_v4 }
 0x2ed   :  { %v712_v20 = vsub.f32 %v682_v59, %v708_v18  ;;  %v857_v59 = vld [vmem:[%s1715_s8 + $0x30] sm:$0xff] }
 0x2ee   :  { %885 = vmatpush.msrb.mxu0 %v857_v59 }
 0x2ef   :  { %v716_v21 = vmul.f32 %v712_v20, %v712_v20 }
 0x2f0   :  { %886 = vmatpush.msrb.mxu0 %v856_v1 }
 0x2f1   :  { %v720_v10 = vsel %vm146_vm0, %v716_v21, 0.0 }
 0x2f2   :  { %721 = vadd.xlane.f32.xlu2 %v720_v10  ;;  %v694_v22 = vpop.xlane.xlu0 %693  ;;  %887 = vmatpush.msrb.mxu0 %v855_v8 }
 0x2f3   :  { %v709_v23 = vmul.f32 %v1592_v19, %v694_v22 }
 0x2f4   :  { %888 = vmatpush.msrb.mxu0 %v854_v11 }
 0x2f5   :  { %v1597_v24 = vsub.f32 %v683_v0, %v709_v23  ;;  %v1112_v0 = vld [vmem:[%s1712_s5 + $0x1] ss:$0 sm:$0xff] }
 0x2f6   :  { %889 = vmatpush.msrb.mxu0 %v853_v16 }
 0x2f7   :  { %v717_v25 = vmul.f32 %v1597_v24, %v1597_v24 }
 0x2f9   :  { %v723_v26 = vsel %vm146_vm0, %v717_v25, 0.0 }
 0x2fa   :  { %v697_v27 = vpop.xlane.xlu1 %696  ;;  %724 = vadd.xlane.f32.xlu2 %v723_v26 }
 0x2fb   :  { %v710_v28 = vmul.f32 %v1592_v19, %v697_v27 }
 0x2fd   :  { %v1603_v29 = vsub.f32 %v684_v6, %v710_v28 }
 0x2ff   :  { %v718_v30 = vmul.f32 %v1603_v29, %v1603_v29 }
 0x301   :  { %v726_v31 = vsel %vm146_vm0, %v718_v30, 0.0 }
 0x302   :  { %v700_v32 = vpop.xlane.xlu1 %699  ;;  %727 = vadd.xlane.f32.xlu0 %v726_v31 }
 0x303   :  { %v711_v33 = vmul.f32 %v1592_v19, %v700_v32 }
 0x305   :  { %v1609_v34 = vsub.f32 %v685_v5, %v711_v33 }
 0x307   :  { %v719_v35 = vmul.f32 %v1609_v34, %v1609_v34 }
 0x309   :  { %v729_v36 = vsel %vm146_vm0, %v719_v35, 0.0 }
 0x30a   :  { %730 = vadd.xlane.f32.xlu1 %v729_v36 }
 0x365   :  { %v722_v41 = vpop.xlane.xlu2 %721 }
 0x366   :  { %v732_v42 = vmul.f32 %v722_v41, %v1592_v19  ;;  %v1113_v41 = vld [vmem:[#allocation10] ss:$0 sm:$0xff] }
 0x368   :  { %v736_v43 = vadd.f32 1e-05, %v732_v42 }
 0x36a   :  { %1143 = vrsqrt.f32 %v736_v43  ;;  %vm746_vm5 = vweird.f32 %v736_v43 }
 0x36d   :  { %v725_v44 = vpop.xlane.xlu2 %724 }
 0x36e   :  { %v733_v45 = vmul.f32 %v725_v44, %v1592_v19 }
 0x370   :  { %v1144_v46 = vpop.eup %1143  ;;  %v737_v50 = vadd.f32 1e-05, %v733_v45 }
 0x371   :  { %v741_v55 = vmul.f32 %v1144_v46, %v736_v43  ;;  %vm747_vm4 = vweird.f32 %v1144_v46 }
 0x372   :  { %1145 = vrsqrt.f32 %v737_v50  ;;  %vm748_vm6 = vmor %vm746_vm5, %vm747_vm4  ;;  %vm756_vm8 = vweird.f32 %v737_v50 }
 0x373   :  { %v742_v47 = vmul.f32 %v1144_v46, %v741_v55 }
 0x375   :  { %v743_v48 = vmul.f32 0.5, %v742_v47  ;;  %v728_v49 = vpop.xlane.xlu0 %727 }
 0x376   :  { %v734_v52 = vmul.f32 %v728_v49, %v1592_v19 }
 0x377   :  { %v744_v53 = vsub.f32 1.5, %v743_v48 }
 0x378   :  { %v1146_v54 = vpop.eup %1145  ;;  %v738_v51 = vadd.f32 1e-05, %v734_v52 }
 0x379   :  { %v745_v61 = vmul.f32 %v1144_v46, %v744_v53  ;;  %v751_v57 = vmul.f32 %v1146_v54, %v737_v50  ;;  %vm757_vm7 = vweird.f32 %v1146_v54  ;;  %v1114_v53 = vld [vmem:[#allocation11] ss:$0 sm:$0xff] }
 0x37a   :  { %1147 = vrsqrt.f32 %v738_v51  ;;  %vm758_vm9 = vmor %vm756_vm8, %vm757_vm7  ;;  %vm766_vm11 = vweird.f32 %v738_v51 }
 0x37b   :  { %v749_v60 = vsel %vm748_vm6, %v1144_v46, %v745_v61  ;;  %v752_v62 = vmul.f32 %v1146_v54, %v751_v57 }
 0x37c   :  { %v780_v63 = vmul.f32 %v749_v60, %v712_v20 }
 0x37d   :  { %v753_v2 = vmul.f32 0.5, %v752_v62  ;;  %v731_v3 = vpop.xlane.xlu1 %730 }
 0x37e   :  { %v787_v6 = vmul.f32 %v1620_v56, %v780_v63  ;;  %v735_v7 = vmul.f32 %v731_v3, %v1592_v19 }
 0x37f   :  { %v754_v9 = vsub.f32 1.5, %v753_v2 }
 0x380   :  { %v1148_v5 = vpop.eup %1147  ;;  %v739_v12 = vadd.f32 1e-05, %v735_v7  ;;  %v1639_v13 = vadd.f32 %v1112_v0, %v787_v6 }
 0x381   :  { %v755_v14 = vmul.f32 %v1146_v54, %v754_v9  ;;  %v761_v15 = vmul.f32 %v1148_v5, %v738_v51  ;;  %vm767_vm10 = vweird.f32 %v1148_v5 }
 0x382   :  { %1149 = vrsqrt.f32 %v739_v12  ;;  %1084 = vmatmul.msk.f32.vlgmr.msrb.gmra.mxu3 %vm146_vm0, %v1639_v13  ;;  %vm768_vm12 = vmor %vm766_vm11, %vm767_vm10  ;;  %vm776_vm14 = vweird.f32 %v739_v12 }
 0x383   :  { %v759_v17 = vsel %vm758_vm9, %v1146_v54, %v755_v14  ;;  %v762_v4 = vmul.f32 %v1148_v5, %v761_v15 }
 0x384   :  { %v781_v18 = vmul.f32 %v759_v17, %v1597_v24 }
 0x385   :  { %v763_v20 = vmul.f32 0.5, %v762_v4 }
 0x386   :  { %v788_v21 = vmul.f32 %v1620_v56, %v781_v18 }
 0x387   :  { %v764_v10 = vsub.f32 1.5, %v763_v20 }
 0x388   :  { %v1150_v22 = vpop.eup %1149  ;;  %v795_v23 = vadd.f32 %v1112_v0, %v788_v21 }
 0x389   :  { %v765_v25 = vmul.f32 %v1148_v5, %v764_v10  ;;  %v771_v26 = vmul.f32 %v1150_v22, %v739_v12  ;;  %vm777_vm13 = vweird.f32 %v1150_v22 }
 0x38a   :  { %1085 = vmatmul.msk.f32.gmra.mxu3 %vm146_vm0, %v795_v23  ;;  %vm778_vm15 = vmor %vm776_vm14, %vm777_vm13 }
 0x38b   :  { %v769_v27 = vsel %vm768_vm12, %v1148_v5, %v765_v25  ;;  %v772_v28 = vmul.f32 %v1150_v22, %v771_v26 }
 0x38c   :  { %v782_v30 = vmul.f32 %v769_v27, %v1603_v29  ;;  %v852_v29 = vld [vmem:[%s1715_s8 + $0x8] sm:$0xff] }
 0x38d   :  { %v773_v31 = vmul.f32 0.5, %v772_v28  ;;  %890 = vmatpush.msrb.mxu0 %v852_v29 }
 0x38e   :  { %v789_v24 = vmul.f32 %v1620_v56, %v782_v30 }
 0x38f   :  { %v774_v32 = vsub.f32 1.5, %v773_v31  ;;  %891 = vmatpush.msrb.mxu0 %v851_v40 }
 0x390   :  { %v796_v33 = vadd.f32 %v1112_v0, %v789_v24 }
 0x391   :  { %v775_v35 = vmul.f32 %v1150_v22, %v774_v32 }
 0x392   :  { %1086 = vmatmul.msk.f32.gmra.mxu3 %vm146_vm0, %v796_v33 }
 0x393   :  { %v779_v36 = vsel %vm778_vm15, %v1150_v22, %v775_v35 }
 0x394   :  { %v783_v37 = vmul.f32 %v779_v36, %v1609_v34 }
 0x396   :  { %v790_v38 = vmul.f32 %v1620_v56, %v783_v37 }
 0x398   :  { %v797_v39 = vadd.f32 %v1112_v0, %v790_v38 }
 0x39a   :  { %1087 = vmatmul.msk.f32.gmra.mxu3 %vm146_vm0, %v797_v39 }
 0x405   :  { %v835_v42 = vpop.f32.mrf.mxu3 }
 0x406   :  { %v836_v43 = vadd.f32 %v1113_v41, %v835_v42 }
 0x408   :  { %v847_v34 = vmax.f32 %v836_v43, 0.0 }
 0x40a   :  { %1088 = vmatmul.msk.f32.vlgmr.msrb.gmra.mxu0 %vm863_vm1, %v847_v34 }
 0x40d   :  { %v838_v44 = vpop.f32.mrf.mxu3 }
 0x40e   :  { %v839_v45 = vadd.f32 %v1113_v41, %v838_v44  ;;  %v1115_v44 = vld [vmem:[%s1717_s10] ss:$0 sm:$0xff] }
 0x410   :  { %v848_v46 = vmax.f32 %v839_v45, 0.0 }
 0x412   :  { %1089 = vmatmul.msk.f32.gmra.mxu0 %vm863_vm1, %v848_v46 }
 0x415   :  { %v841_v50 = vpop.f32.mrf.mxu3 }
 0x416   :  { %v842_v55 = vadd.f32 %v1113_v41, %v841_v50  ;;  %v1116_v50 = vld [vmem:[%s1717_s10 + $0x1] ss:$0 sm:$0xff]  ;;  %s1346_s10 = smov [#allocation13]  }
 0x417   :  { %s1023_s4 = sshll.u32 %s1346_s10, 4  ;;  %s1024_s4 = int_to_ptr.vmem [resolvable:$true] %s1023_s4 }
 0x418   :  { %v849_v47 = vmax.f32 %v842_v55, 0.0 }
 0x41a   :  { %1090 = vmatmul.msk.f32.gmra.mxu0 %vm863_vm1, %v849_v47 }
 0x41d   :  { %v844_v48 = vpop.f32.mrf.mxu3 }
 0x41e   :  { %v845_v49 = vadd.f32 %v1113_v41, %v844_v48 }
 0x420   :  { %v850_v52 = vmax.f32 %v845_v49, 0.0 }
 0x422   :  { %1091 = vmatmul.msk.f32.gmra.mxu0 %vm863_vm1, %v850_v52 }
 0x487   :  { %v893_v54 = vpop.f32.mrf.mxu0 }
 0x488   :  { %v894_v51 = vadd.f32 %v1114_v53, %v893_v54 }
 0x48a   :  { %v905_v56 = vadd.f32 %v894_v51, %v1639_v13 }
 0x48c   :  { %v912_v61 = vsel %vm146_vm0, %v905_v56, 0.0 }
 0x48d   :  { %913 = vadd.xlane.f32.xlu2 %v912_v61 }
 0x48f   :  { %v896_v57 = vpop.f32.mrf.mxu0 }
 0x490   :  { %v897_v58 = vadd.f32 %v1114_v53, %v896_v57 }
 0x492   :  { %v906_v59 = vadd.f32 %v897_v58, %v795_v23 }
 0x494   :  { %v915_v60 = vsel %vm146_vm0, %v906_v59, 0.0 }
 0x495   :  { %916 = vadd.xlane.f32.xlu0 %v915_v60 }
 0x497   :  { %v899_v62 = vpop.f32.mrf.mxu0 }
 0x498   :  { %v900_v63 = vadd.f32 %v1114_v53, %v899_v62 }
 0x49a   :  { %v907_v0 = vadd.f32 %v900_v63, %v796_v33 }
 0x49c   :  { %v918_v1 = vsel %vm146_vm0, %v907_v0, 0.0 }
 0x49d   :  { %919 = vadd.xlane.f32.xlu1 %v918_v1 }
 0x49f   :  { %v902_v2 = vpop.f32.mrf.mxu0 }
 0x4a0   :  { %v903_v3 = vadd.f32 %v1114_v53, %v902_v2 }
 0x4a2   :  { %v908_v6 = vadd.f32 %v903_v3, %v797_v39 }
 0x4a4   :  { %v921_v7 = vsel %vm146_vm0, %v908_v6, 0.0 }
 0x4a5   :  { %922 = vadd.xlane.f32.xlu2 %v921_v7 }
 0x500   :  { %v914_v8 = vpop.xlane.xlu2 %913 }
 0x501   :  { %v924_v9 = vmul.f32 %v914_v8, %v1592_v19 }
 0x503   :  { %v928_v5 = vsub.f32 %v905_v56, %v924_v9 }
 0x505   :  { %v932_v12 = vmul.f32 %v928_v5, %v928_v5 }
 0x507   :  { %v936_v13 = vsel %vm146_vm0, %v932_v12, 0.0 }
 0x508   :  { %937 = vadd.xlane.f32.xlu0 %v936_v13  ;;  %v917_v11 = vpop.xlane.xlu0 %916 }
 0x509   :  { %v925_v14 = vmul.f32 %v917_v11, %v1592_v19 }
 0x50b   :  { %v929_v15 = vsub.f32 %v906_v59, %v925_v14 }
 0x50d   :  { %v933_v16 = vmul.f32 %v929_v15, %v929_v15 }
 0x50f   :  { %v939_v17 = vsel %vm146_vm0, %v933_v16, 0.0 }
 0x510   :  { %v920_v4 = vpop.xlane.xlu1 %919  ;;  %940 = vadd.xlane.f32.xlu1 %v939_v17 }
 0x511   :  { %v926_v18 = vmul.f32 %v920_v4, %v1592_v19 }
 0x513   :  { %v1674_v20 = vsub.f32 %v907_v0, %v926_v18 }
 0x515   :  { %v934_v21 = vmul.f32 %v1674_v20, %v1674_v20 }
 0x517   :  { %v942_v10 = vsel %vm146_vm0, %v934_v21, 0.0 }
 0x518   :  { %v923_v22 = vpop.xlane.xlu2 %922  ;;  %943 = vadd.xlane.f32.xlu2 %v942_v10 }
 0x519   :  { %v927_v23 = vmul.f32 %v923_v22, %v1592_v19 }
 0x51b   :  { %v1680_v25 = vsub.f32 %v908_v6, %v927_v23 }
 0x51d   :  { %v935_v26 = vmul.f32 %v1680_v25, %v1680_v25 }
 0x51f   :  { %v945_v27 = vsel %vm146_vm0, %v935_v26, 0.0 }
 0x520   :  { %946 = vadd.xlane.f32.xlu0 %v945_v27 }
 0x57b   :  { %v938_v28 = vpop.xlane.xlu0 %937 }
 0x57c   :  { %v948_v30 = vmul.f32 %v938_v28, %v1592_v19 }
 0x57e   :  { %v952_v31 = vadd.f32 1e-05, %v948_v30 }
 0x580   :  { %1151 = vrsqrt.f32 %v952_v31  ;;  %vm962_vm3 = vweird.f32 %v952_v31 }
 0x583   :  { %v941_v24 = vpop.xlane.xlu1 %940 }
 0x584   :  { %v949_v32 = vmul.f32 %v941_v24, %v1592_v19 }
 0x586   :  { %v1152_v33 = vpop.eup %1151  ;;  %v953_v35 = vadd.f32 1e-05, %v949_v32 }
 0x587   :  { %v957_v36 = vmul.f32 %v1152_v33, %v952_v31  ;;  %vm963_vm2 = vweird.f32 %v1152_v33 }
 0x588   :  { %1153 = vrsqrt.f32 %v953_v35  ;;  %vm964_vm4 = vmor %vm962_vm3, %vm963_vm2  ;;  %vm972_vm6 = vweird.f32 %v953_v35 }
 0x589   :  { %v958_v37 = vmul.f32 %v1152_v33, %v957_v36 }
 0x58b   :  { %v959_v38 = vmul.f32 0.5, %v958_v37  ;;  %v944_v39 = vpop.xlane.xlu2 %943 }
 0x58c   :  { %v950_v29 = vmul.f32 %v944_v39, %v1592_v19 }
 0x58d   :  { %v960_v40 = vsub.f32 1.5, %v959_v38 }
 0x58e   :  { %v1154_v41 = vpop.eup %1153  ;;  %v954_v42 = vadd.f32 1e-05, %v950_v29 }
 0x58f   :  { %v961_v43 = vmul.f32 %v1152_v33, %v960_v40  ;;  %v967_v34 = vmul.f32 %v1154_v41, %v953_v35  ;;  %vm973_vm5 = vweird.f32 %v1154_v41 }
 0x590   :  { %1155 = vrsqrt.f32 %v954_v42  ;;  %vm974_vm7 = vmor %vm972_vm6, %vm973_vm5  ;;  %vm982_vm9 = vweird.f32 %v954_v42 }
 0x591   :  { %v965_v45 = vsel %vm964_vm4, %v1152_v33, %v961_v43  ;;  %v968_v46 = vmul.f32 %v1154_v41, %v967_v34 }
 0x592   :  { %v996_v55 = vmul.f32 %v965_v45, %v928_v5 }
 0x593   :  { %v969_v47 = vmul.f32 0.5, %v968_v46  ;;  %v947_v48 = vpop.xlane.xlu0 %946 }
 0x594   :  { %v1003_v49 = vmul.f32 %v1115_v44, %v996_v55  ;;  %v951_v52 = vmul.f32 %v947_v48, %v1592_v19 }
 0x595   :  { %v970_v53 = vsub.f32 1.5, %v969_v47 }
 0x596   :  { %v1156_v54 = vpop.eup %1155  ;;  %v1010_v51 = vadd.f32 %v1116_v50, %v1003_v49  ;;  %v955_v56 = vadd.f32 1e-05, %v951_v52 }
 0x597   :  { %v971_v61 = vmul.f32 %v1154_v41, %v970_v53  ;;  %v977_v57 = vmul.f32 %v1156_v54, %v954_v42  ;;  %vm983_vm8 = vweird.f32 %v1156_v54 }
 0x598   :  { %1014 = vst.msk [vmem:[#allocation13] sm:$0xff] %vm146_vm0, %v1010_v51  ;;  %1157 = vrsqrt.f32 %v955_v56  ;;  %vm984_vm10 = vmor %vm982_vm9, %vm983_vm8  ;;  %vm992_vm12 = vweird.f32 %v955_v56 }
 0x599   :  { %v975_v58 = vsel %vm974_vm7, %v1154_v41, %v971_v61  ;;  %v978_v59 = vmul.f32 %v1156_v54, %v977_v57 }
 0x59a   :  { %v997_v60 = vmul.f32 %v975_v58, %v929_v15 }
 0x59b   :  { %v979_v62 = vmul.f32 0.5, %v978_v59 }
 0x59c   :  { %v1004_v63 = vmul.f32 %v1115_v44, %v997_v60 }
 0x59d   :  { %v980_v0 = vsub.f32 1.5, %v979_v62 }
 0x59e   :  { %v1158_v19 = vpop.eup %1157  ;;  %v1011_v1 = vadd.f32 %v1116_v50, %v1004_v63 }
 0x59f   :  { %v981_v2 = vmul.f32 %v1156_v54, %v980_v0  ;;  %v987_v3 = vmul.f32 %v1158_v19, %v955_v56  ;;  %vm993_vm11 = vweird.f32 %v1158_v19 }
 0x5a0   :  { %1015 = vst.msk [vmem:[#allocation13 + $0x8] sm:$0xff] %vm146_vm0, %v1011_v1  ;;  %vm994_vm13 = vmor %vm992_vm12, %vm993_vm11 }
 0x5a1   :  { %v985_v6 = vsel %vm984_vm10, %v1156_v54, %v981_v2  ;;  %v988_v7 = vmul.f32 %v1158_v19, %v987_v3 }
 0x5a2   :  { %v998_v8 = vmul.f32 %v985_v6, %v1674_v20 }
 0x5a3   :  { %v989_v9 = vmul.f32 0.5, %v988_v7 }
 0x5a4   :  { %v1005_v5 = vmul.f32 %v1115_v44, %v998_v8 }
 0x5a5   :  { %v990_v12 = vsub.f32 1.5, %v989_v9 }
 0x5a6   :  { %v1012_v13 = vadd.f32 %v1116_v50, %v1005_v5 }
 0x5a7   :  { %v991_v11 = vmul.f32 %v1158_v19, %v990_v12 }
 0x5a8   :  { %1017 = vst.msk [vmem:[#allocation13 + $0x10] sm:$0xff] %vm146_vm0, %v1012_v13 }
 0x5a9   :  { %v995_v14 = vsel %vm994_vm13, %v1158_v19, %v991_v11 }
 0x5aa   :  { %v999_v15 = vmul.f32 %v995_v14, %v1680_v25 }
 0x5ac   :  { %v1006_v16 = vmul.f32 %v1115_v44, %v999_v15 }
 0x5ae   :  { %v1013_v17 = vadd.f32 %v1116_v50, %v1006_v16 }
 0x5b0   :  { %1018 = vst.msk [vmem:[#allocation13 + $0x18] sm:$0xff] %vm146_vm0, %v1013_v17 }
 0x5b1   :  { %1031 = dma.vmem_to_hbm [thread:$0]  %s1024_s4, 512, %s1026_s2, [#allocation4], %s1338_s16, %s1338_s16, %s1339_s17  }
 0x5b2   :  { %1335 = dma.done.wait [#allocation4], 512  }
 0x5b3   :  { %1336 = vsyncadd [#allocation4], 4294966784 }
 0x5b4   :  { %1036 = vsyncpa [#allocation3], 1 }
 0x5b5   :  { %1037 = vsyncpa [#allocation6], 1 }
 0x5b6   :  { %1038 = vsyncpa [#allocation9], 1 }
 0x5b7   :  { %1039 = vsyncpa [#allocation12], 1 }
 0x5b8   :  { %1040 = vsyncpa [#allocation4], 1 }

</bundles_post_ra>
